<compile_context>
chip_gen: v7x
topology: tpu7x:2x2x1
jax: 0.10.0
libtpu: 0.0.40
codegen_flags: <defaults>
</compile_context>

<pallas_src>
import functools

import jax
import jax.numpy as jnp
import numpy as np
from jax.experimental import pallas as pl
from jax.experimental.pallas import tpu as pltpu

LAYERS = 3           # layers_num
MED_C = 4            # med_channels
BATCH, HEIGHT, WIDTH = 2, 16, 16


# ------------------------------ fused kernel -------------------------------
def _fused_reactionnet_kernel(scal_ref, x_ref, r_ref, w_ref, m_ref, o_ref,
                              stack_ref, *, layers, rows, h, w):
    """All layers fused; activations/weights stay VMEM/vreg resident.

    Activations: (rows, n) = (B*C, H*W) f32.  Each row is one (batch, channel)
    image flattened h*W+w, so the 3x3 'same' conv is 9 masked lane-rolls
    (im2col into a VMEM scratch) + ONE MXU contraction per conv, with the bias
    folded in via a constant ones-row in the scratch / bias column in the
    weights (K = 9*rows + 8 pad).
    """
    n = h * w
    ntap = 9

    # One-time init of the scratch's padding rows:
    #   row 9*rows           = ones  -> multiplied by the bias column of wmat
    #   rows 9*rows+1 .. +7  = zeros -> padded (zero) weight columns contribute 0
    sub = jax.lax.broadcasted_iota(jnp.int32, (8, n), 0)
    stack_ref[pl.ds(ntap * rows, 8), :] = jnp.where(sub == 0, 1.0, 0.0).astype(jnp.float32)

    masks = m_ref[...]            # (16, n): rows 0..8 = per-tap validity masks
    reaction = r_ref[...]
    out = x_ref[...]              # (rows, n)

    shifts = []
    for oy in (-1, 0, 1):
        for ox in (-1, 0, 1):
            shifts.append((-(oy * w + ox)) % n)

    def conv3x3(act, wmat):
        # im2col: tap t occupies scratch rows [t*rows, (t+1)*rows)
        for t, s in enumerate(shifts):
            rolled = act if s == 0 else pltpu.roll(act, shift=s, axis=1)
            if t != 4:                       # centre-tap mask is all ones: skip multiply
                rolled = rolled * masks[t:t + 1, :]
            stack_ref[pl.ds(t * rows, rows), :] = rolled
        # Single wide-K MXU contraction: conv taps + bias accumulate in one matmul.
        return jnp.dot(wmat, stack_ref[...],
                       preferred_element_type=jnp.float32,
                       precision=jax.lax.Precision.HIGHEST)

    for l in range(layers):                  # static unroll (3 layers)
        s1 = scal_ref[l, 0]                  # blk_alpha * tanh(-phi)
        s2 = scal_ref[l, 1]                  # blk_beta * psi * tanh(psi)
        hid = jnp.maximum(conv3x3(out, w_ref[2 * l]), 0.0)
        f = conv3x3(hid, w_ref[2 * l + 1])
        out = s1 * f + s2 * (reaction - out) + out
    o_ref[...] = out


# ------------------------------- wrapper ------------------------------------
def interlayers_forward(x_nchw, reaction_nchw, params, layers_num):
    b, c, hh, ww = x_nchw.shape
    rows, n = b * c, hh * ww
    kpad = 9 * rows + 8                      # 72 taps + 1 bias row + 7 zero pad

    # (B*C, H*W) is a pure reshape of contiguous NCHW -> no runtime transposes.
    x_rc = x_nchw.reshape(rows, n).astype(jnp.float32)
    r_rc = reaction_nchw.reshape(rows, n).astype(jnp.float32)

    # ----- compile-time constant packing (numpy on concrete params) -----------
    def _f(v):                               # (1,)-shaped param -> python float
        return float(np.asarray(v).ravel()[0])

    sa1 = 1.0 / (1.0 + np.exp(-_f(params["alpha1"])))
    sb1 = 1.0 / (1.0 + np.exp(-_f(params["beta1"])))
    tc1, tcc1 = np.tanh(_f(params["c1"])), np.tanh(_f(params["cc1"]))
    scal = np.zeros((layers_num, 2), np.float32)       # SMEM gate scalars
    for i in range(layers_num):
        phi = tc1 * (i + 1.0) ** (-sa1)
        psi = tcc1 * (i + 1.0) ** (-sb1)
        blk = params["blocks"][i]
        scal[i, 0] = _f(blk["alpha"]) * np.tanh(-phi)
        scal[i, 1] = _f(blk["beta"]) * psi * np.tanh(psi)

    # Block-diagonal (over batch) per-tap weights + bias column, all layers and
    # both convs packed into ONE (2L, rows, kpad) operand.
    w_all = np.zeros((2 * layers_num, rows, kpad), np.float32)
    for l in range(layers_num):
        blk = params["blocks"][l]
        for j, (wk, bk) in enumerate((("w1", "b1"), ("w2", "b2"))):
            wnp = np.asarray(blk[wk], np.float32)      # (Co, Ci, 3, 3) OIHW
            bnp = np.asarray(blk[bk], np.float32)      # (Co,)
            dst = w_all[2 * l + j]
            for t in range(9):
                dy, dx = t // 3, t % 3
                for bi in range(b):
                    dst[bi * c:(bi + 1) * c,
                        t * rows + bi * c:t * rows + (bi + 1) * c] = wnp[:, :, dy, dx]
            dst[:, 9 * rows] = np.tile(bnp, b)         # bias column (hits ones-row)

    # Per-tap out-of-image masks over the H*W lanes, packed in one (16, n) block.
    masks = np.zeros((16, n), np.float32)
    lane = np.arange(n)
    hp, wp = lane // ww, lane % ww
    t = 0
    for oy in (-1, 0, 1):
        for ox in (-1, 0, 1):
            masks[t] = (((hp + oy) >= 0) & ((hp + oy) < hh) &
                        ((wp + ox) >= 0) & ((wp + ox) < ww)).astype(np.float32)
            t += 1

    kernel = functools.partial(_fused_reactionnet_kernel,
                               layers=layers_num, rows=rows, h=hh, w=ww)

    out_rc = pl.pallas_call(
        kernel,
        out_shape=jax.ShapeDtypeStruct((rows, n), jnp.float32),
        grid_spec=pltpu.PrefetchScalarGridSpec(
            num_scalar_prefetch=0,
            grid=(1,),
            in_specs=[
                pl.BlockSpec(memory_space=pltpu.SMEM),                          # gates (L,2)
                pl.BlockSpec((rows, n), lambda i: (0, 0)),                      # x
                pl.BlockSpec((rows, n), lambda i: (0, 0)),                      # reaction
                pl.BlockSpec((2 * layers_num, rows, kpad), lambda i: (0, 0, 0)),  # w+b packed
                pl.BlockSpec((16, n), lambda i: (0, 0)),                        # tap masks
            ],
            out_specs=pl.BlockSpec((rows, n), lambda i: (0, 0)),
            scratch_shapes=[pltpu.VMEM((kpad, n), jnp.float32)],                # im2col stack
        ),
        compiler_params=pltpu.CompilerParams(
            dimension_semantics=("arbitrary",)),        # single TensorCore on purpose
        cost_estimate=pl.CostEstimate(flops=2_100_000, transcendentals=0,
                                      bytes_accessed=56_000),
    )(scal, x_rc, r_rc, w_all, masks)

    return out_rc.reshape(b, c, hh, ww)                 # pure reshape back to NCHW


# ------------------------- pure-JAX reference forward -----------------------
def _conv3x3_nchw(x, w_oihw, bias):
    y = jax.lax.conv_general_dilated(
        x, w_oihw, window_strides=(1, 1), padding="SAME",
        dimension_numbers=("NCHW", "OIHW", "NCHW"),
        precision=jax.lax.Precision.HIGHEST)
    return y + bias[None, :, None, None]


def reference_forward(x, reaction, params, layers_num):
    out = x.astype(jnp.float32)
    r = reaction.astype(jnp.float32)
    for i in range(layers_num):
        phi = jnp.tanh(params["c1"]) * (i + 1.0) ** (-jax.nn.sigmoid(params["alpha1"]))
        psi = jnp.tanh(params["cc1"]) * (i + 1.0) ** (-jax.nn.sigmoid(params["beta1"]))
        blk = params["blocks"][i]
        hid = jax.nn.relu(_conv3x3_nchw(out, blk["w1"], blk["b1"]))
        f = _conv3x3_nchw(hid, blk["w2"], blk["b2"])
        out = (blk["alpha"] * jnp.tanh(-phi) * f
               + blk["beta"] * psi * jnp.tanh(psi) * (r - out) + out)
    return out


# ------------------------------ params init ---------------------------------
def init_params(key, layers_num, ch):
    params = {
        "alpha1": jnp.full((1,), 0.5, jnp.float32),
        "beta1": jnp.full((1,), 0.5, jnp.float32),
        "c1": jnp.full((1,), 1.0, jnp.float32),
        "cc1": jnp.full((1,), 1.0, jnp.float32),
        "blocks": [],
    }
    for _ in range(layers_num):
        key, k1, k2, k3, k4 = jax.random.split(key, 5)
        params["blocks"].append({
            "w1": 0.1 * jax.random.normal(k1, (ch, ch, 3, 3), jnp.float32),   # OIHW
            "b1": 0.1 * jax.random.normal(k2, (ch,), jnp.float32),
            "w2": 0.1 * jax.random.normal(k3, (ch, ch, 3, 3), jnp.float32),
            "b2": 0.1 * jax.random.normal(k4, (ch,), jnp.float32),
            "alpha": jnp.full((1,), 1.0, jnp.float32),      # Block's learnable gates
            "beta": jnp.full((1,), 1.0, jnp.float32),
        })
    return params


# ---------------------------------- main -------------------------------------
if __name__ == "__main__":
    root = jax.random.PRNGKey(0)
    kp, kx, kr = jax.random.split(root, 3)

    params = init_params(kp, LAYERS, MED_C)
    x = jax.random.normal(kx, (BATCH, MED_C, HEIGHT, WIDTH), jnp.float32)        # NCHW
    reaction = jax.random.normal(kr, (BATCH, MED_C, HEIGHT, WIDTH), jnp.float32)

    fwd = jax.jit(functools.partial(interlayers_forward,
                                    params=params, layers_num=LAYERS))
    out = fwd(x, reaction)
    jax.block_until_ready(out)

    ref = reference_forward(x, reaction, params, LAYERS)
    # precision=HIGHEST keeps the MXU conv in full f32 (~1e-6 error vs the
    # lax.conv reference); tolerance left with headroom for MXU pass variation.
    np.testing.assert_allclose(np.asarray(out), np.asarray(ref),
                               rtol=5e-4, atol=5e-4)

    print("KERNEL_OK")
</pallas_src>

<mosaic_0001>
module attributes {stable_mosaic.version = 11 : i64} {
  func.func @_fused_reactionnet_kernel(%arg0: i32, %arg1: memref<3x2xf32, #tpu.memory_space<smem>>, %arg2: memref<8x256xf32, #tpu.memory_space<vmem>>, %arg3: memref<8x256xf32, #tpu.memory_space<vmem>>, %arg4: memref<6x8x80xf32, #tpu.memory_space<vmem>>, %arg5: memref<16x256xf32, #tpu.memory_space<vmem>>, %arg6: memref<8x256xf32, #tpu.memory_space<vmem>>, %arg7: memref<80x256xf32, #tpu.memory_space<vmem>>) attributes {dimension_semantics = [#tpu.dimension_semantics<arbitrary>], iteration_bounds = array<i64: 1>, scalar_prefetch = 0 : i64, scratch_operands = 1 : i64, tpu.core_type = #tpu.core_type<tc>, window_params = [{transform_indices = @transform_0, window_bounds = array<i64: 3, 2>}, {pipeline_mode = #tpu.pipeline_mode<synchronous>, transform_indices = @transform_1, window_bounds = array<i64: 8, 256>}, {pipeline_mode = #tpu.pipeline_mode<synchronous>, transform_indices = @transform_2, window_bounds = array<i64: 8, 256>}, {pipeline_mode = #tpu.pipeline_mode<synchronous>, transform_indices = @transform_3, window_bounds = array<i64: 6, 8, 80>}, {pipeline_mode = #tpu.pipeline_mode<synchronous>, transform_indices = @transform_4, window_bounds = array<i64: 16, 256>}, {pipeline_mode = #tpu.pipeline_mode<synchronous>, transform_indices = @transform_5, window_bounds = array<i64: 8, 256>}]} {
    %0 = tpu.iota {dimensions = array<i32: 0>} : vector<8x256xi32>
    %c0_i32 = arith.constant 0 : i32
    %1 = vector.broadcast %c0_i32 : i32 to vector<8x256xi32>
    %2 = arith.cmpi eq, %0, %1 : vector<8x256xi32>
    %cst = arith.constant 1.000000e+00 : f32
    %cst_0 = arith.constant 0.000000e+00 : f32
    %3 = vector.broadcast %cst : f32 to vector<8x256xf32>
    %4 = vector.broadcast %cst_0 : f32 to vector<8x256xf32>
    %5 = arith.select %2, %3, %4 : vector<8x256xi1>, vector<8x256xf32>
    %c72 = arith.constant 72 : index
    %c0 = arith.constant 0 : index
    %6 = vector.load %arg7[%c72, %c0] : memref<80x256xf32, #tpu.memory_space<vmem>>, vector<8x256xf32>
    tpu.vector_store %arg7[%c72, %c0], %5 {strides = array<i32>} : memref<80x256xf32, #tpu.memory_space<vmem>>, vector<8x256xf32>,
    %c0_1 = arith.constant 0 : index
    %c0_2 = arith.constant 0 : index
    %7 = vector.load %arg5[%c0_1, %c0_2] : memref<16x256xf32, #tpu.memory_space<vmem>>, vector<16x256xf32>
    %c0_3 = arith.constant 0 : index
    %c0_4 = arith.constant 0 : index
    %8 = vector.load %arg3[%c0_3, %c0_4] : memref<8x256xf32, #tpu.memory_space<vmem>>, vector<8x256xf32>
    %c0_5 = arith.constant 0 : index
    %c0_6 = arith.constant 0 : index
    %9 = vector.load %arg2[%c0_5, %c0_6] : memref<8x256xf32, #tpu.memory_space<vmem>>, vector<8x256xf32>
    %c0_7 = arith.constant 0 : index
    %c0_8 = arith.constant 0 : index
    %10 = memref.load %arg1[%c0_7, %c0_8] : memref<3x2xf32, #tpu.memory_space<smem>>
    %c0_9 = arith.constant 0 : index
    %c1 = arith.constant 1 : index
    %11 = memref.load %arg1[%c0_9, %c1] : memref<3x2xf32, #tpu.memory_space<smem>>
    %c0_10 = arith.constant 0 : index
    %c0_11 = arith.constant 0 : index
    %c0_12 = arith.constant 0 : index
    %12 = vector.load %arg4[%c0_10, %c0_11, %c0_12] : memref<6x8x80xf32, #tpu.memory_space<vmem>>, vector<1x8x80xf32>
    %13 = vector.shape_cast %12 : vector<1x8x80xf32> to vector<8x80xf32>
    %c17_i32 = arith.constant 17 : i32
    %14 = tpu.dynamic_rotate %9 by %c17_i32 dim 1 : vector<8x256xf32>, i32 -> vector<8x256xf32>
    %15 = vector.extract_strided_slice %7 {offsets = [0, 0], sizes = [1, 256], strides = [1, 1]} : vector<16x256xf32> to vector<1x256xf32>
    %16 = vector.broadcast %15 : vector<1x256xf32> to vector<8x256xf32>
    %17 = arith.mulf %14, %16 : vector<8x256xf32>
    %c0_13 = arith.constant 0 : index
    %c0_14 = arith.constant 0 : index
    %18 = vector.load %arg7[%c0_13, %c0_14] : memref<80x256xf32, #tpu.memory_space<vmem>>, vector<8x256xf32>
    tpu.vector_store %arg7[%c0_13, %c0_14], %17 {strides = array<i32>} : memref<80x256xf32, #tpu.memory_space<vmem>>, vector<8x256xf32>,
    %c16_i32 = arith.constant 16 : i32
    %19 = tpu.dynamic_rotate %9 by %c16_i32 dim 1 : vector<8x256xf32>, i32 -> vector<8x256xf32>
    %20 = vector.extract_strided_slice %7 {offsets = [1, 0], sizes = [1, 256], strides = [1, 1]} : vector<16x256xf32> to vector<1x256xf32>
    %21 = vector.broadcast %20 : vector<1x256xf32> to vector<8x256xf32>
    %22 = arith.mulf %19, %21 : vector<8x256xf32>
    %c8 = arith.constant 8 : index
    %c0_15 = arith.constant 0 : index
    %23 = vector.load %arg7[%c8, %c0_15] : memref<80x256xf32, #tpu.memory_space<vmem>>, vector<8x256xf32>
    tpu.vector_store %arg7[%c8, %c0_15], %22 {strides = array<i32>} : memref<80x256xf32, #tpu.memory_space<vmem>>, vector<8x256xf32>,
    %c15_i32 = arith.constant 15 : i32
    %24 = tpu.dynamic_rotate %9 by %c15_i32 dim 1 : vector<8x256xf32>, i32 -> vector<8x256xf32>
    %25 = vector.extract_strided_slice %7 {offsets = [2, 0], sizes = [1, 256], strides = [1, 1]} : vector<16x256xf32> to vector<1x256xf32>
    %26 = vector.broadcast %25 : vector<1x256xf32> to vector<8x256xf32>
    %27 = arith.mulf %24, %26 : vector<8x256xf32>
    %c16 = arith.constant 16 : index
    %c0_16 = arith.constant 0 : index
    %28 = vector.load %arg7[%c16, %c0_16] : memref<80x256xf32, #tpu.memory_space<vmem>>, vector<8x256xf32>
    tpu.vector_store %arg7[%c16, %c0_16], %27 {strides = array<i32>} : memref<80x256xf32, #tpu.memory_space<vmem>>, vector<8x256xf32>,
    %c1_i32 = arith.constant 1 : i32
    %29 = tpu.dynamic_rotate %9 by %c1_i32 dim 1 : vector<8x256xf32>, i32 -> vector<8x256xf32>
    %30 = vector.extract_strided_slice %7 {offsets = [3, 0], sizes = [1, 256], strides = [1, 1]} : vector<16x256xf32> to vector<1x256xf32>
    %31 = vector.broadcast %30 : vector<1x256xf32> to vector<8x256xf32>
    %32 = arith.mulf %29, %31 : vector<8x256xf32>
    %c24 = arith.constant 24 : index
    %c0_17 = arith.constant 0 : index
    %33 = vector.load %arg7[%c24, %c0_17] : memref<80x256xf32, #tpu.memory_space<vmem>>, vector<8x256xf32>
    tpu.vector_store %arg7[%c24, %c0_17], %32 {strides = array<i32>} : memref<80x256xf32, #tpu.memory_space<vmem>>, vector<8x256xf32>,
    %c32 = arith.constant 32 : index
    %c0_18 = arith.constant 0 : index
    %34 = vector.load %arg7[%c32, %c0_18] : memref<80x256xf32, #tpu.memory_space<vmem>>, vector<8x256xf32>
    tpu.vector_store %arg7[%c32, %c0_18], %9 {strides = array<i32>} : memref<80x256xf32, #tpu.memory_space<vmem>>, vector<8x256xf32>,
    %c255_i32 = arith.constant 255 : i32
    %35 = tpu.dynamic_rotate %9 by %c255_i32 dim 1 : vector<8x256xf32>, i32 -> vector<8x256xf32>
    %36 = vector.extract_strided_slice %7 {offsets = [5, 0], sizes = [1, 256], strides = [1, 1]} : vector<16x256xf32> to vector<1x256xf32>
    %37 = vector.broadcast %36 : vector<1x256xf32> to vector<8x256xf32>
    %38 = arith.mulf %35, %37 : vector<8x256xf32>
    %c40 = arith.constant 40 : index
    %c0_19 = arith.constant 0 : index
    %39 = vector.load %arg7[%c40, %c0_19] : memref<80x256xf32, #tpu.memory_space<vmem>>, vector<8x256xf32>
    tpu.vector_store %arg7[%c40, %c0_19], %38 {strides = array<i32>} : memref<80x256xf32, #tpu.memory_space<vmem>>, vector<8x256xf32>,
    %c241_i32 = arith.constant 241 : i32
    %40 = tpu.dynamic_rotate %9 by %c241_i32 dim 1 : vector<8x256xf32>, i32 -> vector<8x256xf32>
    %41 = vector.extract_strided_slice %7 {offsets = [6, 0], sizes = [1, 256], strides = [1, 1]} : vector<16x256xf32> to vector<1x256xf32>
    %42 = vector.broadcast %41 : vector<1x256xf32> to vector<8x256xf32>
    %43 = arith.mulf %40, %42 : vector<8x256xf32>
    %c48 = arith.constant 48 : index
    %c0_20 = arith.constant 0 : index
    %44 = vector.load %arg7[%c48, %c0_20] : memref<80x256xf32, #tpu.memory_space<vmem>>, vector<8x256xf32>
    tpu.vector_store %arg7[%c48, %c0_20], %43 {strides = array<i32>} : memref<80x256xf32, #tpu.memory_space<vmem>>, vector<8x256xf32>,
    %c240_i32 = arith.constant 240 : i32
    %45 = tpu.dynamic_rotate %9 by %c240_i32 dim 1 : vector<8x256xf32>, i32 -> vector<8x256xf32>
    %46 = vector.extract_strided_slice %7 {offsets = [7, 0], sizes = [1, 256], strides = [1, 1]} : vector<16x256xf32> to vector<1x256xf32>
    %47 = vector.broadcast %46 : vector<1x256xf32> to vector<8x256xf32>
    %48 = arith.mulf %45, %47 : vector<8x256xf32>
    %c56 = arith.constant 56 : index
    %c0_21 = arith.constant 0 : index
    %49 = vector.load %arg7[%c56, %c0_21] : memref<80x256xf32, #tpu.memory_space<vmem>>, vector<8x256xf32>
    tpu.vector_store %arg7[%c56, %c0_21], %48 {strides = array<i32>} : memref<80x256xf32, #tpu.memory_space<vmem>>, vector<8x256xf32>,
    %c239_i32 = arith.constant 239 : i32
    %50 = tpu.dynamic_rotate %9 by %c239_i32 dim 1 : vector<8x256xf32>, i32 -> vector<8x256xf32>
    %51 = vector.extract_strided_slice %7 {offsets = [8, 0], sizes = [1, 256], strides = [1, 1]} : vector<16x256xf32> to vector<1x256xf32>
    %52 = vector.broadcast %51 : vector<1x256xf32> to vector<8x256xf32>
    %53 = arith.mulf %50, %52 : vector<8x256xf32>
    %c64 = arith.constant 64 : index
    %c0_22 = arith.constant 0 : index
    %54 = vector.load %arg7[%c64, %c0_22] : memref<80x256xf32, #tpu.memory_space<vmem>>, vector<8x256xf32>
    tpu.vector_store %arg7[%c64, %c0_22], %53 {strides = array<i32>} : memref<80x256xf32, #tpu.memory_space<vmem>>, vector<8x256xf32>,
    %c0_23 = arith.constant 0 : index
    %c0_24 = arith.constant 0 : index
    %55 = vector.load %arg7[%c0_23, %c0_24] : memref<80x256xf32, #tpu.memory_space<vmem>>, vector<80x256xf32>
    %cst_25 = arith.constant dense<0.000000e+00> : vector<8x256xf32>
    %56 = tpu.matmul %13, %55, %cst_25 {dimension_numbers = #tpu.dot_dimension_numbers<[1], [0], [0], [1], [0, 0, 1, 1], [], []>, precision = #tpu.contract_precision<fp32>} : vector<8x80xf32>, vector<80x256xf32>, vector<8x256xf32> -> vector<8x256xf32>
    %cst_26 = arith.constant 0.000000e+00 : f32
    %57 = vector.broadcast %cst_26 : f32 to vector<8x256xf32>
    %58 = arith.maximumf %56, %57 : vector<8x256xf32>
    %c1_27 = arith.constant 1 : index
    %c0_28 = arith.constant 0 : index
    %c0_29 = arith.constant 0 : index
    %59 = vector.load %arg4[%c1_27, %c0_28, %c0_29] : memref<6x8x80xf32, #tpu.memory_space<vmem>>, vector<1x8x80xf32>
    %60 = vector.shape_cast %59 : vector<1x8x80xf32> to vector<8x80xf32>
    %c17_i32_30 = arith.constant 17 : i32
    %61 = tpu.dynamic_rotate %58 by %c17_i32_30 dim 1 : vector<8x256xf32>, i32 -> vector<8x256xf32>
    %62 = vector.extract_strided_slice %7 {offsets = [0, 0], sizes = [1, 256], strides = [1, 1]} : vector<16x256xf32> to vector<1x256xf32>
    %63 = vector.broadcast %62 : vector<1x256xf32> to vector<8x256xf32>
    %64 = arith.mulf %61, %63 : vector<8x256xf32>
    %c0_31 = arith.constant 0 : index
    %c0_32 = arith.constant 0 : index
    %65 = vector.load %arg7[%c0_31, %c0_32] : memref<80x256xf32, #tpu.memory_space<vmem>>, vector<8x256xf32>
    tpu.vector_store %arg7[%c0_31, %c0_32], %64 {strides = array<i32>} : memref<80x256xf32, #tpu.memory_space<vmem>>, vector<8x256xf32>,
    %c16_i32_33 = arith.constant 16 : i32
    %66 = tpu.dynamic_rotate %58 by %c16_i32_33 dim 1 : vector<8x256xf32>, i32 -> vector<8x256xf32>
    %67 = vector.extract_strided_slice %7 {offsets = [1, 0], sizes = [1, 256], strides = [1, 1]} : vector<16x256xf32> to vector<1x256xf32>
    %68 = vector.broadcast %67 : vector<1x256xf32> to vector<8x256xf32>
    %69 = arith.mulf %66, %68 : vector<8x256xf32>
    %c8_34 = arith.constant 8 : index
    %c0_35 = arith.constant 0 : index
    %70 = vector.load %arg7[%c8_34, %c0_35] : memref<80x256xf32, #tpu.memory_space<vmem>>, vector<8x256xf32>
    tpu.vector_store %arg7[%c8_34, %c0_35], %69 {strides = array<i32>} : memref<80x256xf32, #tpu.memory_space<vmem>>, vector<8x256xf32>,
    %c15_i32_36 = arith.constant 15 : i32
    %71 = tpu.dynamic_rotate %58 by %c15_i32_36 dim 1 : vector<8x256xf32>, i32 -> vector<8x256xf32>
    %72 = vector.extract_strided_slice %7 {offsets = [2, 0], sizes = [1, 256], strides = [1, 1]} : vector<16x256xf32> to vector<1x256xf32>
    %73 = vector.broadcast %72 : vector<1x256xf32> to vector<8x256xf32>
    %74 = arith.mulf %71, %73 : vector<8x256xf32>
    %c16_37 = arith.constant 16 : index
    %c0_38 = arith.constant 0 : index
    %75 = vector.load %arg7[%c16_37, %c0_38] : memref<80x256xf32, #tpu.memory_space<vmem>>, vector<8x256xf32>
    tpu.vector_store %arg7[%c16_37, %c0_38], %74 {strides = array<i32>} : memref<80x256xf32, #tpu.memory_space<vmem>>, vector<8x256xf32>,
    %c1_i32_39 = arith.constant 1 : i32
    %76 = tpu.dynamic_rotate %58 by %c1_i32_39 dim 1 : vector<8x256xf32>, i32 -> vector<8x256xf32>
    %77 = vector.extract_strided_slice %7 {offsets = [3, 0], sizes = [1, 256], strides = [1, 1]} : vector<16x256xf32> to vector<1x256xf32>
    %78 = vector.broadcast %77 : vector<1x256xf32> to vector<8x256xf32>
    %79 = arith.mulf %76, %78 : vector<8x256xf32>
    %c24_40 = arith.constant 24 : index
    %c0_41 = arith.constant 0 : index
    %80 = vector.load %arg7[%c24_40, %c0_41] : memref<80x256xf32, #tpu.memory_space<vmem>>, vector<8x256xf32>
    tpu.vector_store %arg7[%c24_40, %c0_41], %79 {strides = array<i32>} : memref<80x256xf32, #tpu.memory_space<vmem>>, vector<8x256xf32>,
    %c32_42 = arith.constant 32 : index
    %c0_43 = arith.constant 0 : index
    %81 = vector.load %arg7[%c32_42, %c0_43] : memref<80x256xf32, #tpu.memory_space<vmem>>, vector<8x256xf32>
    tpu.vector_store %arg7[%c32_42, %c0_43], %58 {strides = array<i32>} : memref<80x256xf32, #tpu.memory_space<vmem>>, vector<8x256xf32>,
    %c255_i32_44 = arith.constant 255 : i32
    %82 = tpu.dynamic_rotate %58 by %c255_i32_44 dim 1 : vector<8x256xf32>, i32 -> vector<8x256xf32>
    %83 = vector.extract_strided_slice %7 {offsets = [5, 0], sizes = [1, 256], strides = [1, 1]} : vector<16x256xf32> to vector<1x256xf32>
    %84 = vector.broadcast %83 : vector<1x256xf32> to vector<8x256xf32>
    %85 = arith.mulf %82, %84 : vector<8x256xf32>
    %c40_45 = arith.constant 40 : index
    %c0_46 = arith.constant 0 : index
    %86 = vector.load %arg7[%c40_45, %c0_46] : memref<80x256xf32, #tpu.memory_space<vmem>>, vector<8x256xf32>
    tpu.vector_store %arg7[%c40_45, %c0_46], %85 {strides = array<i32>} : memref<80x256xf32, #tpu.memory_space<vmem>>, vector<8x256xf32>,
    %c241_i32_47 = arith.constant 241 : i32
    %87 = tpu.dynamic_rotate %58 by %c241_i32_47 dim 1 : vector<8x256xf32>, i32 -> vector<8x256xf32>
    %88 = vector.extract_strided_slice %7 {offsets = [6, 0], sizes = [1, 256], strides = [1, 1]} : vector<16x256xf32> to vector<1x256xf32>
    %89 = vector.broadcast %88 : vector<1x256xf32> to vector<8x256xf32>
    %90 = arith.mulf %87, %89 : vector<8x256xf32>
    %c48_48 = arith.constant 48 : index
    %c0_49 = arith.constant 0 : index
    %91 = vector.load %arg7[%c48_48, %c0_49] : memref<80x256xf32, #tpu.memory_space<vmem>>, vector<8x256xf32>
    tpu.vector_store %arg7[%c48_48, %c0_49], %90 {strides = array<i32>} : memref<80x256xf32, #tpu.memory_space<vmem>>, vector<8x256xf32>,
    %c240_i32_50 = arith.constant 240 : i32
    %92 = tpu.dynamic_rotate %58 by %c240_i32_50 dim 1 : vector<8x256xf32>, i32 -> vector<8x256xf32>
    %93 = vector.extract_strided_slice %7 {offsets = [7, 0], sizes = [1, 256], strides = [1, 1]} : vector<16x256xf32> to vector<1x256xf32>
    %94 = vector.broadcast %93 : vector<1x256xf32> to vector<8x256xf32>
    %95 = arith.mulf %92, %94 : vector<8x256xf32>
    %c56_51 = arith.constant 56 : index
    %c0_52 = arith.constant 0 : index
    %96 = vector.load %arg7[%c56_51, %c0_52] : memref<80x256xf32, #tpu.memory_space<vmem>>, vector<8x256xf32>
    tpu.vector_store %arg7[%c56_51, %c0_52], %95 {strides = array<i32>} : memref<80x256xf32, #tpu.memory_space<vmem>>, vector<8x256xf32>,
    %c239_i32_53 = arith.constant 239 : i32
    %97 = tpu.dynamic_rotate %58 by %c239_i32_53 dim 1 : vector<8x256xf32>, i32 -> vector<8x256xf32>
    %98 = vector.extract_strided_slice %7 {offsets = [8, 0], sizes = [1, 256], strides = [1, 1]} : vector<16x256xf32> to vector<1x256xf32>
    %99 = vector.broadcast %98 : vector<1x256xf32> to vector<8x256xf32>
    %100 = arith.mulf %97, %99 : vector<8x256xf32>
    %c64_54 = arith.constant 64 : index
    %c0_55 = arith.constant 0 : index
    %101 = vector.load %arg7[%c64_54, %c0_55] : memref<80x256xf32, #tpu.memory_space<vmem>>, vector<8x256xf32>
    tpu.vector_store %arg7[%c64_54, %c0_55], %100 {strides = array<i32>} : memref<80x256xf32, #tpu.memory_space<vmem>>, vector<8x256xf32>,
    %c0_56 = arith.constant 0 : index
    %c0_57 = arith.constant 0 : index
    %102 = vector.load %arg7[%c0_56, %c0_57] : memref<80x256xf32, #tpu.memory_space<vmem>>, vector<80x256xf32>
    %cst_58 = arith.constant dense<0.000000e+00> : vector<8x256xf32>
    %103 = tpu.matmul %60, %102, %cst_58 {dimension_numbers = #tpu.dot_dimension_numbers<[1], [0], [0], [1], [0, 0, 1, 1], [], []>, precision = #tpu.contract_precision<fp32>} : vector<8x80xf32>, vector<80x256xf32>, vector<8x256xf32> -> vector<8x256xf32>
    %104 = vector.broadcast %10 : f32 to vector<8x256xf32>
    %105 = arith.mulf %104, %103 : vector<8x256xf32>
    %106 = arith.subf %8, %9 : vector<8x256xf32>
    %107 = vector.broadcast %11 : f32 to vector<8x256xf32>
    %108 = arith.mulf %107, %106 : vector<8x256xf32>
    %109 = arith.addf %105, %108 : vector<8x256xf32>
    %110 = arith.addf %109, %9 : vector<8x256xf32>
    %c1_59 = arith.constant 1 : index
    %c0_60 = arith.constant 0 : index
    %111 = memref.load %arg1[%c1_59, %c0_60] : memref<3x2xf32, #tpu.memory_space<smem>>
    %c1_61 = arith.constant 1 : index
    %c1_62 = arith.constant 1 : index
    %112 = memref.load %arg1[%c1_61, %c1_62] : memref<3x2xf32, #tpu.memory_space<smem>>
    %c2 = arith.constant 2 : index
    %c0_63 = arith.constant 0 : index
    %c0_64 = arith.constant 0 : index
    %113 = vector.load %arg4[%c2, %c0_63, %c0_64] : memref<6x8x80xf32, #tpu.memory_space<vmem>>, vector<1x8x80xf32>
    %114 = vector.shape_cast %113 : vector<1x8x80xf32> to vector<8x80xf32>
    %c17_i32_65 = arith.constant 17 : i32
    %115 = tpu.dynamic_rotate %110 by %c17_i32_65 dim 1 : vector<8x256xf32>, i32 -> vector<8x256xf32>
    %116 = vector.extract_strided_slice %7 {offsets = [0, 0], sizes = [1, 256], strides = [1, 1]} : vector<16x256xf32> to vector<1x256xf32>
    %117 = vector.broadcast %116 : vector<1x256xf32> to vector<8x256xf32>
    %118 = arith.mulf %115, %117 : vector<8x256xf32>
    %c0_66 = arith.constant 0 : index
    %c0_67 = arith.constant 0 : index
    %119 = vector.load %arg7[%c0_66, %c0_67] : memref<80x256xf32, #tpu.memory_space<vmem>>, vector<8x256xf32>
    tpu.vector_store %arg7[%c0_66, %c0_67], %118 {strides = array<i32>} : memref<80x256xf32, #tpu.memory_space<vmem>>, vector<8x256xf32>,
    %c16_i32_68 = arith.constant 16 : i32
    %120 = tpu.dynamic_rotate %110 by %c16_i32_68 dim 1 : vector<8x256xf32>, i32 -> vector<8x256xf32>
    %121 = vector.extract_strided_slice %7 {offsets = [1, 0], sizes = [1, 256], strides = [1, 1]} : vector<16x256xf32> to vector<1x256xf32>
    %122 = vector.broadcast %121 : vector<1x256xf32> to vector<8x256xf32>
    %123 = arith.mulf %120, %122 : vector<8x256xf32>
    %c8_69 = arith.constant 8 : index
    %c0_70 = arith.constant 0 : index
    %124 = vector.load %arg7[%c8_69, %c0_70] : memref<80x256xf32, #tpu.memory_space<vmem>>, vector<8x256xf32>
    tpu.vector_store %arg7[%c8_69, %c0_70], %123 {strides = array<i32>} : memref<80x256xf32, #tpu.memory_space<vmem>>, vector<8x256xf32>,
    %c15_i32_71 = arith.constant 15 : i32
    %125 = tpu.dynamic_rotate %110 by %c15_i32_71 dim 1 : vector<8x256xf32>, i32 -> vector<8x256xf32>
    %126 = vector.extract_strided_slice %7 {offsets = [2, 0], sizes = [1, 256], strides = [1, 1]} : vector<16x256xf32> to vector<1x256xf32>
    %127 = vector.broadcast %126 : vector<1x256xf32> to vector<8x256xf32>
    %128 = arith.mulf %125, %127 : vector<8x256xf32>
    %c16_72 = arith.constant 16 : index
    %c0_73 = arith.constant 0 : index
    %129 = vector.load %arg7[%c16_72, %c0_73] : memref<80x256xf32, #tpu.memory_space<vmem>>, vector<8x256xf32>
    tpu.vector_store %arg7[%c16_72, %c0_73], %128 {strides = array<i32>} : memref<80x256xf32, #tpu.memory_space<vmem>>, vector<8x256xf32>,
    %c1_i32_74 = arith.constant 1 : i32
    %130 = tpu.dynamic_rotate %110 by %c1_i32_74 dim 1 : vector<8x256xf32>, i32 -> vector<8x256xf32>
    %131 = vector.extract_strided_slice %7 {offsets = [3, 0], sizes = [1, 256], strides = [1, 1]} : vector<16x256xf32> to vector<1x256xf32>
    %132 = vector.broadcast %131 : vector<1x256xf32> to vector<8x256xf32>
    %133 = arith.mulf %130, %132 : vector<8x256xf32>
    %c24_75 = arith.constant 24 : index
    %c0_76 = arith.constant 0 : index
    %134 = vector.load %arg7[%c24_75, %c0_76] : memref<80x256xf32, #tpu.memory_space<vmem>>, vector<8x256xf32>
    tpu.vector_store %arg7[%c24_75, %c0_76], %133 {strides = array<i32>} : memref<80x256xf32, #tpu.memory_space<vmem>>, vector<8x256xf32>,
    %c32_77 = arith.constant 32 : index
    %c0_78 = arith.constant 0 : index
    %135 = vector.load %arg7[%c32_77, %c0_78] : memref<80x256xf32, #tpu.memory_space<vmem>>, vector<8x256xf32>
    tpu.vector_store %arg7[%c32_77, %c0_78], %110 {strides = array<i32>} : memref<80x256xf32, #tpu.memory_space<vmem>>, vector<8x256xf32>,
    %c255_i32_79 = arith.constant 255 : i32
    %136 = tpu.dynamic_rotate %110 by %c255_i32_79 dim 1 : vector<8x256xf32>, i32 -> vector<8x256xf32>
    %137 = vector.extract_strided_slice %7 {offsets = [5, 0], sizes = [1, 256], strides = [1, 1]} : vector<16x256xf32> to vector<1x256xf32>
    %138 = vector.broadcast %137 : vector<1x256xf32> to vector<8x256xf32>
    %139 = arith.mulf %136, %138 : vector<8x256xf32>
    %c40_80 = arith.constant 40 : index
    %c0_81 = arith.constant 0 : index
    %140 = vector.load %arg7[%c40_80, %c0_81] : memref<80x256xf32, #tpu.memory_space<vmem>>, vector<8x256xf32>
    tpu.vector_store %arg7[%c40_80, %c0_81], %139 {strides = array<i32>} : memref<80x256xf32, #tpu.memory_space<vmem>>, vector<8x256xf32>,
    %c241_i32_82 = arith.constant 241 : i32
    %141 = tpu.dynamic_rotate %110 by %c241_i32_82 dim 1 : vector<8x256xf32>, i32 -> vector<8x256xf32>
    %142 = vector.extract_strided_slice %7 {offsets = [6, 0], sizes = [1, 256], strides = [1, 1]} : vector<16x256xf32> to vector<1x256xf32>
    %143 = vector.broadcast %142 : vector<1x256xf32> to vector<8x256xf32>
    %144 = arith.mulf %141, %143 : vector<8x256xf32>
    %c48_83 = arith.constant 48 : index
    %c0_84 = arith.constant 0 : index
    %145 = vector.load %arg7[%c48_83, %c0_84] : memref<80x256xf32, #tpu.memory_space<vmem>>, vector<8x256xf32>
    tpu.vector_store %arg7[%c48_83, %c0_84], %144 {strides = array<i32>} : memref<80x256xf32, #tpu.memory_space<vmem>>, vector<8x256xf32>,
    %c240_i32_85 = arith.constant 240 : i32
    %146 = tpu.dynamic_rotate %110 by %c240_i32_85 dim 1 : vector<8x256xf32>, i32 -> vector<8x256xf32>
    %147 = vector.extract_strided_slice %7 {offsets = [7, 0], sizes = [1, 256], strides = [1, 1]} : vector<16x256xf32> to vector<1x256xf32>
    %148 = vector.broadcast %147 : vector<1x256xf32> to vector<8x256xf32>
    %149 = arith.mulf %146, %148 : vector<8x256xf32>
    %c56_86 = arith.constant 56 : index
    %c0_87 = arith.constant 0 : index
    %150 = vector.load %arg7[%c56_86, %c0_87] : memref<80x256xf32, #tpu.memory_space<vmem>>, vector<8x256xf32>
    tpu.vector_store %arg7[%c56_86, %c0_87], %149 {strides = array<i32>} : memref<80x256xf32, #tpu.memory_space<vmem>>, vector<8x256xf32>,
    %c239_i32_88 = arith.constant 239 : i32
    %151 = tpu.dynamic_rotate %110 by %c239_i32_88 dim 1 : vector<8x256xf32>, i32 -> vector<8x256xf32>
    %152 = vector.extract_strided_slice %7 {offsets = [8, 0], sizes = [1, 256], strides = [1, 1]} : vector<16x256xf32> to vector<1x256xf32>
    %153 = vector.broadcast %152 : vector<1x256xf32> to vector<8x256xf32>
    %154 = arith.mulf %151, %153 : vector<8x256xf32>
    %c64_89 = arith.constant 64 : index
    %c0_90 = arith.constant 0 : index
    %155 = vector.load %arg7[%c64_89, %c0_90] : memref<80x256xf32, #tpu.memory_space<vmem>>, vector<8x256xf32>
    tpu.vector_store %arg7[%c64_89, %c0_90], %154 {strides = array<i32>} : memref<80x256xf32, #tpu.memory_space<vmem>>, vector<8x256xf32>,
    %c0_91 = arith.constant 0 : index
    %c0_92 = arith.constant 0 : index
    %156 = vector.load %arg7[%c0_91, %c0_92] : memref<80x256xf32, #tpu.memory_space<vmem>>, vector<80x256xf32>
    %cst_93 = arith.constant dense<0.000000e+00> : vector<8x256xf32>
    %157 = tpu.matmul %114, %156, %cst_93 {dimension_numbers = #tpu.dot_dimension_numbers<[1], [0], [0], [1], [0, 0, 1, 1], [], []>, precision = #tpu.contract_precision<fp32>} : vector<8x80xf32>, vector<80x256xf32>, vector<8x256xf32> -> vector<8x256xf32>
    %cst_94 = arith.constant 0.000000e+00 : f32
    %158 = vector.broadcast %cst_94 : f32 to vector<8x256xf32>
    %159 = arith.maximumf %157, %158 : vector<8x256xf32>
    %c3 = arith.constant 3 : index
    %c0_95 = arith.constant 0 : index
    %c0_96 = arith.constant 0 : index
    %160 = vector.load %arg4[%c3, %c0_95, %c0_96] : memref<6x8x80xf32, #tpu.memory_space<vmem>>, vector<1x8x80xf32>
    %161 = vector.shape_cast %160 : vector<1x8x80xf32> to vector<8x80xf32>
    %c17_i32_97 = arith.constant 17 : i32
    %162 = tpu.dynamic_rotate %159 by %c17_i32_97 dim 1 : vector<8x256xf32>, i32 -> vector<8x256xf32>
    %163 = vector.extract_strided_slice %7 {offsets = [0, 0], sizes = [1, 256], strides = [1, 1]} : vector<16x256xf32> to vector<1x256xf32>
    %164 = vector.broadcast %163 : vector<1x256xf32> to vector<8x256xf32>
    %165 = arith.mulf %162, %164 : vector<8x256xf32>
    %c0_98 = arith.constant 0 : index
    %c0_99 = arith.constant 0 : index
    %166 = vector.load %arg7[%c0_98, %c0_99] : memref<80x256xf32, #tpu.memory_space<vmem>>, vector<8x256xf32>
    tpu.vector_store %arg7[%c0_98, %c0_99], %165 {strides = array<i32>} : memref<80x256xf32, #tpu.memory_space<vmem>>, vector<8x256xf32>,
    %c16_i32_100 = arith.constant 16 : i32
    %167 = tpu.dynamic_rotate %159 by %c16_i32_100 dim 1 : vector<8x256xf32>, i32 -> vector<8x256xf32>
    %168 = vector.extract_strided_slice %7 {offsets = [1, 0], sizes = [1, 256], strides = [1, 1]} : vector<16x256xf32> to vector<1x256xf32>
    %169 = vector.broadcast %168 : vector<1x256xf32> to vector<8x256xf32>
    %170 = arith.mulf %167, %169 : vector<8x256xf32>
    %c8_101 = arith.constant 8 : index
    %c0_102 = arith.constant 0 : index
    %171 = vector.load %arg7[%c8_101, %c0_102] : memref<80x256xf32, #tpu.memory_space<vmem>>, vector<8x256xf32>
    tpu.vector_store %arg7[%c8_101, %c0_102], %170 {strides = array<i32>} : memref<80x256xf32, #tpu.memory_space<vmem>>, vector<8x256xf32>,
    %c15_i32_103 = arith.constant 15 : i32
    %172 = tpu.dynamic_rotate %159 by %c15_i32_103 dim 1 : vector<8x256xf32>, i32 -> vector<8x256xf32>
    %173 = vector.extract_strided_slice %7 {offsets = [2, 0], sizes = [1, 256], strides = [1, 1]} : vector<16x256xf32> to vector<1x256xf32>
    %174 = vector.broadcast %173 : vector<1x256xf32> to vector<8x256xf32>
    %175 = arith.mulf %172, %174 : vector<8x256xf32>
    %c16_104 = arith.constant 16 : index
    %c0_105 = arith.constant 0 : index
    %176 = vector.load %arg7[%c16_104, %c0_105] : memref<80x256xf32, #tpu.memory_space<vmem>>, vector<8x256xf32>
    tpu.vector_store %arg7[%c16_104, %c0_105], %175 {strides = array<i32>} : memref<80x256xf32, #tpu.memory_space<vmem>>, vector<8x256xf32>,
    %c1_i32_106 = arith.constant 1 : i32
    %177 = tpu.dynamic_rotate %159 by %c1_i32_106 dim 1 : vector<8x256xf32>, i32 -> vector<8x256xf32>
    %178 = vector.extract_strided_slice %7 {offsets = [3, 0], sizes = [1, 256], strides = [1, 1]} : vector<16x256xf32> to vector<1x256xf32>
    %179 = vector.broadcast %178 : vector<1x256xf32> to vector<8x256xf32>
    %180 = arith.mulf %177, %179 : vector<8x256xf32>
    %c24_107 = arith.constant 24 : index
    %c0_108 = arith.constant 0 : index
    %181 = vector.load %arg7[%c24_107, %c0_108] : memref<80x256xf32, #tpu.memory_space<vmem>>, vector<8x256xf32>
    tpu.vector_store %arg7[%c24_107, %c0_108], %180 {strides = array<i32>} : memref<80x256xf32, #tpu.memory_space<vmem>>, vector<8x256xf32>,
    %c32_109 = arith.constant 32 : index
    %c0_110 = arith.constant 0 : index
    %182 = vector.load %arg7[%c32_109, %c0_110] : memref<80x256xf32, #tpu.memory_space<vmem>>, vector<8x256xf32>
    tpu.vector_store %arg7[%c32_109, %c0_110], %159 {strides = array<i32>} : memref<80x256xf32, #tpu.memory_space<vmem>>, vector<8x256xf32>,
    %c255_i32_111 = arith.constant 255 : i32
    %183 = tpu.dynamic_rotate %159 by %c255_i32_111 dim 1 : vector<8x256xf32>, i32 -> vector<8x256xf32>
    %184 = vector.extract_strided_slice %7 {offsets = [5, 0], sizes = [1, 256], strides = [1, 1]} : vector<16x256xf32> to vector<1x256xf32>
    %185 = vector.broadcast %184 : vector<1x256xf32> to vector<8x256xf32>
    %186 = arith.mulf %183, %185 : vector<8x256xf32>
    %c40_112 = arith.constant 40 : index
    %c0_113 = arith.constant 0 : index
    %187 = vector.load %arg7[%c40_112, %c0_113] : memref<80x256xf32, #tpu.memory_space<vmem>>, vector<8x256xf32>
    tpu.vector_store %arg7[%c40_112, %c0_113], %186 {strides = array<i32>} : memref<80x256xf32, #tpu.memory_space<vmem>>, vector<8x256xf32>,
    %c241_i32_114 = arith.constant 241 : i32
    %188 = tpu.dynamic_rotate %159 by %c241_i32_114 dim 1 : vector<8x256xf32>, i32 -> vector<8x256xf32>
    %189 = vector.extract_strided_slice %7 {offsets = [6, 0], sizes = [1, 256], strides = [1, 1]} : vector<16x256xf32> to vector<1x256xf32>
    %190 = vector.broadcast %189 : vector<1x256xf32> to vector<8x256xf32>
    %191 = arith.mulf %188, %190 : vector<8x256xf32>
    %c48_115 = arith.constant 48 : index
    %c0_116 = arith.constant 0 : index
    %192 = vector.load %arg7[%c48_115, %c0_116] : memref<80x256xf32, #tpu.memory_space<vmem>>, vector<8x256xf32>
    tpu.vector_store %arg7[%c48_115, %c0_116], %191 {strides = array<i32>} : memref<80x256xf32, #tpu.memory_space<vmem>>, vector<8x256xf32>,
    %c240_i32_117 = arith.constant 240 : i32
    %193 = tpu.dynamic_rotate %159 by %c240_i32_117 dim 1 : vector<8x256xf32>, i32 -> vector<8x256xf32>
    %194 = vector.extract_strided_slice %7 {offsets = [7, 0], sizes = [1, 256], strides = [1, 1]} : vector<16x256xf32> to vector<1x256xf32>
    %195 = vector.broadcast %194 : vector<1x256xf32> to vector<8x256xf32>
    %196 = arith.mulf %193, %195 : vector<8x256xf32>
    %c56_118 = arith.constant 56 : index
    %c0_119 = arith.constant 0 : index
    %197 = vector.load %arg7[%c56_118, %c0_119] : memref<80x256xf32, #tpu.memory_space<vmem>>, vector<8x256xf32>
    tpu.vector_store %arg7[%c56_118, %c0_119], %196 {strides = array<i32>} : memref<80x256xf32, #tpu.memory_space<vmem>>, vector<8x256xf32>,
    %c239_i32_120 = arith.constant 239 : i32
    %198 = tpu.dynamic_rotate %159 by %c239_i32_120 dim 1 : vector<8x256xf32>, i32 -> vector<8x256xf32>
    %199 = vector.extract_strided_slice %7 {offsets = [8, 0], sizes = [1, 256], strides = [1, 1]} : vector<16x256xf32> to vector<1x256xf32>
    %200 = vector.broadcast %199 : vector<1x256xf32> to vector<8x256xf32>
    %201 = arith.mulf %198, %200 : vector<8x256xf32>
    %c64_121 = arith.constant 64 : index
    %c0_122 = arith.constant 0 : index
    %202 = vector.load %arg7[%c64_121, %c0_122] : memref<80x256xf32, #tpu.memory_space<vmem>>, vector<8x256xf32>
    tpu.vector_store %arg7[%c64_121, %c0_122], %201 {strides = array<i32>} : memref<80x256xf32, #tpu.memory_space<vmem>>, vector<8x256xf32>,
    %c0_123 = arith.constant 0 : index
    %c0_124 = arith.constant 0 : index
    %203 = vector.load %arg7[%c0_123, %c0_124] : memref<80x256xf32, #tpu.memory_space<vmem>>, vector<80x256xf32>
    %cst_125 = arith.constant dense<0.000000e+00> : vector<8x256xf32>
    %204 = tpu.matmul %161, %203, %cst_125 {dimension_numbers = #tpu.dot_dimension_numbers<[1], [0], [0], [1], [0, 0, 1, 1], [], []>, precision = #tpu.contract_precision<fp32>} : vector<8x80xf32>, vector<80x256xf32>, vector<8x256xf32> -> vector<8x256xf32>
    %205 = vector.broadcast %111 : f32 to vector<8x256xf32>
    %206 = arith.mulf %205, %204 : vector<8x256xf32>
    %207 = arith.subf %8, %110 : vector<8x256xf32>
    %208 = vector.broadcast %112 : f32 to vector<8x256xf32>
    %209 = arith.mulf %208, %207 : vector<8x256xf32>
    %210 = arith.addf %206, %209 : vector<8x256xf32>
    %211 = arith.addf %210, %110 : vector<8x256xf32>
    %c2_126 = arith.constant 2 : index
    %c0_127 = arith.constant 0 : index
    %212 = memref.load %arg1[%c2_126, %c0_127] : memref<3x2xf32, #tpu.memory_space<smem>>
    %c2_128 = arith.constant 2 : index
    %c1_129 = arith.constant 1 : index
    %213 = memref.load %arg1[%c2_128, %c1_129] : memref<3x2xf32, #tpu.memory_space<smem>>
    %c4 = arith.constant 4 : index
    %c0_130 = arith.constant 0 : index
    %c0_131 = arith.constant 0 : index
    %214 = vector.load %arg4[%c4, %c0_130, %c0_131] : memref<6x8x80xf32, #tpu.memory_space<vmem>>, vector<1x8x80xf32>
    %215 = vector.shape_cast %214 : vector<1x8x80xf32> to vector<8x80xf32>
    %c17_i32_132 = arith.constant 17 : i32
    %216 = tpu.dynamic_rotate %211 by %c17_i32_132 dim 1 : vector<8x256xf32>, i32 -> vector<8x256xf32>
    %217 = vector.extract_strided_slice %7 {offsets = [0, 0], sizes = [1, 256], strides = [1, 1]} : vector<16x256xf32> to vector<1x256xf32>
    %218 = vector.broadcast %217 : vector<1x256xf32> to vector<8x256xf32>
    %219 = arith.mulf %216, %218 : vector<8x256xf32>
    %c0_133 = arith.constant 0 : index
    %c0_134 = arith.constant 0 : index
    %220 = vector.load %arg7[%c0_133, %c0_134] : memref<80x256xf32, #tpu.memory_space<vmem>>, vector<8x256xf32>
    tpu.vector_store %arg7[%c0_133, %c0_134], %219 {strides = array<i32>} : memref<80x256xf32, #tpu.memory_space<vmem>>, vector<8x256xf32>,
    %c16_i32_135 = arith.constant 16 : i32
    %221 = tpu.dynamic_rotate %211 by %c16_i32_135 dim 1 : vector<8x256xf32>, i32 -> vector<8x256xf32>
    %222 = vector.extract_strided_slice %7 {offsets = [1, 0], sizes = [1, 256], strides = [1, 1]} : vector<16x256xf32> to vector<1x256xf32>
    %223 = vector.broadcast %222 : vector<1x256xf32> to vector<8x256xf32>
    %224 = arith.mulf %221, %223 : vector<8x256xf32>
    %c8_136 = arith.constant 8 : index
    %c0_137 = arith.constant 0 : index
    %225 = vector.load %arg7[%c8_136, %c0_137] : memref<80x256xf32, #tpu.memory_space<vmem>>, vector<8x256xf32>
    tpu.vector_store %arg7[%c8_136, %c0_137], %224 {strides = array<i32>} : memref<80x256xf32, #tpu.memory_space<vmem>>, vector<8x256xf32>,
    %c15_i32_138 = arith.constant 15 : i32
    %226 = tpu.dynamic_rotate %211 by %c15_i32_138 dim 1 : vector<8x256xf32>, i32 -> vector<8x256xf32>
    %227 = vector.extract_strided_slice %7 {offsets = [2, 0], sizes = [1, 256], strides = [1, 1]} : vector<16x256xf32> to vector<1x256xf32>
    %228 = vector.broadcast %227 : vector<1x256xf32> to vector<8x256xf32>
    %229 = arith.mulf %226, %228 : vector<8x256xf32>
    %c16_139 = arith.constant 16 : index
    %c0_140 = arith.constant 0 : index
    %230 = vector.load %arg7[%c16_139, %c0_140] : memref<80x256xf32, #tpu.memory_space<vmem>>, vector<8x256xf32>
    tpu.vector_store %arg7[%c16_139, %c0_140], %229 {strides = array<i32>} : memref<80x256xf32, #tpu.memory_space<vmem>>, vector<8x256xf32>,
    %c1_i32_141 = arith.constant 1 : i32
    %231 = tpu.dynamic_rotate %211 by %c1_i32_141 dim 1 : vector<8x256xf32>, i32 -> vector<8x256xf32>
    %232 = vector.extract_strided_slice %7 {offsets = [3, 0], sizes = [1, 256], strides = [1, 1]} : vector<16x256xf32> to vector<1x256xf32>
    %233 = vector.broadcast %232 : vector<1x256xf32> to vector<8x256xf32>
    %234 = arith.mulf %231, %233 : vector<8x256xf32>
    %c24_142 = arith.constant 24 : index
    %c0_143 = arith.constant 0 : index
    %235 = vector.load %arg7[%c24_142, %c0_143] : memref<80x256xf32, #tpu.memory_space<vmem>>, vector<8x256xf32>
    tpu.vector_store %arg7[%c24_142, %c0_143], %234 {strides = array<i32>} : memref<80x256xf32, #tpu.memory_space<vmem>>, vector<8x256xf32>,
    %c32_144 = arith.constant 32 : index
    %c0_145 = arith.constant 0 : index
    %236 = vector.load %arg7[%c32_144, %c0_145] : memref<80x256xf32, #tpu.memory_space<vmem>>, vector<8x256xf32>
    tpu.vector_store %arg7[%c32_144, %c0_145], %211 {strides = array<i32>} : memref<80x256xf32, #tpu.memory_space<vmem>>, vector<8x256xf32>,
    %c255_i32_146 = arith.constant 255 : i32
    %237 = tpu.dynamic_rotate %211 by %c255_i32_146 dim 1 : vector<8x256xf32>, i32 -> vector<8x256xf32>
    %238 = vector.extract_strided_slice %7 {offsets = [5, 0], sizes = [1, 256], strides = [1, 1]} : vector<16x256xf32> to vector<1x256xf32>
    %239 = vector.broadcast %238 : vector<1x256xf32> to vector<8x256xf32>
    %240 = arith.mulf %237, %239 : vector<8x256xf32>
    %c40_147 = arith.constant 40 : index
    %c0_148 = arith.constant 0 : index
    %241 = vector.load %arg7[%c40_147, %c0_148] : memref<80x256xf32, #tpu.memory_space<vmem>>, vector<8x256xf32>
    tpu.vector_store %arg7[%c40_147, %c0_148], %240 {strides = array<i32>} : memref<80x256xf32, #tpu.memory_space<vmem>>, vector<8x256xf32>,
    %c241_i32_149 = arith.constant 241 : i32
    %242 = tpu.dynamic_rotate %211 by %c241_i32_149 dim 1 : vector<8x256xf32>, i32 -> vector<8x256xf32>
    %243 = vector.extract_strided_slice %7 {offsets = [6, 0], sizes = [1, 256], strides = [1, 1]} : vector<16x256xf32> to vector<1x256xf32>
    %244 = vector.broadcast %243 : vector<1x256xf32> to vector<8x256xf32>
    %245 = arith.mulf %242, %244 : vector<8x256xf32>
    %c48_150 = arith.constant 48 : index
    %c0_151 = arith.constant 0 : index
    %246 = vector.load %arg7[%c48_150, %c0_151] : memref<80x256xf32, #tpu.memory_space<vmem>>, vector<8x256xf32>
    tpu.vector_store %arg7[%c48_150, %c0_151], %245 {strides = array<i32>} : memref<80x256xf32, #tpu.memory_space<vmem>>, vector<8x256xf32>,
    %c240_i32_152 = arith.constant 240 : i32
    %247 = tpu.dynamic_rotate %211 by %c240_i32_152 dim 1 : vector<8x256xf32>, i32 -> vector<8x256xf32>
    %248 = vector.extract_strided_slice %7 {offsets = [7, 0], sizes = [1, 256], strides = [1, 1]} : vector<16x256xf32> to vector<1x256xf32>
    %249 = vector.broadcast %248 : vector<1x256xf32> to vector<8x256xf32>
    %250 = arith.mulf %247, %249 : vector<8x256xf32>
    %c56_153 = arith.constant 56 : index
    %c0_154 = arith.constant 0 : index
    %251 = vector.load %arg7[%c56_153, %c0_154] : memref<80x256xf32, #tpu.memory_space<vmem>>, vector<8x256xf32>
    tpu.vector_store %arg7[%c56_153, %c0_154], %250 {strides = array<i32>} : memref<80x256xf32, #tpu.memory_space<vmem>>, vector<8x256xf32>,
    %c239_i32_155 = arith.constant 239 : i32
    %252 = tpu.dynamic_rotate %211 by %c239_i32_155 dim 1 : vector<8x256xf32>, i32 -> vector<8x256xf32>
    %253 = vector.extract_strided_slice %7 {offsets = [8, 0], sizes = [1, 256], strides = [1, 1]} : vector<16x256xf32> to vector<1x256xf32>
    %254 = vector.broadcast %253 : vector<1x256xf32> to vector<8x256xf32>
    %255 = arith.mulf %252, %254 : vector<8x256xf32>
    %c64_156 = arith.constant 64 : index
    %c0_157 = arith.constant 0 : index
    %256 = vector.load %arg7[%c64_156, %c0_157] : memref<80x256xf32, #tpu.memory_space<vmem>>, vector<8x256xf32>
    tpu.vector_store %arg7[%c64_156, %c0_157], %255 {strides = array<i32>} : memref<80x256xf32, #tpu.memory_space<vmem>>, vector<8x256xf32>,
    %c0_158 = arith.constant 0 : index
    %c0_159 = arith.constant 0 : index
    %257 = vector.load %arg7[%c0_158, %c0_159] : memref<80x256xf32, #tpu.memory_space<vmem>>, vector<80x256xf32>
    %cst_160 = arith.constant dense<0.000000e+00> : vector<8x256xf32>
    %258 = tpu.matmul %215, %257, %cst_160 {dimension_numbers = #tpu.dot_dimension_numbers<[1], [0], [0], [1], [0, 0, 1, 1], [], []>, precision = #tpu.contract_precision<fp32>} : vector<8x80xf32>, vector<80x256xf32>, vector<8x256xf32> -> vector<8x256xf32>
    %cst_161 = arith.constant 0.000000e+00 : f32
    %259 = vector.broadcast %cst_161 : f32 to vector<8x256xf32>
    %260 = arith.maximumf %258, %259 : vector<8x256xf32>
    %c5 = arith.constant 5 : index
    %c0_162 = arith.constant 0 : index
    %c0_163 = arith.constant 0 : index
    %261 = vector.load %arg4[%c5, %c0_162, %c0_163] : memref<6x8x80xf32, #tpu.memory_space<vmem>>, vector<1x8x80xf32>
    %262 = vector.shape_cast %261 : vector<1x8x80xf32> to vector<8x80xf32>
    %c17_i32_164 = arith.constant 17 : i32
    %263 = tpu.dynamic_rotate %260 by %c17_i32_164 dim 1 : vector<8x256xf32>, i32 -> vector<8x256xf32>
    %264 = vector.extract_strided_slice %7 {offsets = [0, 0], sizes = [1, 256], strides = [1, 1]} : vector<16x256xf32> to vector<1x256xf32>
    %265 = vector.broadcast %264 : vector<1x256xf32> to vector<8x256xf32>
    %266 = arith.mulf %263, %265 : vector<8x256xf32>
    %c0_165 = arith.constant 0 : index
    %c0_166 = arith.constant 0 : index
    %267 = vector.load %arg7[%c0_165, %c0_166] : memref<80x256xf32, #tpu.memory_space<vmem>>, vector<8x256xf32>
    tpu.vector_store %arg7[%c0_165, %c0_166], %266 {strides = array<i32>} : memref<80x256xf32, #tpu.memory_space<vmem>>, vector<8x256xf32>,
    %c16_i32_167 = arith.constant 16 : i32
    %268 = tpu.dynamic_rotate %260 by %c16_i32_167 dim 1 : vector<8x256xf32>, i32 -> vector<8x256xf32>
    %269 = vector.extract_strided_slice %7 {offsets = [1, 0], sizes = [1, 256], strides = [1, 1]} : vector<16x256xf32> to vector<1x256xf32>
    %270 = vector.broadcast %269 : vector<1x256xf32> to vector<8x256xf32>
    %271 = arith.mulf %268, %270 : vector<8x256xf32>
    %c8_168 = arith.constant 8 : index
    %c0_169 = arith.constant 0 : index
    %272 = vector.load %arg7[%c8_168, %c0_169] : memref<80x256xf32, #tpu.memory_space<vmem>>, vector<8x256xf32>
    tpu.vector_store %arg7[%c8_168, %c0_169], %271 {strides = array<i32>} : memref<80x256xf32, #tpu.memory_space<vmem>>, vector<8x256xf32>,
    %c15_i32_170 = arith.constant 15 : i32
    %273 = tpu.dynamic_rotate %260 by %c15_i32_170 dim 1 : vector<8x256xf32>, i32 -> vector<8x256xf32>
    %274 = vector.extract_strided_slice %7 {offsets = [2, 0], sizes = [1, 256], strides = [1, 1]} : vector<16x256xf32> to vector<1x256xf32>
    %275 = vector.broadcast %274 : vector<1x256xf32> to vector<8x256xf32>
    %276 = arith.mulf %273, %275 : vector<8x256xf32>
    %c16_171 = arith.constant 16 : index
    %c0_172 = arith.constant 0 : index
    %277 = vector.load %arg7[%c16_171, %c0_172] : memref<80x256xf32, #tpu.memory_space<vmem>>, vector<8x256xf32>
    tpu.vector_store %arg7[%c16_171, %c0_172], %276 {strides = array<i32>} : memref<80x256xf32, #tpu.memory_space<vmem>>, vector<8x256xf32>,
    %c1_i32_173 = arith.constant 1 : i32
    %278 = tpu.dynamic_rotate %260 by %c1_i32_173 dim 1 : vector<8x256xf32>, i32 -> vector<8x256xf32>
    %279 = vector.extract_strided_slice %7 {offsets = [3, 0], sizes = [1, 256], strides = [1, 1]} : vector<16x256xf32> to vector<1x256xf32>
    %280 = vector.broadcast %279 : vector<1x256xf32> to vector<8x256xf32>
    %281 = arith.mulf %278, %280 : vector<8x256xf32>
    %c24_174 = arith.constant 24 : index
    %c0_175 = arith.constant 0 : index
    %282 = vector.load %arg7[%c24_174, %c0_175] : memref<80x256xf32, #tpu.memory_space<vmem>>, vector<8x256xf32>
    tpu.vector_store %arg7[%c24_174, %c0_175], %281 {strides = array<i32>} : memref<80x256xf32, #tpu.memory_space<vmem>>, vector<8x256xf32>,
    %c32_176 = arith.constant 32 : index
    %c0_177 = arith.constant 0 : index
    %283 = vector.load %arg7[%c32_176, %c0_177] : memref<80x256xf32, #tpu.memory_space<vmem>>, vector<8x256xf32>
    tpu.vector_store %arg7[%c32_176, %c0_177], %260 {strides = array<i32>} : memref<80x256xf32, #tpu.memory_space<vmem>>, vector<8x256xf32>,
    %c255_i32_178 = arith.constant 255 : i32
    %284 = tpu.dynamic_rotate %260 by %c255_i32_178 dim 1 : vector<8x256xf32>, i32 -> vector<8x256xf32>
    %285 = vector.extract_strided_slice %7 {offsets = [5, 0], sizes = [1, 256], strides = [1, 1]} : vector<16x256xf32> to vector<1x256xf32>
    %286 = vector.broadcast %285 : vector<1x256xf32> to vector<8x256xf32>
    %287 = arith.mulf %284, %286 : vector<8x256xf32>
    %c40_179 = arith.constant 40 : index
    %c0_180 = arith.constant 0 : index
    %288 = vector.load %arg7[%c40_179, %c0_180] : memref<80x256xf32, #tpu.memory_space<vmem>>, vector<8x256xf32>
    tpu.vector_store %arg7[%c40_179, %c0_180], %287 {strides = array<i32>} : memref<80x256xf32, #tpu.memory_space<vmem>>, vector<8x256xf32>,
    %c241_i32_181 = arith.constant 241 : i32
    %289 = tpu.dynamic_rotate %260 by %c241_i32_181 dim 1 : vector<8x256xf32>, i32 -> vector<8x256xf32>
    %290 = vector.extract_strided_slice %7 {offsets = [6, 0], sizes = [1, 256], strides = [1, 1]} : vector<16x256xf32> to vector<1x256xf32>
    %291 = vector.broadcast %290 : vector<1x256xf32> to vector<8x256xf32>
    %292 = arith.mulf %289, %291 : vector<8x256xf32>
    %c48_182 = arith.constant 48 : index
    %c0_183 = arith.constant 0 : index
    %293 = vector.load %arg7[%c48_182, %c0_183] : memref<80x256xf32, #tpu.memory_space<vmem>>, vector<8x256xf32>
    tpu.vector_store %arg7[%c48_182, %c0_183], %292 {strides = array<i32>} : memref<80x256xf32, #tpu.memory_space<vmem>>, vector<8x256xf32>,
    %c240_i32_184 = arith.constant 240 : i32
    %294 = tpu.dynamic_rotate %260 by %c240_i32_184 dim 1 : vector<8x256xf32>, i32 -> vector<8x256xf32>
    %295 = vector.extract_strided_slice %7 {offsets = [7, 0], sizes = [1, 256], strides = [1, 1]} : vector<16x256xf32> to vector<1x256xf32>
    %296 = vector.broadcast %295 : vector<1x256xf32> to vector<8x256xf32>
    %297 = arith.mulf %294, %296 : vector<8x256xf32>
    %c56_185 = arith.constant 56 : index
    %c0_186 = arith.constant 0 : index
    %298 = vector.load %arg7[%c56_185, %c0_186] : memref<80x256xf32, #tpu.memory_space<vmem>>, vector<8x256xf32>
    tpu.vector_store %arg7[%c56_185, %c0_186], %297 {strides = array<i32>} : memref<80x256xf32, #tpu.memory_space<vmem>>, vector<8x256xf32>,
    %c239_i32_187 = arith.constant 239 : i32
    %299 = tpu.dynamic_rotate %260 by %c239_i32_187 dim 1 : vector<8x256xf32>, i32 -> vector<8x256xf32>
    %300 = vector.extract_strided_slice %7 {offsets = [8, 0], sizes = [1, 256], strides = [1, 1]} : vector<16x256xf32> to vector<1x256xf32>
    %301 = vector.broadcast %300 : vector<1x256xf32> to vector<8x256xf32>
    %302 = arith.mulf %299, %301 : vector<8x256xf32>
    %c64_188 = arith.constant 64 : index
    %c0_189 = arith.constant 0 : index
    %303 = vector.load %arg7[%c64_188, %c0_189] : memref<80x256xf32, #tpu.memory_space<vmem>>, vector<8x256xf32>
    tpu.vector_store %arg7[%c64_188, %c0_189], %302 {strides = array<i32>} : memref<80x256xf32, #tpu.memory_space<vmem>>, vector<8x256xf32>,
    %c0_190 = arith.constant 0 : index
    %c0_191 = arith.constant 0 : index
    %304 = vector.load %arg7[%c0_190, %c0_191] : memref<80x256xf32, #tpu.memory_space<vmem>>, vector<80x256xf32>
    %cst_192 = arith.constant dense<0.000000e+00> : vector<8x256xf32>
    %305 = tpu.matmul %262, %304, %cst_192 {dimension_numbers = #tpu.dot_dimension_numbers<[1], [0], [0], [1], [0, 0, 1, 1], [], []>, precision = #tpu.contract_precision<fp32>} : vector<8x80xf32>, vector<80x256xf32>, vector<8x256xf32> -> vector<8x256xf32>
    %306 = vector.broadcast %212 : f32 to vector<8x256xf32>
    %307 = arith.mulf %306, %305 : vector<8x256xf32>
    %308 = arith.subf %8, %211 : vector<8x256xf32>
    %309 = vector.broadcast %213 : f32 to vector<8x256xf32>
    %310 = arith.mulf %309, %308 : vector<8x256xf32>
    %311 = arith.addf %307, %310 : vector<8x256xf32>
    %312 = arith.addf %311, %211 : vector<8x256xf32>
    %c0_193 = arith.constant 0 : index
    %c0_194 = arith.constant 0 : index
    %313 = vector.load %arg6[%c0_193, %c0_194] : memref<8x256xf32, #tpu.memory_space<vmem>>, vector<8x256xf32>
    tpu.vector_store %arg6[%c0_193, %c0_194], %312 {strides = array<i32>} : memref<8x256xf32, #tpu.memory_space<vmem>>, vector<8x256xf32>,
    return
  }
  func.func @transform_0(%arg0: i32) -> (i32, i32) {
    %c0_i32 = arith.constant 0 : i32
    %c0_i32_0 = arith.constant 0 : i32
    %c0_i32_1 = arith.constant 0 : i32
    return %c0_i32, %c0_i32_0 : i32, i32
  }
  func.func @transform_1(%arg0: i32) -> (i32, i32) {
    %c0_i32 = arith.constant 0 : i32
    %c0_i32_0 = arith.constant 0 : i32
    %c0_i32_1 = arith.constant 0 : i32
    return %c0_i32, %c0_i32_0 : i32, i32
  }
  func.func @transform_2(%arg0: i32) -> (i32, i32) {
    %c0_i32 = arith.constant 0 : i32
    %c0_i32_0 = arith.constant 0 : i32
    %c0_i32_1 = arith.constant 0 : i32
    return %c0_i32, %c0_i32_0 : i32, i32
  }
  func.func @transform_3(%arg0: i32) -> (i32, i32, i32) {
    %c0_i32 = arith.constant 0 : i32
    %c0_i32_0 = arith.constant 0 : i32
    %c0_i32_1 = arith.constant 0 : i32
    %c0_i32_2 = arith.constant 0 : i32
    return %c0_i32, %c0_i32_0, %c0_i32_1 : i32, i32, i32
  }
  func.func @transform_4(%arg0: i32) -> (i32, i32) {
    %c0_i32 = arith.constant 0 : i32
    %c0_i32_0 = arith.constant 0 : i32
    %c0_i32_1 = arith.constant 0 : i32
    return %c0_i32, %c0_i32_0 : i32, i32
  }
  func.func @transform_5(%arg0: i32) -> (i32, i32) {
    %c0_i32 = arith.constant 0 : i32
    %c0_i32_0 = arith.constant 0 : i32
    %c0_i32_1 = arith.constant 0 : i32
    return %c0_i32, %c0_i32_0 : i32, i32
  }
}

</mosaic_0001>

<bundles_post_ra>
// kernel: interlayers_forward.1
= control target key start
LH: loop header
LB: loop body
LE: loop exit
PB: predicated region body
PF: predicated region fallthrough
CT: control target
= control target key end

     0   :  { %10 = vsyncpa [#allocation4], 0  ;;  %s8151_s0 = inlined_call_operand.vmem [shape: f32[3,2], index: 0, kind: input, shape index: {}]   ;;  %s8152_s1 = inlined_call_operand.vmem [shape: f32[8,256], index: 1, kind: input, shape index: {}]   ;;  %s8153_s2 = inlined_call_operand.vmem [shape: f32[8,256], index: 2, kind: input, shape index: {}]   ;;  %s8154_s3 = inlined_call_operand.vmem [shape: f32[6,8,80], index: 3, kind: input, shape index: {}]   ;;  %s8155_s4 = inlined_call_operand.vmem [shape: f32[16,256], index: 4, kind: input, shape index: {}]   ;;  %s8156_s5 = inlined_call_operand.vmem [shape: f32[8,256], index: 5, kind: output, shape index: {}]  }
   0x1   :  { %s17_s20 = sshll.u32 %s8151_s0, 4  ;;  %s18_s20 = int_to_ptr.vmem [resolvable:$true] %s17_s20 }
   0x2   :  { %s5892_s21 = scalar_lea.vmem %s18_s20, 64  ;;  %p5897_p1 = scmp.lt.s32.totalorder %s18_s20, %s18_s20 }
   0x3   :  { %p5893_p0 = scmp.ne.s32.totalorder %s18_s20, %s5892_s21  ;;  %p5898_p2 = scmp.lt.s32.totalorder %s5892_s21, %s5892_s21 }
   0x5   :  { %p5899_p3 = por %p5898_p2, %p5897_p1 }
   0x7   :  { %p5900_p4 = pnand %p5899_p3, %p5893_p0 }
   0x9   :  { %5903 = shalt.err (!%p5900_p4)
}
   0xa   :  { %s5906_s22 = smov [#allocation3]  }
   0xb   :  { %20 = dma.vmem_to_smem %s18_s20, 64, %s5906_s22, [#allocation4]  }
   0xc   :  { %5904 = dma.done.wait [#allocation4], 64  }
   0xd   :  { %5905 = vsyncadd [#allocation4], 4294967232 }
   0xe   :  { %32 = sfence }
   0xf   :  { %v5954_v0 = vld [vmem:[%s8152_s1] sm:$0xff]  ;;  %s5907_s25 = smov 16   ;;  %s5908_s0 = smov 17   ;;  %v5963_v1 = vld [vmem:[%s8152_s1 + $0x8] sm:$0xff]  ;;  %v8160_v2 = vmov 0.0   ;;  %v33_v3 = vlaneseq  ;;  %vm226_vm5 = vcmask 654336  }
  0x10   :  { %71 = vrot.lane.b32.xlu1 %v5954_v0, %s5907_s25  ;;  %50 = vrot.lane.b32.xlu0 %v5954_v0, %s5908_s0  ;;  %s5910_s28 = smov 15   ;;  %s5911_s29 = smov 1   ;;  %v6007_v8 = vld [vmem:[%s8155_s4] sm:$0xff]  ;;  %v6012_v9 = vld [vmem:[%s8155_s4 + $0x8] sm:$0xff]  ;;  %v246_v22 = vand.u32 4294901760, %v5963_v1  ;;  %v248_v35 = vand.u32 4294901760, %v5954_v0 }
  0x11   :  { %314 = vmatprep.mubr.f32.mxu0 %v8160_v2  ;;  %1122 = vmatprep.mubr.f32.mxu1 %v8160_v2  ;;  %s5912_s30 = smov 127   ;;  %s5913_s6 = smov 113   ;;  %v5995_v4 = vshrl.u32 %v33_v3, 7  ;;  %v5998_v5 = vand.u32 127, %v33_v3  ;;  %v49_v31 = vld [vmem:[%s8154_s3] sm:$0xff]  ;;  %vm5916_vm10 = vmmov 1  }
  0x12   :  { %s5914_s7 = smov 112   ;;  %s5915_s8 = smov 111   ;;  %v228_v44 = vsel %vm226_vm5, %v49_v31, 0  ;;  %v6082_v48 = vsub.f32 %v5963_v1, %v246_v22  ;;  %v6093_v52 = vsub.f32 %v5954_v0, %v248_v35 }
  0x13   :  { %vm35_vm0 = vcmp.eq.s32.totalorder %v5995_v4, 0  ;;  %8260 = vst [vmem:[#allocation6_spill] sm:$0xff] %v5998_v5  ;;  %v80_v6 = vsub.s32 1, %v5995_v4  ;;  %v6002_v7 = vsub.s32 0, %v5995_v4  ;;  %vm75_vm1 = vcmp.lt.s32.totalorder %v5998_v5, 16  ;;  %s5012_s20 = sld [smem:[#allocation3 + $0x1]] }
  0x14   :  { %73 = vrot.lane.b32.xlu1 %v5963_v1, %s5907_s25  ;;  %52 = vrot.lane.b32.xlu0 %v5963_v1, %s5908_s0  ;;  %v36_v12 = vsel %vm35_vm0, 1.0, %v8160_v2  ;;  %vm56_vm2 = vcmp.lt.s32.totalorder %v5998_v5, 17  ;;  %vm94_vm3 = vcmp.lt.s32.totalorder %v5998_v5, 15  ;;  %v99_v18 = vsub.s32 2, %v5995_v4  ;;  %vm6272_vm11 = vmpackc.low %vm35_vm0, %vm5916_vm10  ;;  %s47_s21 = sld [smem:[#allocation3]]  ;;  %s5015_s16 = sld [smem:[#allocation3 + $0x81]] }
  0x15   :  { %v6020_v13 = vrot.slane %v6007_v8, %v80_v6  ;;  %v6023_v14 = vrot.slane %v6012_v9, %v80_v6  ;;  %v6027_v15 = vrot.slane %v6007_v8, %v6002_v7  ;;  %v6031_v16 = vrot.slane %v6012_v9, %v6002_v7  ;;  %s5014_s15 = sld [smem:[#allocation3 + $0x80]] }
  0x16   :  { %v6033_v17 = vsub.f32 %v36_v12, %v36_v12  ;;  %vm113_vm4 = vcmp.lt.s32.totalorder %v5998_v5, 1  ;;  %v118_v21 = vsub.s32 3, %v5995_v4  ;;  %v6058_v32 = vrot.slane %v6007_v8, %v99_v18 }
  0x17   :  { %8261 = vst [vmem:[#allocation7_spill] sm:$0xff] %v6020_v13  ;;  %8262 = vst [vmem:[#allocation8_spill] sm:$0xff] %v6023_v14  ;;  %v139_v33 = vsub.s32 5, %v5995_v4  ;;  %v158_v34 = vsub.s32 6, %v5995_v4  ;;  %v6065_v42 = vrot.slane %v6012_v9, %v99_v18  ;;  %vm134_vm6 = vcmp.lt.s32.totalorder %v5998_v5, 127 }
  0x18   :  { %92 = vrot.lane.b32.xlu1 %v5963_v1, %s5910_s28  ;;  %90 = vrot.lane.b32.xlu0 %v5954_v0, %s5910_s28  ;;  %8263 = vst [vmem:[#allocation9_spill] sm:$0xff] %v6027_v15  ;;  %8264 = vst [vmem:[#allocation10_spill] sm:$0xff] %v6031_v16  ;;  %v6068_v43 = vrot.slane %v6007_v8, %v118_v21  ;;  %v6077_v47 = vrot.slane %v6012_v9, %v118_v21  ;;  %vm153_vm7 = vcmp.lt.s32.totalorder %v5998_v5, 113 }
  0x19   :  { %8265 = vst [vmem:[#allocation11_spill] sm:$0xff] %v6058_v32  ;;  %8266 = vst [vmem:[#allocation12_spill] sm:$0xff] %v6065_v42  ;;  %v177_v51 = vsub.s32 7, %v5995_v4  ;;  %v6096_v55 = vrot.slane %v6007_v8, %v139_v33  ;;  %v6099_v56 = vrot.slane %v6012_v9, %v139_v33  ;;  %v6102_v57 = vrot.slane %v6007_v8, %v158_v34 }
  0x1a   :  { %8267 = vst [vmem:[#allocation13_spill] sm:$0xff] %v6068_v43  ;;  %8268 = vst [vmem:[#allocation14_spill] sm:$0xff] %v6077_v47  ;;  %v6104_v58 = vand.u32 4294901760, %v228_v44  ;;  %v6123_v6 = vrot.slane %v6012_v9, %v158_v34  ;;  %vm172_vm8 = vcmp.lt.s32.totalorder %v5998_v5, 112  ;;  %v8157_v18 = vand.u32 4294901760, %v6093_v52 }
  0x1b   :  { %8269 = vst [vmem:[#allocation15_spill] sm:$0xff] %v6096_v55  ;;  %8270 = vst [vmem:[#allocation16_spill] sm:$0xff] %v6099_v56  ;;  %v6131_v12 = vrot.slane %v6012_v9, %v177_v51  ;;  %vm191_vm9 = vcmp.lt.s32.totalorder %v5998_v5, 111 }
  0x1c   :  { %111 = vrot.lane.b32.xlu1 %v5963_v1, %s5911_s29  ;;  %109 = vrot.lane.b32.xlu0 %v5954_v0, %s5911_s29  ;;  %8271 = vst [vmem:[#allocation17_spill] sm:$0xff] %v6102_v57  ;;  %8272 = vst [vmem:[#allocation18_spill] sm:$0xff] %v6123_v6 }
  0x1d   :  { %8274 = vst [vmem:[#allocation20_spill] sm:$0xff] %v6131_v12 }
  0x20   :  { %132 = vrot.lane.b32.xlu1 %v5963_v1, %s5912_s30  ;;  %130 = vrot.lane.b32.xlu0 %v5954_v0, %s5912_s30 }
  0x24   :  { %151 = vrot.lane.b32.xlu1 %v5963_v1, %s5913_s6  ;;  %149 = vrot.lane.b32.xlu0 %v5954_v0, %s5913_s6 }
  0x28   :  { %170 = vrot.lane.b32.xlu1 %v5963_v1, %s5914_s7  ;;  %168 = vrot.lane.b32.xlu0 %v5954_v0, %s5914_s7 }
  0x2c   :  { %189 = vrot.lane.b32.xlu1 %v5963_v1, %s5915_s8  ;;  %187 = vrot.lane.b32.xlu0 %v5954_v0, %s5915_s8 }
  0x82   :  { %v72_v10 = vpop.permute.xlu1 %71  ;;  %v51_v11 = vpop.permute.xlu0 %50 }
  0x86   :  { %v74_v19 = vpop.permute.xlu1 %73  ;;  %v53_v20 = vpop.permute.xlu0 %52 }
  0x87   :  { %v76_v23 = vsel %vm75_vm1, %v72_v10, %v74_v19  ;;  %v77_v24 = vsel %vm75_vm1, %v74_v19, %v72_v10  ;;  %v57_v25 = vsel %vm56_vm2, %v51_v11, %v53_v20  ;;  %v58_v26 = vsel %vm56_vm2, %v53_v20, %v51_v11 }
  0x88   :  { %v86_v27 = vmul.f32 %v6020_v13, %v77_v24  ;;  %v6050_v28 = vmul.f32 %v6023_v14, %v76_v23  ;;  %v67_v29 = vmul.f32 %v6027_v15, %v58_v26  ;;  %v68_v30 = vmul.f32 %v6031_v16, %v57_v25 }
  0x89   :  { %v8158_v10 = vand.u32 4294901760, %v6082_v48  ;;  %v6128_v11 = vrot.slane %v6007_v8, %v177_v51  ;;  %v6138_v25 = vsub.f32 %v228_v44, %v6104_v58 }
  0x8a   :  { %v234_v36 = vand.u32 4294901760, %v6050_v28  ;;  %v236_v37 = vand.u32 4294901760, %v86_v27  ;;  %v230_v38 = vand.u32 4294901760, %v68_v30  ;;  %v232_v39 = vand.u32 4294901760, %v67_v29  ;;  %v93_v40 = vpop.permute.xlu1 %92  ;;  %v91_v41 = vpop.permute.xlu0 %90 }
  0x8b   :  { %v95_v45 = vsel %vm94_vm3, %v91_v41, %v93_v40  ;;  %v96_v46 = vsel %vm94_vm3, %v93_v40, %v91_v41  ;;  %8273 = vst [vmem:[#allocation19_spill] sm:$0xff] %v6128_v11  ;;  %v42_v40 = vld [vmem:[%s8155_s4 + $0x18] sm:$0xff]  ;;  %v6159_v41 = vsub.f32 %v6082_v48, %v8158_v10 }
  0x8c   :  { %v6084_v49 = vpack.c.bf16 %v234_v36, %v230_v38  ;;  %v6086_v50 = vpack.c.bf16 %v236_v37, %v232_v39  ;;  %v6107_v59 = vmul.f32 %v6058_v32, %v96_v46  ;;  %v6110_v60 = vmul.f32 %v6065_v42, %v95_v45 }
  0x8d   :  { %v6134_v19 = vsub.f32 %v86_v27, %v236_v37  ;;  %v6146_v27 = vsub.f32 %v67_v29, %v232_v39  ;;  %v41_v37 = vld [vmem:[%s8155_s4 + $0x10] sm:$0xff]  ;;  %v6162_v29 = vsub.f32 %v6050_v28, %v234_v36  ;;  %v6164_v39 = vsub.f32 %v68_v30, %v230_v38 }
  0x8e   :  { %v112_v53 = vpop.permute.xlu1 %111  ;;  %v110_v54 = vpop.permute.xlu0 %109  ;;  %5059 = vmatprep.subr.bf16.mxu0 %v6084_v49  ;;  %v238_v26 = vand.u32 4294901760, %v6110_v60  ;;  %v240_v8 = vand.u32 4294901760, %v6107_v59  ;;  %v6175_v28 = vrot.slane %v41_v37, %v6002_v7  ;;  %v6178_v30 = vrot.slane %v42_v40, %v6002_v7 }
  0x8f   :  { %v114_v61 = vsel %vm113_vm4, %v110_v54, %v112_v53  ;;  %v115_v62 = vsel %vm113_vm4, %v112_v53, %v110_v54  ;;  %5061 = vmatpush1.bf16.msra.mxu0 %v6086_v50  ;;  %v8162_v46 = vand.u32 4294901760, %v6134_v19  ;;  %v6183_v36 = vsub.f32 %v6093_v52, %v8157_v18 }
  0x90   :  { %v6118_v63 = vmul.f32 %v6068_v43, %v115_v62  ;;  %v125_v3 = vmul.f32 %v6077_v47, %v114_v61  ;;  %v8159_v62 = vand.u32 4294901760, %v6138_v25  ;;  %8275 = vst [vmem:[#allocation21_spill] sm:$0xff] %v6175_v28  ;;  %8276 = vst [vmem:[#allocation22_spill] sm:$0xff] %v6178_v30  ;;  %v8163_v38 = vand.u32 4294901760, %v6146_v27 }
  0x91   :  { %v8164_v37 = vand.u32 4294901760, %v6164_v39  ;;  %v8165_v40 = vand.u32 4294901760, %v6162_v29  ;;  %v384_v14 = vand.u32 4294901760, %v6183_v36  ;;  %v6309_v36 = vand.u32 4294901760, %v6033_v17 }
  0x92   :  { %v242_v20 = vand.u32 4294901760, %v125_v3  ;;  %v244_v21 = vand.u32 4294901760, %v6118_v63  ;;  %v133_v23 = vpop.permute.xlu1 %132  ;;  %v131_v24 = vpop.permute.xlu0 %130  ;;  %v6212_v1 = vsub.f32 %v6138_v25, %v8159_v62  ;;  %v8281_v15 = vand.u32 4294901760, %v6164_v39 }
  0x93   :  { %v135_v9 = vsel %vm134_vm6, %v131_v24, %v133_v23  ;;  %v136_v31 = vsel %vm134_vm6, %v133_v23, %v131_v24  ;;  %8280 = vst [vmem:[#allocation23_spill] sm:$0xff] %v6309_v36 }
  0x94   :  { %v145_v33 = vmul.f32 %v6096_v55, %v135_v9  ;;  %v146_v34 = vmul.f32 %v6099_v56, %v136_v31  ;;  %v6166_v44 = vpack.c.bf16 %v242_v20, %v238_v26  ;;  %v6168_v45 = vpack.c.bf16 %v244_v21, %v240_v8 }
  0x96   :  { %v250_v51 = vand.u32 4294901760, %v146_v34  ;;  %v252_v53 = vand.u32 4294901760, %v145_v33  ;;  %v152_v54 = vpop.permute.xlu1 %151  ;;  %v150_v61 = vpop.permute.xlu0 %149  ;;  %5063 = vmatprep.subr.bf16.mxu0 %v6166_v44 }
  0x97   :  { %v154_v23 = vsel %vm153_vm7, %v150_v61, %v152_v54  ;;  %v155_v24 = vsel %vm153_vm7, %v152_v54, %v150_v61  ;;  %5065 = vmatpush1.bf16.msra.mxu0 %v6168_v45  ;;  %v6205_v54 = vsub.f32 %v6134_v19, %v8162_v46  ;;  %v6207_v61 = vsub.f32 %v125_v3, %v242_v20 }
  0x98   :  { %v6194_v7 = vpack.c.bf16 %v250_v51, %v246_v22  ;;  %v6198_v31 = vpack.c.bf16 %v252_v53, %v248_v35  ;;  %v6215_v0 = vmul.f32 %v6102_v57, %v154_v23  ;;  %v165_v22 = vmul.f32 %v6123_v6, %v155_v24 }
  0x99   :  { %v6224_v3 = vsub.f32 %v6110_v60, %v238_v26  ;;  %v6227_v20 = vsub.f32 %v6107_v59, %v240_v8  ;;  %v335_v24 = vsub.f32 %v6146_v27, %v8163_v38  ;;  %v329_v60 = vsub.f32 %v6164_v39, %v8164_v37 }
  0x9a   :  { %v171_v9 = vpop.permute.xlu1 %170  ;;  %v169_v18 = vpop.permute.xlu0 %168  ;;  %5067 = vmatprep.subr.bf16.mxu0 %v6194_v7  ;;  %v341_v59 = vsub.f32 %v6162_v29, %v8165_v40  ;;  %v6244_v26 = vsub.f32 %v146_v34, %v250_v51  ;;  %v254_v46 = vand.u32 4294901760, %v165_v22  ;;  %v6253_v40 = vsub.f32 %v145_v33, %v252_v53 }
  0x9b   :  { %v173_v35 = vsel %vm172_vm8, %v169_v18, %v171_v9  ;;  %v174_v10 = vsel %vm172_vm8, %v171_v9, %v169_v18  ;;  %5069 = vmatpush1.bf16.msra.mxu0 %v6198_v31  ;;  %v6236_v18 = vsub.f32 %v6118_v63, %v244_v21  ;;  %v256_v63 = vand.u32 4294901760, %v6215_v0 }
  0x9c   :  { %v183_v62 = vmul.f32 %v6128_v11, %v173_v35  ;;  %v184_v23 = vmul.f32 %v6131_v12, %v174_v10  ;;  %v358_v37 = vand.u32 4294901760, %v6227_v20  ;;  %v352_v51 = vand.u32 4294901760, %v6224_v3 }
  0x9d   :  { %v370_v12 = vand.u32 4294901760, %v6236_v18  ;;  %v336_v56 = vand.u32 4294901760, %v335_v24  ;;  %v388_v33 = vand.u32 4294901760, %v6244_v26  ;;  %v342_v55 = vand.u32 4294901760, %v341_v59 }
  0x9e   :  { %v258_v10 = vand.u32 4294901760, %v184_v23  ;;  %v260_v8 = vand.u32 4294901760, %v183_v62  ;;  %v190_v9 = vpop.permute.xlu1 %189  ;;  %v188_v35 = vpop.permute.xlu0 %187  ;;  %v394_v24 = vand.u32 4294901760, %v6253_v40  ;;  %v359_v59 = vsub.f32 %v6227_v20, %v358_v37 }
  0x9f   :  { %v192_v21 = vsel %vm191_vm9, %v188_v35, %v190_v9  ;;  %v193_v38 = vsel %vm191_vm9, %v190_v9, %v188_v35  ;;  %v8277_v9 = vand.u32 4294901760, %v6207_v61  ;;  %v371_v4 = vsub.f32 %v6236_v18, %v370_v12 }
  0xa0   :  { %v202_v34 = vmul.f32 %v6175_v28, %v192_v21  ;;  %v203_v2 = vmul.f32 %v6178_v30, %v193_v38  ;;  %v6259_v11 = vpack.c.bf16 %v258_v10, %v254_v46  ;;  %v6261_v57 = vpack.c.bf16 %v260_v8, %v256_v63 }
  0xa1   :  { %v365_v35 = vsub.f32 %v6207_v61, %v8277_v9  ;;  %v6267_v53 = vsub.f32 %v184_v23, %v258_v10  ;;  %v330_v28 = vand.u32 4294901760, %v329_v60  ;;  %v8194_v30 = vmov 1.0  }
  0xa2   :  { %v264_v6 = vand.u32 4294901760, %v202_v34  ;;  %v262_v21 = vand.u32 4294901760, %v203_v2  ;;  %5071 = vmatprep.subr.bf16.mxu0 %v6259_v11  ;;  %v348_v23 = vand.u32 4294901760, %v6205_v54  ;;  %v353_v60 = vsub.f32 %v6224_v3, %v352_v51 }
  0xa3   :  { %5073 = vmatpush1.bf16.msra.mxu0 %v6261_v57  ;;  %v6285_v10 = vsub.f32 %v165_v22, %v254_v46  ;;  %v6290_v43 = vsub.f32 %v183_v62, %v260_v8  ;;  %v366_v42 = vand.u32 4294901760, %v365_v35  ;;  %v389_v32 = vsub.f32 %v6244_v26, %v388_v33 }
  0xa4   :  { %v6278_v9 = vpack.c.bf16 %v8194_v30, %v264_v6  ;;  %v6288_v47 = vpack.c.bf16 %v8194_v30, %v262_v21  ;;  %v6294_v13 = vsub.f32 %v203_v2, %v262_v21  ;;  %v5080_v54 = vpack.c.bf16 %v342_v55, %v330_v28 }
  0xa5   :  { %v319_v46 = vand.u32 4294901760, %v6212_v1  ;;  %v412_v22 = vand.u32 4294901760, %v6267_v53  ;;  %v395_v30 = vsub.f32 %v6253_v40, %v394_v24  ;;  %v6303_v62 = vsub.f32 %v6215_v0, %v256_v63 }
  0xa6   :  { %5076 = vmatprep.subr.msk.bf16.mxu0 %vm6272_vm11, %v6288_v47  ;;  %v354_v2 = vand.u32 4294901760, %v353_v60  ;;  %v5082_v8 = vpack.c.bf16 %v348_v23, %v336_v56  ;;  %v360_v55 = vand.u32 4294901760, %v359_v59  ;;  %v372_v28 = vand.u32 4294901760, %v371_v4 }
  0xa7   :  { %5079 = vmatpush1.bf16.msk.msra.mxu0 %vm6272_vm11, %v6278_v9  ;;  %v400_v1 = vand.u32 4294901760, %v6285_v10  ;;  %v418_v35 = vand.u32 4294901760, %v6290_v43  ;;  %v6313_v21 = vsub.f32 %v202_v34, %v264_v6  ;;  %v390_v63 = vand.u32 4294901760, %v389_v32 }
  0xa8   :  { %5081 = vmatprep.subr.bf16.mxu0 %v5080_v54  ;;  %v5084_v0 = vpack.c.bf16 %v366_v42, %v354_v2  ;;  %v413_v16 = vsub.f32 %v6267_v53, %v412_v22  ;;  %v8282_v54 = vand.u32 4294901760, %v6162_v29  ;;  %v8283_v23 = vand.u32 4294901760, %v6146_v27 }
  0xa9   :  { %v8284_v59 = vand.u32 4294901760, %v6134_v19  ;;  %v406_v42 = vand.u32 4294901760, %v6303_v62  ;;  %v396_v32 = vand.u32 4294901760, %v395_v30  ;;  %v8285_v6 = vmov 0.0  }
  0xaa   :  { %320 = vmatmul.mubr.f32.vlgmr.msra.gmra.mrb[0].mxu0 %v319_v46  ;;  %v6321_v56 = vpack.c.bf16 %v8282_v54, %v8281_v15  ;;  %v8286_v34 = vand.u32 4294901760, %v6207_v61  ;;  %v6335_v2 = vpack.c.bf16 %v370_v12, %v358_v37  ;;  %v401_v15 = vsub.f32 %v6285_v10, %v400_v1 }
  0xab   :  { %v6327_v4 = vpack.c.bf16 %v8284_v59, %v8283_v23  ;;  %5083 = vmatpush1.bf16.msra.mxu0 %v5082_v8  ;;  %490 = vmatprep.mubr.f32.mxu0 %v8285_v6  ;;  %v8287_v54 = vand.u32 4294901760, %v6082_v48  ;;  %v8288_v23 = vand.u32 4294901760, %v6093_v52  ;;  %v6346_v30 = vpack.c.bf16 %v412_v22, %v400_v1 }
  0xac   :  { %v6333_v46 = vpack.c.bf16 %v8286_v34, %v352_v51  ;;  %5085 = vmatprep.subr.bf16.mxu0 %v5084_v0  ;;  %v419_v8 = vsub.f32 %v6290_v43, %v418_v35  ;;  %v430_v51 = vand.u32 4294901760, %v6313_v21  ;;  %v5086_v34 = vpack.c.bf16 %v372_v28, %v360_v55 }
  0xad   :  { %v6340_v60 = vpack.c.bf16 %v388_v33, %v8287_v54  ;;  %v6344_v59 = vpack.c.bf16 %v394_v24, %v8288_v23  ;;  %v6350_v12 = vpack.c.bf16 %v418_v35, %v406_v42  ;;  %v8289_v37 = vand.u32 4294901760, %v6159_v41 }
  0xae   :  { %v414_v5 = vand.u32 4294901760, %v413_v16  ;;  %v8290_v33 = vand.u32 4294901760, %v6294_v13  ;;  %v437_v24 = vsub.f32 %v6033_v17, %v6309_v36  ;;  %v407_v22 = vsub.f32 %v6303_v62, %v406_v42 }
  0xaf   :  { %v5088_v0 = vpack.c.bf16 %v390_v63, %v8289_v37  ;;  %5087 = vmatpush1.bf16.msra.mxu0 %v5086_v34  ;;  %v402_v1 = vand.u32 4294901760, %v401_v15  ;;  %v431_v55 = vsub.f32 %v6313_v21, %v430_v51  ;;  %v5090_v28 = vpack.c.bf16 %v396_v32, %v384_v14 }
  0xb0   :  { %v425_v54 = vsub.f32 %v6294_v13, %v8290_v33  ;;  %v420_v41 = vand.u32 4294901760, %v419_v8  ;;  %v6363_v63 = vand.u32 4294901760, %v437_v24  ;;  %v408_v23 = vand.u32 4294901760, %v407_v22 }
  0xb1   :  { %5089 = vmatprep.subr.bf16.mxu0 %v5088_v0  ;;  %v5092_v35 = vpack.c.bf16 %v414_v5, %v402_v1  ;;  %v432_v33 = vand.u32 4294901760, %v431_v55  ;;  %v5100_v34 = vpack.c.bf16 %v6162_v29, %v6164_v39  ;;  %v5102_v5 = vpack.c.bf16 %v6134_v19, %v6146_v27 }
  0xb2   :  { %v426_v16 = vand.u32 4294901760, %v425_v54  ;;  %v5094_v37 = vpack.c.bf16 %v420_v41, %v408_v23  ;;  %v5104_v14 = vpack.c.bf16 %v6207_v61, %v6224_v3  ;;  %v5106_v32 = vpack.c.bf16 %v6236_v18, %v6227_v20  ;;  %v8294_v3 = vld [vmem:[#allocation9_spill] sm:$0xff]  ;;  %v8295_v18 = vld [vmem:[#allocation10_spill] sm:$0xff]  ;;  %v8298_v41 = vld [vmem:[#allocation11_spill] sm:$0xff] }
  0xb3   :  { %5091 = vmatpush1.bf16.msra.mxu0 %v5090_v28  ;;  %v5098_v15 = vpack.c.bf16 %v6363_v63, %v432_v33  ;;  %v5108_v29 = vpack.c.bf16 %v6244_v26, %v6082_v48  ;;  %v5110_v19 = vpack.c.bf16 %v6253_v40, %v6093_v52  ;;  %v5112_v27 = vpack.c.bf16 %v6267_v53, %v6285_v10  ;;  %v5013_v10 = vld [vmem:[%s8154_s3 + $0x8] sm:$0xff] }
  0xb4   :  { %5093 = vmatprep.subr.bf16.mxu0 %v5092_v35  ;;  %v5096_v42 = vpack.c.bf16 %v6363_v63, %v426_v16  ;;  %v5114_v39 = vpack.c.bf16 %v6290_v43, %v6303_v62  ;;  %v5116_v61 = vpack.c.bf16 %v6033_v17, %v6294_v13  ;;  %v5118_v48 = vpack.c.bf16 %v6033_v17, %v6313_v21  ;;  %v8296_v62 = vld [vmem:[#allocation7_spill] sm:$0xff]  ;;  %v8299_v16 = vld [vmem:[#allocation12_spill] sm:$0xff] }
  0xb5   :  { %v8291_v43 = vand.u32 4294901760, %v6138_v25  ;;  %v8292_v52 = vand.u32 4294901760, %v6294_v13 }
  0xb7   :  { %5095 = vmatpush1.bf16.msra.mxu0 %v5094_v37  ;;  %v5158_v40 = vpack.c.bf16 %v6309_v36, %v8292_v52 }
  0xb8   :  { %5097 = vmatprep.subr.bf16.mxu0 %v5096_v42  ;;  %v8300_v42 = vld [vmem:[#allocation13_spill] sm:$0xff] }
  0xbb   :  { %5099 = vmatpush1.bf16.msra.mxu0 %v5098_v15 }
  0xbc   :  { %5101 = vmatprep.subr.bf16.mxu0 %v5100_v34  ;;  %v8301_v34 = vld [vmem:[#allocation14_spill] sm:$0xff] }
  0xbe   :  { %492 = vmatmul.mubr.f32.vlgmr.msra.gmra.mrb[0].mxu0 %v6104_v58 }
  0xbf   :  { %5103 = vmatpush1.bf16.msra.mxu0 %v5102_v5  ;;  %602 = vmatprep.mubr.f32.mxu0 %v8285_v6 }
  0xc0   :  { %5105 = vmatprep.subr.bf16.mxu0 %v5104_v14 }
  0xc3   :  { %5107 = vmatpush1.bf16.msra.mxu0 %v5106_v32 }
  0xc4   :  { %5109 = vmatprep.subr.bf16.mxu0 %v5108_v29 }
  0xc7   :  { %5111 = vmatpush1.bf16.msra.mxu0 %v5110_v19 }
  0xc8   :  { %5113 = vmatprep.subr.bf16.mxu0 %v5112_v27 }
  0xcb   :  { %5115 = vmatpush1.bf16.msra.mxu0 %v5114_v39 }
  0xcc   :  { %5117 = vmatprep.subr.bf16.mxu0 %v5116_v61 }
  0xcf   :  { %5119 = vmatpush1.bf16.msra.mxu0 %v5118_v48 }
  0xd0   :  { %5121 = vmatprep.subr.bf16.mxu0 %v6084_v49 }
  0xd2   :  { %605 = vmatmul.mubr.f32.vlgmr.msra.gmra.mrb[0].mxu0 %v6138_v25  ;;  %v5160_v25 = vpack.c.bf16 %v6309_v36, %v430_v51 }
  0xd3   :  { %5123 = vmatpush1.bf16.msra.mxu0 %v6086_v50  ;;  %695 = vmatprep.mubr.f32.mxu0 %v8285_v6 }
  0xd4   :  { %5125 = vmatprep.subr.bf16.mxu0 %v6166_v44 }
  0xd7   :  { %5127 = vmatpush1.bf16.msra.mxu0 %v6168_v45 }
  0xd8   :  { %5129 = vmatprep.subr.bf16.mxu0 %v6194_v7 }
  0xdb   :  { %5131 = vmatpush1.bf16.msra.mxu0 %v6198_v31 }
  0xdc   :  { %5133 = vmatprep.subr.bf16.mxu0 %v6259_v11 }
  0xdf   :  { %5135 = vmatpush1.bf16.msra.mxu0 %v6261_v57 }
  0xe0   :  { %5138 = vmatprep.subr.msk.bf16.mxu0 %vm6272_vm11, %v6288_v47 }
  0xe3   :  { %5141 = vmatpush1.bf16.msk.msra.mxu0 %vm6272_vm11, %v6278_v9 }
  0xe4   :  { %5143 = vmatprep.subr.bf16.mxu0 %v6321_v56 }
  0xe6   :  { %699 = vmatmul.mubr.f32.vlgmr.msra.gmra.mrb[0].mxu0 %v8291_v43 }
  0xe7   :  { %5145 = vmatpush1.bf16.msra.mxu0 %v6327_v4  ;;  %829 = vmatprep.mubr.f32.mxu0 %v8285_v6 }
  0xe8   :  { %5147 = vmatprep.subr.bf16.mxu0 %v6333_v46 }
  0xeb   :  { %5149 = vmatpush1.bf16.msra.mxu0 %v6335_v2 }
  0xec   :  { %5151 = vmatprep.subr.bf16.mxu0 %v6340_v60  ;;  %v8297_v60 = vld [vmem:[#allocation8_spill] sm:$0xff] }
  0xef   :  { %5153 = vmatpush1.bf16.msra.mxu0 %v6344_v59 }
  0xf0   :  { %5155 = vmatprep.subr.bf16.mxu0 %v6346_v30  ;;  %v1036_v30 = vsel %vm226_vm5, %v5013_v10, 0 }
  0xf1   :  { %v6501_v55 = vand.u32 4294901760, %v1036_v30 }
  0xf3   :  { %5157 = vmatpush1.bf16.msra.mxu0 %v6350_v12  ;;  %v6518_v19 = vsub.f32 %v1036_v30, %v6501_v55 }
  0xf4   :  { %5159 = vmatprep.subr.bf16.mxu0 %v5158_v40 }
  0xf7   :  { %5161 = vmatpush1.bf16.msra.mxu0 %v5160_v25 }
  0xf8   :  { %5163 = vmatprep.subr.bf16.mxu0 %v6084_v49 }
  0xfa   :  { %831 = vmatmul.mubr.f32.vlgmr.msra.gmra.mrb[0].mxu0 %v6104_v58 }
  0xfb   :  { %5165 = vmatpush1.bf16.msra.mxu0 %v6086_v50  ;;  %921 = vmatprep.mubr.f32.mxu0 %v8285_v6 }
  0xfc   :  { %5167 = vmatprep.subr.bf16.mxu0 %v6166_v44 }
  0xff   :  { %5169 = vmatpush1.bf16.msra.mxu0 %v6168_v45 }
 0x100   :  { %5171 = vmatprep.subr.bf16.mxu0 %v6194_v7 }
 0x103   :  { %5173 = vmatpush1.bf16.msra.mxu0 %v6198_v31 }
 0x104   :  { %5175 = vmatprep.subr.bf16.mxu0 %v6259_v11 }
 0x107   :  { %5177 = vmatpush1.bf16.msra.mxu0 %v6261_v57 }
 0x108   :  { %5180 = vmatprep.subr.msk.bf16.mxu0 %vm6272_vm11, %v6288_v47 }
 0x10b   :  { %5183 = vmatpush1.bf16.msk.msra.mxu0 %vm6272_vm11, %v6278_v9 }
 0x10e   :  { %923 = vmatmul.mubr.f32.vlgmr.msra.gmra.mrb[0].mxu0 %v6104_v58 }
 0x10f   :  { %1942 = vmatprep.mubr.f32.mxu0 %v8285_v6 }
 0x1e1   :  { %v924_v13 = vpop.f32.mrb[0].mxu0 }
 0x1e2   :  { %v6440_v49 = vmax.f32 %v924_v13, 0.0  ;;  %v926_v50 = vpop.f32.mrb[1].mxu0 }
 0x1e3   :  { %v6442_v44 = vmax.f32 %v926_v50, 0.0 }
 0x1e4   :  { %933 = vrot.lane.b32.xlu0 %v6440_v49, %s5908_s0  ;;  %v1056_v1 = vand.u32 4294901760, %v6440_v49 }
 0x1e5   :  { %935 = vrot.lane.b32.xlu1 %v6442_v44, %s5908_s0  ;;  %v1054_v14 = vand.u32 4294901760, %v6442_v44 }
 0x1e6   :  { %v6515_v29 = vsub.f32 %v6440_v49, %v1056_v1 }
 0x1e8   :  { %943 = vrot.lane.b32.xlu0 %v6440_v49, %s5907_s25 }
 0x1e9   :  { %945 = vrot.lane.b32.xlu1 %v6442_v44, %s5907_s25 }
 0x1ec   :  { %953 = vrot.lane.b32.xlu0 %v6440_v49, %s5910_s28 }
 0x1ed   :  { %955 = vrot.lane.b32.xlu1 %v6442_v44, %s5910_s28 }
 0x1f0   :  { %963 = vrot.lane.b32.xlu0 %v6440_v49, %s5911_s29 }
 0x1f1   :  { %965 = vrot.lane.b32.xlu1 %v6442_v44, %s5911_s29 }
 0x1f4   :  { %975 = vrot.lane.b32.xlu0 %v6440_v49, %s5912_s30 }
 0x1f5   :  { %977 = vrot.lane.b32.xlu1 %v6442_v44, %s5912_s30 }
 0x1f8   :  { %985 = vrot.lane.b32.xlu0 %v6440_v49, %s5913_s6 }
 0x1f9   :  { %987 = vrot.lane.b32.xlu1 %v6442_v44, %s5913_s6 }
 0x1fc   :  { %995 = vrot.lane.b32.xlu0 %v6440_v49, %s5914_s7 }
 0x1fd   :  { %997 = vrot.lane.b32.xlu1 %v6442_v44, %s5914_s7 }
 0x200   :  { %1005 = vrot.lane.b32.xlu0 %v6440_v49, %s5915_s8 }
 0x201   :  { %1007 = vrot.lane.b32.xlu1 %v6442_v44, %s5915_s8 }
 0x256   :  { %v934_v47 = vpop.permute.xlu0 %933 }
 0x257   :  { %v936_v57 = vpop.permute.xlu1 %935 }
 0x258   :  { %v937_v11 = vsel %vm56_vm2, %v934_v47, %v936_v57  ;;  %v938_v45 = vsel %vm56_vm2, %v936_v57, %v934_v47  ;;  %v8302_v47 = vld [vmem:[#allocation15_spill] sm:$0xff] }
 0x259   :  { %v939_v20 = vmul.f32 %v938_v45, %v8294_v3  ;;  %v940_v26 = vmul.f32 %v937_v11, %v8295_v18  ;;  %v6534_v11 = vsub.f32 %v6442_v44, %v1054_v14  ;;  %v8303_v45 = vld [vmem:[#allocation16_spill] sm:$0xff] }
 0x25a   :  { %v944_v7 = vpop.permute.xlu0 %943 }
 0x25b   :  { %v946_v31 = vpop.permute.xlu1 %945  ;;  %v1038_v8 = vand.u32 4294901760, %v940_v26  ;;  %v1040_v51 = vand.u32 4294901760, %v939_v20 }
 0x25c   :  { %v947_v53 = vsel %vm75_vm1, %v944_v7, %v946_v31  ;;  %v948_v9 = vsel %vm75_vm1, %v946_v31, %v944_v7 }
 0x25d   :  { %v949_v21 = vmul.f32 %v948_v9, %v8296_v62  ;;  %v950_v56 = vmul.f32 %v947_v53, %v8297_v60  ;;  %v6520_v27 = vsub.f32 %v940_v26, %v1038_v8  ;;  %v6522_v39 = vsub.f32 %v939_v20, %v1040_v51 }
 0x25e   :  { %v954_v4 = vpop.permute.xlu0 %953 }
 0x25f   :  { %v1042_v46 = vand.u32 4294901760, %v950_v56  ;;  %v1044_v2 = vand.u32 4294901760, %v949_v21  ;;  %v956_v59 = vpop.permute.xlu1 %955  ;;  %v8204_v53 = vand.u32 4294901760, %v6522_v39 }
 0x260   :  { %v957_v12 = vsel %vm94_vm3, %v954_v4, %v956_v59  ;;  %v958_v0 = vsel %vm94_vm3, %v956_v59, %v954_v4  ;;  %v8205_v4 = vand.u32 4294901760, %v6520_v27 }
 0x261   :  { %v6496_v24 = vpack.c.bf16 %v1042_v46, %v1038_v8  ;;  %v6498_v22 = vpack.c.bf16 %v1044_v2, %v1040_v51  ;;  %v959_v35 = vmul.f32 %v958_v0, %v8298_v41  ;;  %v960_v23 = vmul.f32 %v957_v12, %v8299_v16 }
 0x262   :  { %v964_v54 = vpop.permute.xlu0 %963  ;;  %v6528_v49 = vsub.f32 %v950_v56, %v1042_v46  ;;  %v6530_v50 = vsub.f32 %v949_v21, %v1044_v2  ;;  %v8202_v56 = vand.u32 4294901760, %v6518_v19  ;;  %v8310_v41 = vmov 1.0  }
 0x263   :  { %v966_v28 = vpop.permute.xlu1 %965  ;;  %5185 = vmatprep.subr.bf16.mxu1 %v6496_v24  ;;  %v1046_v52 = vand.u32 4294901760, %v960_v23  ;;  %v1048_v40 = vand.u32 4294901760, %v959_v35 }
 0x264   :  { %v967_v37 = vsel %vm113_vm4, %v964_v54, %v966_v28  ;;  %v968_v33 = vsel %vm113_vm4, %v966_v28, %v964_v54  ;;  %5187 = vmatpush1.bf16.msra.mxu1 %v6498_v22  ;;  %v8203_v2 = vand.u32 4294901760, %v6530_v50  ;;  %v8206_v30 = vand.u32 4294901760, %v6528_v49 }
 0x265   :  { %v969_v15 = vmul.f32 %v968_v33, %v8300_v42  ;;  %v970_v5 = vmul.f32 %v967_v37, %v8301_v34  ;;  %v6554_v51 = vsub.f32 %v960_v23, %v1046_v52  ;;  %v6565_v37 = vsub.f32 %v6522_v39, %v8204_v53 }
 0x266   :  { %v976_v32 = vpop.permute.xlu0 %975  ;;  %v6573_v23 = vsub.f32 %v6518_v19, %v8202_v56 }
 0x267   :  { %v1050_v61 = vand.u32 4294901760, %v970_v5  ;;  %v1052_v48 = vand.u32 4294901760, %v969_v15  ;;  %v978_v43 = vpop.permute.xlu1 %977  ;;  %v1160_v56 = vand.u32 4294901760, %v6554_v51 }
 0x268   :  { %v979_v25 = vsel %vm134_vm6, %v976_v32, %v978_v43  ;;  %v980_v13 = vsel %vm134_vm6, %v978_v43, %v976_v32  ;;  %v8304_v32 = vld [vmem:[#allocation18_spill] sm:$0xff] }
 0x269   :  { %v981_v57 = vmul.f32 %v979_v25, %v8302_v47  ;;  %v982_v7 = vmul.f32 %v980_v13, %v8303_v45  ;;  %v6537_v20 = vpack.c.bf16 %v1050_v61, %v1046_v52  ;;  %v6539_v26 = vpack.c.bf16 %v1052_v48, %v1048_v40  ;;  %v8306_v13 = vld [vmem:[#allocation19_spill] sm:$0xff] }
 0x26a   :  { %v986_v31 = vpop.permute.xlu0 %985  ;;  %v6556_v12 = vsub.f32 %v970_v5, %v1050_v61  ;;  %v6567_v33 = vsub.f32 %v969_v15, %v1052_v48  ;;  %v8305_v5 = vld [vmem:[#allocation17_spill] sm:$0xff]  ;;  %v1137_v15 = vsub.f32 %v6520_v27, %v8205_v4  ;;  %v1155_v48 = vsub.f32 %v6530_v50, %v8203_v2 }
 0x26b   :  { %v1060_v9 = vand.u32 4294901760, %v981_v57  ;;  %v988_v10 = vpop.permute.xlu1 %987  ;;  %v1058_v21 = vand.u32 4294901760, %v982_v7  ;;  %5189 = vmatprep.subr.bf16.mxu1 %v6537_v20  ;;  %v6587_v52 = vsub.f32 %v959_v35, %v1048_v40 }
 0x26c   :  { %v990_v44 = vsel %vm153_vm7, %v988_v10, %v986_v31  ;;  %v989_v59 = vsel %vm153_vm7, %v986_v31, %v988_v10  ;;  %5191 = vmatpush1.bf16.msra.mxu1 %v6539_v26  ;;  %v1149_v10 = vsub.f32 %v6528_v49, %v8206_v30  ;;  %v1172_v46 = vand.u32 4294901760, %v6556_v12  ;;  %v8308_v30 = vld [vmem:[#allocation21_spill] sm:$0xff] }
 0x26d   :  { %v6558_v54 = vpack.c.bf16 %v1058_v21, %v1054_v14  ;;  %v6560_v28 = vpack.c.bf16 %v1060_v9, %v1056_v1  ;;  %v992_v43 = vmul.f32 %v990_v44, %v8304_v32  ;;  %v991_v14 = vmul.f32 %v989_v59, %v8305_v5  ;;  %v8307_v59 = vld [vmem:[#allocation20_spill] sm:$0xff] }
 0x26e   :  { %v996_v0 = vpop.permute.xlu0 %995  ;;  %v6594_v44 = vsub.f32 %v982_v7, %v1058_v21  ;;  %v1178_v35 = vand.u32 4294901760, %v6567_v33  ;;  %v6600_v40 = vsub.f32 %v981_v57, %v1060_v9  ;;  %v1144_v57 = vand.u32 4294901760, %v6565_v37 }
 0x26f   :  { %v998_v25 = vpop.permute.xlu1 %997  ;;  %5193 = vmatprep.subr.bf16.mxu1 %v6558_v54  ;;  %v1064_v4 = vand.u32 4294901760, %v991_v14  ;;  %v1173_v45 = vsub.f32 %v6556_v12, %v1172_v46  ;;  %v1150_v37 = vand.u32 4294901760, %v1149_v10 }
 0x270   :  { %v999_v1 = vsel %vm172_vm8, %v996_v0, %v998_v25  ;;  %v1000_v61 = vsel %vm172_vm8, %v998_v25, %v996_v0  ;;  %5195 = vmatpush1.bf16.msra.mxu1 %v6560_v28  ;;  %v1196_v47 = vand.u32 4294901760, %v6594_v44  ;;  %v1179_v16 = vsub.f32 %v6567_v33, %v1178_v35 }
 0x271   :  { %v1001_v31 = vmul.f32 %v999_v1, %v8306_v13  ;;  %v1002_v0 = vmul.f32 %v1000_v61, %v8307_v59  ;;  %v1062_v1 = vand.u32 4294901760, %v992_v43  ;;  %v1166_v61 = vand.u32 4294901760, %v6587_v52  ;;  %v8309_v13 = vld [vmem:[#allocation22_spill] sm:$0xff] }
 0x272   :  { %v1006_v25 = vpop.permute.xlu0 %1005  ;;  %v1174_v62 = vand.u32 4294901760, %v1173_v45  ;;  %v1197_v10 = vsub.f32 %v6594_v44, %v1196_v47 }
 0x273   :  { %v1068_v2 = vand.u32 4294901760, %v1001_v31  ;;  %v1008_v53 = vpop.permute.xlu1 %1007  ;;  %v1066_v8 = vand.u32 4294901760, %v1002_v0  ;;  %v1167_v3 = vsub.f32 %v6587_v52, %v1166_v61 }
 0x274   :  { %v1009_v7 = vsel %vm191_vm9, %v1006_v25, %v1008_v53  ;;  %v1010_v21 = vsel %vm191_vm9, %v1008_v53, %v1006_v25  ;;  %v1156_v25 = vand.u32 4294901760, %v1155_v48  ;;  %v6633_v48 = vsub.f32 %v992_v43, %v1062_v1 }
 0x275   :  { %v1011_v59 = vmul.f32 %v1009_v7, %v8308_v30  ;;  %v1012_v32 = vmul.f32 %v1010_v21, %v8309_v13  ;;  %v6610_v9 = vpack.c.bf16 %v1066_v8, %v1062_v1  ;;  %v6612_v5 = vpack.c.bf16 %v1068_v2, %v1064_v4 }
 0x276   :  { %v6616_v34 = vsub.f32 %v1002_v0, %v1066_v8  ;;  %v1202_v7 = vand.u32 4294901760, %v6600_v40  ;;  %v1161_v21 = vsub.f32 %v6554_v51, %v1160_v56  ;;  %v6622_v13 = vsub.f32 %v991_v14, %v1064_v4 }
 0x277   :  { %v1070_v42 = vand.u32 4294901760, %v1012_v32  ;;  %v1072_v53 = vand.u32 4294901760, %v1011_v59  ;;  %5197 = vmatprep.subr.bf16.mxu1 %v6610_v9  ;;  %v6624_v30 = vsub.f32 %v1001_v31, %v1068_v2  ;;  %v1138_v0 = vand.u32 4294901760, %v1137_v15 }
 0x278   :  { %5199 = vmatpush1.bf16.msra.mxu1 %v6612_v5  ;;  %v1127_v4 = vand.u32 4294901760, %v6573_v23  ;;  %v8312_v2 = vand.u32 4294901760, %v6534_v11  ;;  %v1220_v31 = vand.u32 4294901760, %v6616_v34  ;;  %v5208_v45 = vpack.c.bf16 %v1156_v25, %v1144_v57 }
 0x279   :  { %v6627_v60 = vpack.c.bf16 %v8310_v41, %v1070_v42  ;;  %v6630_v8 = vpack.c.bf16 %v8310_v41, %v1072_v53  ;;  %v6645_v43 = vsub.f32 %v1012_v32, %v1070_v42  ;;  %v5206_v15 = vpack.c.bf16 %v1150_v37, %v1138_v0 }
 0x27a   :  { %v1185_v14 = vsub.f32 %v6534_v11, %v8312_v2  ;;  %v1162_v1 = vand.u32 4294901760, %v1161_v21  ;;  %v1203_v41 = vsub.f32 %v6600_v40, %v1202_v7  ;;  %v1214_v18 = vand.u32 4294901760, %v6622_v13 }
 0x27b   :  { %8311 = vst [vmem:[#allocation24_spill] sm:$0xff] %v6630_v8  ;;  %5202 = vmatprep.subr.msk.bf16.mxu1 %vm6272_vm11, %v6627_v60  ;;  %v1226_v58 = vand.u32 4294901760, %v6624_v30  ;;  %v1180_v23 = vand.u32 4294901760, %v1179_v16  ;;  %v6653_v36 = vsub.f32 %v1011_v59, %v1072_v53  ;;  %v1198_v42 = vand.u32 4294901760, %v1197_v10 }
 0x27c   :  { %5205 = vmatpush1.bf16.msk.msra.mxu1 %vm6272_vm11, %v6630_v8  ;;  %v5210_v2 = vpack.c.bf16 %v1174_v62, %v1162_v1  ;;  %v1208_v32 = vand.u32 4294901760, %v6633_v48  ;;  %v1221_v57 = vsub.f32 %v6616_v34, %v1220_v31  ;;  %v8313_v25 = vand.u32 4294901760, %v6520_v27 }
 0x27d   :  { %5207 = vmatprep.subr.bf16.mxu1 %v5206_v15  ;;  %v8314_v37 = vand.u32 4294901760, %v6528_v49  ;;  %v8315_v0 = vand.u32 4294901760, %v6522_v39  ;;  %v8316_v8 = vand.u32 4294901760, %v6530_v50  ;;  %v6669_v59 = vpack.c.bf16 %v1172_v46, %v1160_v56 }
 0x27e   :  { %v1232_v62 = vand.u32 4294901760, %v6645_v43  ;;  %v6672_v53 = vpack.c.bf16 %v1178_v35, %v1166_v61  ;;  %v8317_v10 = vand.u32 4294901760, %v6534_v11  ;;  %v8318_v1 = vand.u32 4294901760, %v6515_v29 }
 0x27f   :  { %v6661_v21 = vpack.c.bf16 %v8314_v37, %v8313_v25  ;;  %v6667_v16 = vpack.c.bf16 %v8316_v8, %v8315_v0  ;;  %1128 = vmatmul.mubr.f32.vlgmr.msra.gmra.mrb[0].mxu1 %v1127_v4  ;;  %v1168_v37 = vand.u32 4294901760, %v1167_v3  ;;  %v6686_v46 = vpack.c.bf16 %v1220_v31, %v1208_v32 }
 0x280   :  { %v6676_v15 = vpack.c.bf16 %v1196_v47, %v8317_v10  ;;  %v6680_v25 = vpack.c.bf16 %v1202_v7, %v8318_v1  ;;  %5209 = vmatpush1.bf16.msra.mxu1 %v5208_v45  ;;  %v8319_v8 = vmov %v8318_v1  ;;  %1298 = vmatprep.mubr.f32.mxu1 %v8285_v6  ;;  %v6688_v35 = vpack.c.bf16 %v1226_v58, %v1214_v18 }
 0x281   :  { %v1191_v56 = vsub.f32 %v6515_v29, %v8319_v8  ;;  %5211 = vmatprep.subr.bf16.mxu1 %v5210_v2  ;;  %v1186_v61 = vand.u32 4294901760, %v1185_v14  ;;  %v1209_v47 = vsub.f32 %v6633_v48, %v1208_v32  ;;  %v1227_v4 = vsub.f32 %v6624_v30, %v1226_v58 }
 0x282   :  { %v1238_v7 = vand.u32 4294901760, %v6653_v36  ;;  %v5212_v45 = vpack.c.bf16 %v1180_v23, %v1168_v37  ;;  %v1204_v3 = vand.u32 4294901760, %v1203_v41  ;;  %v1222_v10 = vand.u32 4294901760, %v1221_v57 }
 0x283   :  { %v5214_v0 = vpack.c.bf16 %v1198_v42, %v1186_v61  ;;  %v1233_v1 = vsub.f32 %v6645_v43, %v1232_v62  ;;  %v1215_v31 = vsub.f32 %v6622_v13, %v1214_v18  ;;  %v1192_v8 = vand.u32 4294901760, %v1191_v56 }
 0x284   :  { %5213 = vmatpush1.bf16.msra.mxu1 %v5212_v45  ;;  %v1210_v14 = vand.u32 4294901760, %v1209_v47  ;;  %v1239_v58 = vsub.f32 %v6653_v36, %v1238_v7  ;;  %v1228_v32 = vand.u32 4294901760, %v1227_v4  ;;  %v5226_v56 = vpack.c.bf16 %v6528_v49, %v6520_v27 }
 0x285   :  { %5215 = vmatprep.subr.bf16.mxu1 %v5214_v0  ;;  %v5216_v2 = vpack.c.bf16 %v1204_v3, %v1192_v8  ;;  %v1234_v41 = vand.u32 4294901760, %v1233_v1  ;;  %v1216_v42 = vand.u32 4294901760, %v1215_v31  ;;  %v5228_v47 = vpack.c.bf16 %v6530_v50, %v6522_v39  ;;  %v5016_v1 = vld [vmem:[%s8154_s3 + $0x10] sm:$0xff]  ;;  %v8328_v8 = vld [vmem:[#allocation7_spill] sm:$0xff] }
 0x286   :  { %v5218_v23 = vpack.c.bf16 %v1222_v10, %v1210_v14  ;;  %v1240_v37 = vand.u32 4294901760, %v1239_v58  ;;  %v5230_v4 = vpack.c.bf16 %v6556_v12, %v6554_v51  ;;  %v5232_v45 = vpack.c.bf16 %v6567_v33, %v6587_v52  ;;  %v8329_v58 = vld [vmem:[#allocation8_spill] sm:$0xff] }
 0x287   :  { %v5220_v57 = vpack.c.bf16 %v1228_v32, %v1216_v42  ;;  %v5222_v61 = vpack.c.bf16 %v6363_v63, %v1234_v41  ;;  %v5234_v27 = vpack.c.bf16 %v6594_v44, %v6534_v11  ;;  %v5236_v39 = vpack.c.bf16 %v6600_v40, %v6515_v29 }
 0x288   :  { %5217 = vmatpush1.bf16.msra.mxu1 %v5216_v2  ;;  %v5224_v18 = vpack.c.bf16 %v6363_v63, %v1240_v37  ;;  %v5238_v49 = vpack.c.bf16 %v6616_v34, %v6633_v48  ;;  %v5240_v50 = vpack.c.bf16 %v6624_v30, %v6622_v13  ;;  %v5242_v51 = vpack.c.bf16 %v6033_v17, %v6645_v43  ;;  %v8320_v34 = vld [vmem:[#allocation24_spill] sm:$0xff]  ;;  %v8322_v30 = vld [vmem:[#allocation23_spill] sm:$0xff] }
 0x289   :  { %5219 = vmatprep.subr.bf16.mxu1 %v5218_v23  ;;  %v5244_v11 = vpack.c.bf16 %v6033_v17, %v6653_v36  ;;  %v8321_v29 = vand.u32 4294901760, %v6518_v19  ;;  %v5284_v12 = vpack.c.bf16 %v8322_v30, %v1232_v62  ;;  %v43_v36 = vld [vmem:[%s8153_s2] sm:$0xff]  ;;  %v1856_v37 = vsel %vm226_vm5, %v5016_v1, 0 }
 0x28c   :  { %5221 = vmatpush1.bf16.msra.mxu1 %v5220_v57 }
 0x28d   :  { %5223 = vmatprep.subr.bf16.mxu1 %v5222_v61 }
 0x290   :  { %5225 = vmatpush1.bf16.msra.mxu1 %v5224_v18 }
 0x291   :  { %5227 = vmatprep.subr.bf16.mxu1 %v5226_v56 }
 0x293   :  { %1300 = vmatmul.mubr.f32.vlgmr.msra.gmra.mrb[0].mxu1 %v6501_v55 }
 0x294   :  { %5229 = vmatpush1.bf16.msra.mxu1 %v5228_v47  ;;  %1410 = vmatprep.mubr.f32.mxu1 %v8285_v6 }
 0x295   :  { %5231 = vmatprep.subr.bf16.mxu1 %v5230_v4 }
 0x298   :  { %5233 = vmatpush1.bf16.msra.mxu1 %v5232_v45 }
 0x299   :  { %5235 = vmatprep.subr.bf16.mxu1 %v5234_v27 }
 0x29c   :  { %5237 = vmatpush1.bf16.msra.mxu1 %v5236_v39  ;;  %v6851_v39 = vand.u32 4294901760, %v1856_v37 }
 0x29d   :  { %5239 = vmatprep.subr.bf16.mxu1 %v5238_v49  ;;  %v8330_v49 = vld [vmem:[#allocation11_spill] sm:$0xff] }
 0x2a0   :  { %5241 = vmatpush1.bf16.msra.mxu1 %v5240_v50 }
 0x2a1   :  { %5243 = vmatprep.subr.bf16.mxu1 %v5242_v51 }
 0x2a4   :  { %5245 = vmatpush1.bf16.msra.mxu1 %v5244_v11 }
 0x2a5   :  { %5247 = vmatprep.subr.bf16.mxu1 %v6496_v24 }
 0x2a7   :  { %1413 = vmatmul.mubr.f32.vlgmr.msra.gmra.mrb[0].mxu1 %v6518_v19  ;;  %v5286_v19 = vpack.c.bf16 %v8322_v30, %v1238_v7 }
 0x2a8   :  { %5249 = vmatpush1.bf16.msra.mxu1 %v6498_v22  ;;  %1503 = vmatprep.mubr.f32.mxu1 %v8285_v6 }
 0x2a9   :  { %5251 = vmatprep.subr.bf16.mxu1 %v6537_v20 }
 0x2ac   :  { %5253 = vmatpush1.bf16.msra.mxu1 %v6539_v26 }
 0x2ad   :  { %5255 = vmatprep.subr.bf16.mxu1 %v6558_v54 }
 0x2b0   :  { %5257 = vmatpush1.bf16.msra.mxu1 %v6560_v28 }
 0x2b1   :  { %5259 = vmatprep.subr.bf16.mxu1 %v6610_v9 }
 0x2b4   :  { %5261 = vmatpush1.bf16.msra.mxu1 %v6612_v5 }
 0x2b5   :  { %5264 = vmatprep.subr.msk.bf16.mxu1 %vm6272_vm11, %v6627_v60 }
 0x2b8   :  { %5267 = vmatpush1.bf16.msk.msra.mxu1 %vm6272_vm11, %v8320_v34 }
 0x2b9   :  { %5269 = vmatprep.subr.bf16.mxu1 %v6661_v21 }
 0x2bb   :  { %1507 = vmatmul.mubr.f32.vlgmr.msra.gmra.mrb[0].mxu1 %v8321_v29 }
 0x2bc   :  { %5271 = vmatpush1.bf16.msra.mxu1 %v6667_v16  ;;  %1637 = vmatprep.mubr.f32.mxu1 %v8285_v6 }
 0x2bd   :  { %5273 = vmatprep.subr.bf16.mxu1 %v6669_v59 }
 0x2c0   :  { %5275 = vmatpush1.bf16.msra.mxu1 %v6672_v53 }
 0x2c1   :  { %5277 = vmatprep.subr.bf16.mxu1 %v6676_v15  ;;  %v8326_v15 = vld [vmem:[#allocation10_spill] sm:$0xff] }
 0x2c4   :  { %5279 = vmatpush1.bf16.msra.mxu1 %v6680_v25 }
 0x2c5   :  { %5281 = vmatprep.subr.bf16.mxu1 %v6686_v46 }
 0x2c8   :  { %5283 = vmatpush1.bf16.msra.mxu1 %v6688_v35  ;;  %v8327_v35 = vld [vmem:[#allocation9_spill] sm:$0xff] }
 0x2c9   :  { %5285 = vmatprep.subr.bf16.mxu1 %v5284_v12 }
 0x2cc   :  { %5287 = vmatpush1.bf16.msra.mxu1 %v5286_v19 }
 0x2cd   :  { %5289 = vmatprep.subr.bf16.mxu1 %v6496_v24  ;;  %v44_v24 = vld [vmem:[%s8153_s2 + $0x8] sm:$0xff] }
 0x2cf   :  { %1639 = vmatmul.mubr.f32.vlgmr.msra.gmra.mrb[0].mxu1 %v6501_v55 }
 0x2d0   :  { %5291 = vmatpush1.bf16.msra.mxu1 %v6498_v22  ;;  %1729 = vmatprep.mubr.f32.mxu1 %v8285_v6 }
 0x2d1   :  { %5293 = vmatprep.subr.bf16.mxu1 %v6537_v20  ;;  %v1742_v20 = vstv %s5012_s20 }
 0x2d4   :  { %5295 = vmatpush1.bf16.msra.mxu1 %v6539_v26 }
 0x2d5   :  { %5297 = vmatprep.subr.bf16.mxu1 %v6558_v54  ;;  %v1737_v54 = vstv %s47_s21 }
 0x2d8   :  { %5299 = vmatpush1.bf16.msra.mxu1 %v6560_v28 }
 0x2d9   :  { %5301 = vmatprep.subr.bf16.mxu1 %v6610_v9 }
 0x2dc   :  { %5303 = vmatpush1.bf16.msra.mxu1 %v6612_v5 }
 0x2dd   :  { %5306 = vmatprep.subr.msk.bf16.mxu1 %vm6272_vm11, %v6627_v60  ;;  %v5886_v60 = vld [vmem:[%s8152_s1] sm:$0xff] }
 0x2de   :  { %v1740_v22 = vsub.f32 %v43_v36, %v5886_v60  ;;  %v8332_v36 = vld [vmem:[#allocation13_spill] sm:$0xff] }
 0x2e0   :  { %5309 = vmatpush1.bf16.msk.msra.mxu1 %vm6272_vm11, %v8320_v34  ;;  %v1743_v28 = vmul.f32 %v1742_v20, %v1740_v22  ;;  %v8331_v34 = vld [vmem:[#allocation12_spill] sm:$0xff] }
 0x2e3   :  { %1731 = vmatmul.mubr.f32.vlgmr.msra.gmra.mrb[0].mxu1 %v6501_v55  ;;  %v5887_v55 = vld [vmem:[%s8152_s1 + $0x8] sm:$0xff] }
 0x2e4   :  { %2750 = vmatprep.mubr.f32.mxu1 %v8285_v6  ;;  %v1741_v26 = vsub.f32 %v44_v24, %v5887_v55 }
 0x2e6   :  { %v1744_v5 = vmul.f32 %v1742_v20, %v1741_v26 }
 0x3b6   :  { %v1732_v33 = vpop.f32.mrb[0].mxu1 }
 0x3b7   :  { %v1738_v52 = vmul.f32 %v1737_v54, %v1732_v33  ;;  %v1734_v13 = vpop.f32.mrb[1].mxu1  ;;  %v6872_v33 = vsub.f32 %v1856_v37, %v6851_v39 }
 0x3b8   :  { %v1739_v44 = vmul.f32 %v1737_v54, %v1734_v13 }
 0x3b9   :  { %v1745_v40 = vadd.f32 %v1743_v28, %v1738_v52 }
 0x3ba   :  { %v1746_v9 = vadd.f32 %v1744_v5, %v1739_v44 }
 0x3bb   :  { %v6787_v48 = vadd.f32 %v5886_v60, %v1745_v40  ;;  %v8333_v60 = vld [vmem:[#allocation14_spill] sm:$0xff] }
 0x3bc   :  { %v6789_v43 = vadd.f32 %v5887_v55, %v1746_v9 }
 0x3bd   :  { %8323 = vst [vmem:[#allocation24_spill] sm:$0xff] %v6787_v48  ;;  %1753 = vrot.lane.b32.xlu0 %v6787_v48, %s5908_s0  ;;  %v1876_v20 = vand.u32 4294901760, %v6787_v48 }
 0x3be   :  { %8324 = vst [vmem:[#allocation25_spill] sm:$0xff] %v6789_v43  ;;  %1755 = vrot.lane.b32.xlu1 %v6789_v43, %s5908_s0  ;;  %v1874_v28 = vand.u32 4294901760, %v6789_v43 }
 0x3c1   :  { %1763 = vrot.lane.b32.xlu0 %v6787_v48, %s5907_s25 }
 0x3c2   :  { %1765 = vrot.lane.b32.xlu1 %v6789_v43, %s5907_s25 }
 0x3c5   :  { %1773 = vrot.lane.b32.xlu0 %v6787_v48, %s5910_s28 }
 0x3c6   :  { %1775 = vrot.lane.b32.xlu1 %v6789_v43, %s5910_s28 }
 0x3c9   :  { %1783 = vrot.lane.b32.xlu0 %v6787_v48, %s5911_s29 }
 0x3ca   :  { %1785 = vrot.lane.b32.xlu1 %v6789_v43, %s5911_s29 }
 0x3cd   :  { %1795 = vrot.lane.b32.xlu0 %v6787_v48, %s5912_s30 }
 0x3ce   :  { %1797 = vrot.lane.b32.xlu1 %v6789_v43, %s5912_s30 }
 0x3d1   :  { %1805 = vrot.lane.b32.xlu0 %v6787_v48, %s5913_s6 }
 0x3d2   :  { %1807 = vrot.lane.b32.xlu1 %v6789_v43, %s5913_s6 }
 0x3d5   :  { %1815 = vrot.lane.b32.xlu0 %v6787_v48, %s5914_s7 }
 0x3d6   :  { %1817 = vrot.lane.b32.xlu1 %v6789_v43, %s5914_s7 }
 0x3d9   :  { %1825 = vrot.lane.b32.xlu0 %v6787_v48, %s5915_s8 }
 0x3da   :  { %1827 = vrot.lane.b32.xlu1 %v6789_v43, %s5915_s8 }
 0x42f   :  { %v1754_v21 = vpop.permute.xlu0 %1753 }
 0x430   :  { %v1756_v16 = vpop.permute.xlu1 %1755 }
 0x431   :  { %v1757_v62 = vsel %vm56_vm2, %v1754_v21, %v1756_v16  ;;  %v1758_v53 = vsel %vm56_vm2, %v1756_v16, %v1754_v21 }
 0x432   :  { %v1760_v25 = vmul.f32 %v1757_v62, %v8326_v15  ;;  %v1759_v7 = vmul.f32 %v1758_v53, %v8327_v35  ;;  %v6886_v53 = vsub.f32 %v6787_v48, %v1876_v20 }
 0x433   :  { %v1764_v46 = vpop.permute.xlu0 %1763 }
 0x434   :  { %v1766_v3 = vpop.permute.xlu1 %1765  ;;  %v1858_v31 = vand.u32 4294901760, %v1760_v25  ;;  %v1860_v23 = vand.u32 4294901760, %v1759_v7 }
 0x435   :  { %v1767_v0 = vsel %vm75_vm1, %v1764_v46, %v1766_v3  ;;  %v1768_v10 = vsel %vm75_vm1, %v1766_v3, %v1764_v46  ;;  %v8336_v3 = vld [vmem:[#allocation16_spill] sm:$0xff] }
 0x436   :  { %v1769_v14 = vmul.f32 %v1768_v10, %v8328_v8  ;;  %v1770_v2 = vmul.f32 %v1767_v0, %v8329_v58  ;;  %v6841_v18 = vsub.f32 %v1760_v25, %v1858_v31  ;;  %v6868_v26 = vsub.f32 %v1759_v7, %v1860_v23  ;;  %v8335_v25 = vld [vmem:[#allocation15_spill] sm:$0xff] }
 0x437   :  { %v1774_v32 = vpop.permute.xlu0 %1773 }
 0x438   :  { %v1862_v41 = vand.u32 4294901760, %v1770_v2  ;;  %v1864_v42 = vand.u32 4294901760, %v1769_v14  ;;  %v1776_v57 = vpop.permute.xlu1 %1775  ;;  %v1956_v55 = vand.u32 4294901760, %v6841_v18 }
 0x439   :  { %v1778_v61 = vsel %vm94_vm3, %v1776_v57, %v1774_v32  ;;  %v1777_v4 = vsel %vm94_vm3, %v1774_v32, %v1776_v57 }
 0x43a   :  { %v6843_v56 = vpack.c.bf16 %v1864_v42, %v1860_v23  ;;  %v6845_v47 = vsub.f32 %v1770_v2, %v1862_v41  ;;  %v6849_v27 = vpack.c.bf16 %v1862_v41, %v1858_v31  ;;  %v6854_v50 = vmul.f32 %v1778_v61, %v8330_v49 }
 0x43b   :  { %v1784_v45 = vpop.permute.xlu0 %1783  ;;  %v1780_v29 = vmul.f32 %v1777_v4, %v8331_v34  ;;  %v6889_v7 = vsub.f32 %v1769_v14, %v1864_v42  ;;  %v6895_v31 = vsub.f32 %v6789_v43, %v1874_v28  ;;  %v8213_v2 = vand.u32 4294901760, %v6868_v26 }
 0x43c   :  { %v1786_v51 = vpop.permute.xlu1 %1785  ;;  %v1968_v11 = vand.u32 4294901760, %v6845_v47  ;;  %5311 = vmatprep.subr.bf16.mxu0 %v6849_v27  ;;  %v1868_v5 = vand.u32 4294901760, %v6854_v50  ;;  %v8214_v41 = vand.u32 4294901760, %v6872_v33 }
 0x43d   :  { %v1787_v12 = vsel %vm113_vm4, %v1784_v45, %v1786_v51  ;;  %v1788_v19 = vsel %vm113_vm4, %v1786_v51, %v1784_v45  ;;  %5313 = vmatpush1.bf16.msra.mxu0 %v6843_v56  ;;  %v1866_v9 = vand.u32 4294901760, %v1780_v29  ;;  %v8219_v4 = vand.u32 4294901760, %v6889_v7 }
 0x43e   :  { %v1789_v24 = vmul.f32 %v1788_v19, %v8332_v36  ;;  %v1790_v22 = vmul.f32 %v1787_v12, %v8333_v60  ;;  %v6877_v40 = vpack.c.bf16 %v1968_v11, %v1956_v55  ;;  %v8348_v30 = vand.u32 4294901760, %v6889_v7 }
 0x43f   :  { %v1796_v54 = vpop.permute.xlu0 %1795 }
 0x440   :  { %v1870_v52 = vand.u32 4294901760, %v1790_v22  ;;  %v1872_v13 = vand.u32 4294901760, %v1789_v24  ;;  %v1798_v44 = vpop.permute.xlu1 %1797  ;;  %8334 = vst [vmem:[#allocation26_spill] sm:$0xff] %v6877_v40 }
 0x441   :  { %v1799_v21 = vsel %vm134_vm6, %v1796_v54, %v1798_v44  ;;  %v1800_v16 = vsel %vm134_vm6, %v1798_v44, %v1796_v54  ;;  %v8337_v54 = vld [vmem:[#allocation17_spill] sm:$0xff] }
 0x442   :  { %v6883_v62 = vpack.c.bf16 %v1872_v13, %v1868_v5  ;;  %v1801_v46 = vmul.f32 %v1799_v21, %v8335_v25  ;;  %v1802_v0 = vmul.f32 %v1800_v16, %v8336_v3  ;;  %v6892_v1 = vpack.c.bf16 %v1870_v52, %v1866_v9  ;;  %v8338_v16 = vld [vmem:[#allocation18_spill] sm:$0xff] }
 0x443   :  { %v1806_v10 = vpop.permute.xlu0 %1805  ;;  %v6902_v42 = vsub.f32 %v1790_v22, %v1870_v52  ;;  %v6917_v22 = vsub.f32 %v6868_v26, %v8213_v2  ;;  %v6925_v21 = vsub.f32 %v6872_v33, %v8214_v41  ;;  %v1957_v41 = vsub.f32 %v6841_v18, %v1956_v55  ;;  %v8342_v3 = vld [vmem:[#allocation22_spill] sm:$0xff] }
 0x444   :  { %v1880_v32 = vand.u32 4294901760, %v1801_v46  ;;  %v1808_v23 = vpop.permute.xlu1 %1807  ;;  %v1878_v57 = vand.u32 4294901760, %v1802_v0  ;;  %5315 = vmatprep.subr.bf16.mxu0 %v6892_v1 }
 0x445   :  { %v1809_v14 = vsel %vm153_vm7, %v1806_v10, %v1808_v23  ;;  %v1810_v61 = vsel %vm153_vm7, %v1808_v23, %v1806_v10  ;;  %5317 = vmatpush1.bf16.msra.mxu0 %v6883_v62 }
 0x446   :  { %v6904_v37 = vpack.c.bf16 %v1880_v32, %v1876_v20  ;;  %v6910_v51 = vpack.c.bf16 %v1878_v57, %v1874_v28  ;;  %v6919_v20 = vsub.f32 %v1789_v24, %v1872_v13  ;;  %v1811_v52 = vmul.f32 %v1809_v14, %v8337_v54  ;;  %v8339_v24 = vld [vmem:[#allocation19_spill] sm:$0xff]  ;;  %v8340_v14 = vld [vmem:[#allocation20_spill] sm:$0xff] }
 0x447   :  { %v1816_v45 = vpop.permute.xlu0 %1815  ;;  %v6927_v28 = vsub.f32 %v1780_v29, %v1866_v9  ;;  %v1812_v10 = vmul.f32 %v1810_v61, %v8338_v16  ;;  %v1992_v29 = vand.u32 4294901760, %v6902_v42  ;;  %v1975_v9 = vsub.f32 %v6889_v7, %v8219_v4  ;;  %v8341_v16 = vld [vmem:[#allocation21_spill] sm:$0xff] }
 0x448   :  { %v1818_v44 = vpop.permute.xlu1 %1817  ;;  %5319 = vmatprep.subr.bf16.mxu0 %v6910_v51  ;;  %v6944_v61 = vsub.f32 %v6854_v50, %v1868_v5  ;;  %v1884_v12 = vand.u32 4294901760, %v1811_v52 }
 0x449   :  { %v1819_v23 = vsel %vm172_vm8, %v1816_v45, %v1818_v44  ;;  %v1820_v19 = vsel %vm172_vm8, %v1818_v44, %v1816_v45  ;;  %5321 = vmatpush1.bf16.msra.mxu0 %v6904_v37  ;;  %v6946_v45 = vsub.f32 %v1802_v0, %v1878_v57  ;;  %v1980_v5 = vand.u32 4294901760, %v6927_v28 }
 0x44a   :  { %v1821_v13 = vmul.f32 %v1819_v23, %v8339_v24  ;;  %v1822_v2 = vmul.f32 %v1820_v19, %v8340_v14  ;;  %v1969_v19 = vsub.f32 %v6845_v47, %v1968_v11  ;;  %v1998_v23 = vand.u32 4294901760, %v6919_v20 }
 0x44b   :  { %v1826_v44 = vpop.permute.xlu0 %1825  ;;  %v1882_v14 = vand.u32 4294901760, %v1812_v10  ;;  %v6957_v0 = vsub.f32 %v1801_v46, %v1880_v32  ;;  %v1958_v11 = vand.u32 4294901760, %v1957_v41  ;;  %v1993_v24 = vsub.f32 %v6902_v42, %v1992_v29 }
 0x44c   :  { %v1886_v55 = vand.u32 4294901760, %v1822_v2  ;;  %v1888_v43 = vand.u32 4294901760, %v1821_v13  ;;  %v1828_v48 = vpop.permute.xlu1 %1827  ;;  %v2016_v36 = vand.u32 4294901760, %v6946_v45  ;;  %v1986_v34 = vand.u32 4294901760, %v6944_v61 }
 0x44d   :  { %v1829_v4 = vsel %vm191_vm9, %v1826_v44, %v1828_v48  ;;  %v1830_v50 = vsel %vm191_vm9, %v1828_v48, %v1826_v44  ;;  %v1999_v48 = vsub.f32 %v6919_v20, %v1998_v23  ;;  %v1970_v44 = vand.u32 4294901760, %v1969_v19 }
 0x44e   :  { %v6959_v57 = vpack.c.bf16 %v1888_v43, %v1884_v12  ;;  %v1831_v54 = vmul.f32 %v1829_v4, %v8341_v16  ;;  %v1832_v25 = vmul.f32 %v1830_v50, %v8342_v3  ;;  %v6964_v60 = vpack.c.bf16 %v1886_v55, %v1882_v14 }
 0x44f   :  { %v1976_v46 = vand.u32 4294901760, %v1975_v9  ;;  %v6969_v32 = vsub.f32 %v1822_v2, %v1886_v55  ;;  %v1981_v4 = vsub.f32 %v6927_v28, %v1980_v5  ;;  %v2022_v50 = vand.u32 4294901760, %v6957_v0 }
 0x450   :  { %v1890_v49 = vand.u32 4294901760, %v1832_v25  ;;  %v1892_v41 = vand.u32 4294901760, %v1831_v54  ;;  %5323 = vmatprep.subr.bf16.mxu0 %v6964_v60  ;;  %v6974_v3 = vsub.f32 %v1812_v10, %v1882_v14  ;;  %v6976_v16 = vsub.f32 %v1811_v52, %v1884_v12 }
 0x451   :  { %v6978_v58 = vsub.f32 %v1821_v13, %v1888_v43  ;;  %5325 = vmatpush1.bf16.msra.mxu0 %v6959_v57  ;;  %v8343_v19 = vmov 1.0   ;;  %v1994_v55 = vand.u32 4294901760, %v1993_v24  ;;  %v2017_v8 = vsub.f32 %v6946_v45, %v2016_v36 }
 0x452   :  { %v6982_v9 = vpack.c.bf16 %v8343_v19, %v1890_v49  ;;  %v6985_v2 = vpack.c.bf16 %v8343_v19, %v1892_v41  ;;  %v1987_v35 = vsub.f32 %v6944_v61, %v1986_v34  ;;  %v1947_v10 = vand.u32 4294901760, %v6925_v21 }
 0x453   :  { %v1964_v12 = vand.u32 4294901760, %v6917_v22  ;;  %v8346_v43 = vand.u32 4294901760, %v6895_v31  ;;  %v6994_v13 = vsub.f32 %v1832_v25, %v1890_v49  ;;  %v5332_v14 = vpack.c.bf16 %v1970_v44, %v1958_v11 }
 0x454   :  { %8344 = vst [vmem:[#allocation27_spill] sm:$0xff] %v6982_v9  ;;  %8345 = vst [vmem:[#allocation28_spill] sm:$0xff] %v6985_v2  ;;  %5328 = vmatprep.subr.msk.bf16.mxu0 %vm6272_vm11, %v6982_v9  ;;  %v1982_v24 = vand.u32 4294901760, %v1981_v4  ;;  %v2040_v19 = vand.u32 4294901760, %v6969_v32  ;;  %v2023_v15 = vsub.f32 %v6957_v0, %v2022_v50  ;;  %v2046_v21 = vand.u32 4294901760, %v6978_v58 }
 0x455   :  { %v2005_v52 = vsub.f32 %v6895_v31, %v8346_v43  ;;  %5331 = vmatpush1.bf16.msk.msra.mxu0 %vm6272_vm11, %v6985_v2  ;;  %v5334_v22 = vpack.c.bf16 %v1976_v46, %v1964_v12  ;;  %v2000_v43 = vand.u32 4294901760, %v1999_v48  ;;  %v2034_v49 = vand.u32 4294901760, %v6976_v16 }
 0x456   :  { %5333 = vmatprep.subr.bf16.mxu0 %v5332_v14  ;;  %v5336_v25 = vpack.c.bf16 %v1994_v55, %v1982_v24  ;;  %v2018_v59 = vand.u32 4294901760, %v2017_v8  ;;  %v2028_v11 = vand.u32 4294901760, %v6974_v3  ;;  %v7007_v44 = vsub.f32 %v1831_v54, %v1892_v41 }
 0x457   :  { %v8347_v4 = vand.u32 4294901760, %v6868_v26  ;;  %v7015_v9 = vpack.c.bf16 %v1992_v29, %v1980_v5  ;;  %v7017_v2 = vpack.c.bf16 %v1998_v23, %v1986_v34  ;;  %v2041_v48 = vsub.f32 %v6969_v32, %v2040_v19 }
 0x458   :  { %1948 = vmatmul.mubr.f32.vlgmr.msra.gmra.mrb[2].mxu0 %v1947_v10  ;;  %v2052_v46 = vand.u32 4294901760, %v6994_v13  ;;  %v8349_v8 = vand.u32 4294901760, %v6895_v31  ;;  %v8350_v54 = vand.u32 4294901760, %v6886_v53  ;;  %v7033_v23 = vpack.c.bf16 %v2040_v19, %v2028_v11 }
 0x459   :  { %v7013_v40 = vpack.c.bf16 %v8348_v30, %v8347_v4  ;;  %5335 = vmatpush1.bf16.msra.mxu0 %v5334_v22  ;;  %v1988_v30 = vand.u32 4294901760, %v1987_v35  ;;  %2118 = vmatprep.mubr.f32.mxu0 %v8285_v6  ;;  %v7035_v5 = vpack.c.bf16 %v2046_v21, %v2034_v49  ;;  %v2006_v10 = vand.u32 4294901760, %v2005_v52 }
 0x45a   :  { %v7023_v55 = vpack.c.bf16 %v2016_v36, %v8349_v8  ;;  %v7027_v41 = vpack.c.bf16 %v2022_v50, %v8350_v54  ;;  %v8351_v29 = vmov %v8350_v54  ;;  %5337 = vmatprep.subr.bf16.mxu0 %v5336_v25  ;;  %v2029_v36 = vsub.f32 %v6974_v3, %v2028_v11 }
 0x45b   :  { %v2011_v34 = vsub.f32 %v6886_v53, %v8351_v29  ;;  %v2047_v12 = vsub.f32 %v6978_v58, %v2046_v21  ;;  %v2058_v50 = vand.u32 4294901760, %v7007_v44  ;;  %v5338_v14 = vpack.c.bf16 %v2000_v43, %v1988_v30 }
 0x45c   :  { %v2024_v35 = vand.u32 4294901760, %v2023_v15  ;;  %v5340_v24 = vpack.c.bf16 %v2018_v59, %v2006_v10  ;;  %v2042_v22 = vand.u32 4294901760, %v2041_v48  ;;  %v2053_v4 = vsub.f32 %v6994_v13, %v2052_v46 }
 0x45d   :  { %v2035_v19 = vsub.f32 %v6976_v16, %v2034_v49  ;;  %5339 = vmatpush1.bf16.msra.mxu0 %v5338_v14  ;;  %v2012_v8 = vand.u32 4294901760, %v2011_v34  ;;  %v2030_v52 = vand.u32 4294901760, %v2029_v36  ;;  %v2059_v21 = vsub.f32 %v7007_v44, %v2058_v50 }
 0x45e   :  { %5341 = vmatprep.subr.bf16.mxu0 %v5340_v24  ;;  %v2048_v11 = vand.u32 4294901760, %v2047_v12  ;;  %v2054_v15 = vand.u32 4294901760, %v2053_v4  ;;  %v5352_v29 = vpack.c.bf16 %v6845_v47, %v6841_v18  ;;  %v5354_v34 = vpack.c.bf16 %v6889_v7, %v6868_v26 }
 0x45f   :  { %v5342_v25 = vpack.c.bf16 %v2024_v35, %v2012_v8  ;;  %v5344_v43 = vpack.c.bf16 %v2042_v22, %v2030_v52  ;;  %v2036_v59 = vand.u32 4294901760, %v2035_v19  ;;  %v2060_v54 = vand.u32 4294901760, %v2059_v21 }
 0x460   :  { %v5348_v30 = vpack.c.bf16 %v6363_v63, %v2054_v15  ;;  %v5356_v10 = vpack.c.bf16 %v6902_v42, %v6927_v28  ;;  %v5358_v36 = vpack.c.bf16 %v6919_v20, %v6944_v61  ;;  %v5360_v18 = vpack.c.bf16 %v6946_v45, %v6895_v31  ;;  %v8356_v28 = vld [vmem:[#allocation23_spill] sm:$0xff]  ;;  %v8358_v61 = vld [vmem:[#allocation10_spill] sm:$0xff] }
 0x461   :  { %5343 = vmatpush1.bf16.msra.mxu0 %v5342_v25  ;;  %v5346_v48 = vpack.c.bf16 %v2048_v11, %v2036_v59  ;;  %v5350_v49 = vpack.c.bf16 %v6363_v63, %v2060_v54  ;;  %v5362_v47 = vpack.c.bf16 %v6957_v0, %v6886_v53  ;;  %v5364_v26 = vpack.c.bf16 %v6969_v32, %v6974_v3  ;;  %v8353_v53 = vld [vmem:[#allocation28_spill] sm:$0xff]  ;;  %v8354_v3 = vld [vmem:[#allocation26_spill] sm:$0xff]  ;;  %v8362_v15 = vld [vmem:[#allocation11_spill] sm:$0xff] }
 0x462   :  { %5345 = vmatprep.subr.bf16.mxu0 %v5344_v43  ;;  %v5366_v7 = vpack.c.bf16 %v6978_v58, %v6976_v16  ;;  %v5368_v42 = vpack.c.bf16 %v6033_v17, %v6994_v13  ;;  %v5370_v31 = vpack.c.bf16 %v6033_v17, %v7007_v44  ;;  %v8352_v58 = vld [vmem:[#allocation27_spill] sm:$0xff]  ;;  %v8355_v20 = vand.u32 4294901760, %v6872_v33  ;;  %v5017_v44 = vld [vmem:[%s8154_s3 + $0x18] sm:$0xff] }
 0x463   :  { %v5410_v16 = vpack.c.bf16 %v8356_v28, %v2052_v46  ;;  %v2664_v22 = vsel %vm226_vm5, %v5017_v44, 0 }
 0x464   :  { %v7186_v43 = vand.u32 4294901760, %v2664_v22 }
 0x465   :  { %5347 = vmatpush1.bf16.msra.mxu0 %v5346_v48 }
 0x466   :  { %5349 = vmatprep.subr.bf16.mxu0 %v5348_v30  ;;  %v8363_v30 = vld [vmem:[#allocation12_spill] sm:$0xff] }
 0x469   :  { %5351 = vmatpush1.bf16.msra.mxu0 %v5350_v49 }
 0x46a   :  { %5353 = vmatprep.subr.bf16.mxu0 %v5352_v29 }
 0x46c   :  { %2120 = vmatmul.mubr.f32.vlgmr.msra.gmra.mrb[2].mxu0 %v6851_v39 }
 0x46d   :  { %5355 = vmatpush1.bf16.msra.mxu0 %v5354_v34  ;;  %2230 = vmatprep.mubr.f32.mxu0 %v8285_v6 }
 0x46e   :  { %5357 = vmatprep.subr.bf16.mxu0 %v5356_v10  ;;  %v8364_v10 = vld [vmem:[#allocation13_spill] sm:$0xff] }
 0x471   :  { %5359 = vmatpush1.bf16.msra.mxu0 %v5358_v36 }
 0x472   :  { %5361 = vmatprep.subr.bf16.mxu0 %v5360_v18  ;;  %v8365_v18 = vld [vmem:[#allocation14_spill] sm:$0xff] }
 0x475   :  { %5363 = vmatpush1.bf16.msra.mxu0 %v5362_v47 }
 0x476   :  { %5365 = vmatprep.subr.bf16.mxu0 %v5364_v26 }
 0x479   :  { %5367 = vmatpush1.bf16.msra.mxu0 %v5366_v7 }
 0x47a   :  { %5369 = vmatprep.subr.bf16.mxu0 %v5368_v42 }
 0x47d   :  { %5371 = vmatpush1.bf16.msra.mxu0 %v5370_v31 }
 0x47e   :  { %5373 = vmatprep.subr.bf16.mxu0 %v6849_v27 }
 0x480   :  { %2233 = vmatmul.mubr.f32.vlgmr.msra.gmra.mrb[2].mxu0 %v6872_v33  ;;  %v5412_v33 = vpack.c.bf16 %v8356_v28, %v2058_v50 }
 0x481   :  { %5375 = vmatpush1.bf16.msra.mxu0 %v6843_v56  ;;  %2323 = vmatprep.mubr.f32.mxu0 %v8285_v6 }
 0x482   :  { %5377 = vmatprep.subr.bf16.mxu0 %v6892_v1 }
 0x485   :  { %5379 = vmatpush1.bf16.msra.mxu0 %v6883_v62 }
 0x486   :  { %5381 = vmatprep.subr.bf16.mxu0 %v6910_v51 }
 0x489   :  { %5383 = vmatpush1.bf16.msra.mxu0 %v6904_v37 }
 0x48a   :  { %5385 = vmatprep.subr.bf16.mxu0 %v6964_v60 }
 0x48d   :  { %5387 = vmatpush1.bf16.msra.mxu0 %v6959_v57 }
 0x48e   :  { %5390 = vmatprep.subr.msk.bf16.mxu0 %vm6272_vm11, %v8352_v58 }
 0x491   :  { %5393 = vmatpush1.bf16.msk.msra.mxu0 %vm6272_vm11, %v8353_v53 }
 0x492   :  { %5395 = vmatprep.subr.bf16.mxu0 %v8354_v3 }
 0x494   :  { %2327 = vmatmul.mubr.f32.vlgmr.msra.gmra.mrb[2].mxu0 %v8355_v20 }
 0x495   :  { %5397 = vmatpush1.bf16.msra.mxu0 %v7013_v40  ;;  %2457 = vmatprep.mubr.f32.mxu0 %v8285_v6 }
 0x496   :  { %5399 = vmatprep.subr.bf16.mxu0 %v7015_v9 }
 0x499   :  { %5401 = vmatpush1.bf16.msra.mxu0 %v7017_v2 }
 0x49a   :  { %5403 = vmatprep.subr.bf16.mxu0 %v7023_v55  ;;  %v8360_v55 = vld [vmem:[#allocation7_spill] sm:$0xff] }
 0x49d   :  { %5405 = vmatpush1.bf16.msra.mxu0 %v7027_v41 }
 0x49e   :  { %5407 = vmatprep.subr.bf16.mxu0 %v7033_v23  ;;  %v8361_v23 = vld [vmem:[#allocation8_spill] sm:$0xff] }
 0x4a1   :  { %5409 = vmatpush1.bf16.msra.mxu0 %v7035_v5 }
 0x4a2   :  { %5411 = vmatprep.subr.bf16.mxu0 %v5410_v16 }
 0x4a5   :  { %5413 = vmatpush1.bf16.msra.mxu0 %v5412_v33 }
 0x4a6   :  { %5415 = vmatprep.subr.bf16.mxu0 %v6849_v27 }
 0x4a8   :  { %2459 = vmatmul.mubr.f32.vlgmr.msra.gmra.mrb[2].mxu0 %v6851_v39 }
 0x4a9   :  { %5417 = vmatpush1.bf16.msra.mxu0 %v6843_v56  ;;  %2549 = vmatprep.mubr.f32.mxu0 %v8285_v6 }
 0x4aa   :  { %5419 = vmatprep.subr.bf16.mxu0 %v6892_v1 }
 0x4ad   :  { %5421 = vmatpush1.bf16.msra.mxu0 %v6883_v62 }
 0x4ae   :  { %5423 = vmatprep.subr.bf16.mxu0 %v6910_v51 }
 0x4b1   :  { %5425 = vmatpush1.bf16.msra.mxu0 %v6904_v37 }
 0x4b2   :  { %5427 = vmatprep.subr.bf16.mxu0 %v6964_v60 }
 0x4b5   :  { %5429 = vmatpush1.bf16.msra.mxu0 %v6959_v57  ;;  %v8359_v57 = vld [vmem:[#allocation9_spill] sm:$0xff] }
 0x4b6   :  { %5432 = vmatprep.subr.msk.bf16.mxu0 %vm6272_vm11, %v8352_v58 }
 0x4b9   :  { %5435 = vmatpush1.bf16.msk.msra.mxu0 %vm6272_vm11, %v8353_v53  ;;  %v7207_v53 = vsub.f32 %v2664_v22, %v7186_v43 }
 0x4bc   :  { %2551 = vmatmul.mubr.f32.vlgmr.msra.gmra.mrb[2].mxu0 %v6851_v39 }
 0x4bd   :  { %3570 = vmatprep.mubr.f32.mxu0 %v8285_v6 }
 0x58f   :  { %v2552_v56 = vpop.f32.mrb[2].mxu0 }
 0x590   :  { %v7122_v27 = vmax.f32 %v2552_v56, 0.0  ;;  %v2554_v40 = vpop.f32.mrb[3].mxu0 }
 0x591   :  { %v7124_v62 = vmax.f32 %v2554_v40, 0.0 }
 0x592   :  { %2561 = vrot.lane.b32.xlu0 %v7122_v27, %s5908_s0  ;;  %v2684_v26 = vand.u32 4294901760, %v7122_v27 }
 0x593   :  { %2563 = vrot.lane.b32.xlu1 %v7124_v62, %s5908_s0  ;;  %v2682_v58 = vand.u32 4294901760, %v7124_v62 }
 0x596   :  { %2571 = vrot.lane.b32.xlu0 %v7122_v27, %s5907_s25 }
 0x597   :  { %2573 = vrot.lane.b32.xlu1 %v7124_v62, %s5907_s25 }
 0x59a   :  { %2581 = vrot.lane.b32.xlu0 %v7122_v27, %s5910_s28 }
 0x59b   :  { %2583 = vrot.lane.b32.xlu1 %v7124_v62, %s5910_s28 }
 0x59e   :  { %2591 = vrot.lane.b32.xlu0 %v7122_v27, %s5911_s29 }
 0x59f   :  { %2593 = vrot.lane.b32.xlu1 %v7124_v62, %s5911_s29 }
 0x5a2   :  { %2603 = vrot.lane.b32.xlu0 %v7122_v27, %s5912_s30 }
 0x5a3   :  { %2605 = vrot.lane.b32.xlu1 %v7124_v62, %s5912_s30 }
 0x5a6   :  { %2613 = vrot.lane.b32.xlu0 %v7122_v27, %s5913_s6 }
 0x5a7   :  { %2615 = vrot.lane.b32.xlu1 %v7124_v62, %s5913_s6 }
 0x5aa   :  { %2623 = vrot.lane.b32.xlu0 %v7122_v27, %s5914_s7 }
 0x5ab   :  { %2625 = vrot.lane.b32.xlu1 %v7124_v62, %s5914_s7 }
 0x5ae   :  { %2633 = vrot.lane.b32.xlu0 %v7122_v27, %s5915_s8 }
 0x5af   :  { %2635 = vrot.lane.b32.xlu1 %v7124_v62, %s5915_s8 }
 0x604   :  { %v2562_v39 = vpop.permute.xlu0 %2561 }
 0x605   :  { %v2564_v60 = vpop.permute.xlu1 %2563 }
 0x606   :  { %v2565_v37 = vsel %vm56_vm2, %v2562_v39, %v2564_v60  ;;  %v2566_v51 = vsel %vm56_vm2, %v2564_v60, %v2562_v39 }
 0x607   :  { %v2568_v45 = vmul.f32 %v2565_v37, %v8358_v61  ;;  %v2567_v32 = vmul.f32 %v2566_v51, %v8359_v57  ;;  %v7221_v51 = vsub.f32 %v7122_v27, %v2684_v26 }
 0x608   :  { %v2572_v0 = vpop.permute.xlu0 %2571 }
 0x609   :  { %v2574_v9 = vpop.permute.xlu1 %2573  ;;  %v2666_v46 = vand.u32 4294901760, %v2568_v45  ;;  %v2668_v50 = vand.u32 4294901760, %v2567_v32 }
 0x60a   :  { %v2575_v2 = vsel %vm75_vm1, %v2572_v0, %v2574_v9  ;;  %v2576_v13 = vsel %vm75_vm1, %v2574_v9, %v2572_v0  ;;  %v8368_v9 = vld [vmem:[#allocation16_spill] sm:$0xff] }
 0x60b   :  { %v2577_v41 = vmul.f32 %v2576_v13, %v8360_v55  ;;  %v2578_v5 = vmul.f32 %v2575_v2, %v8361_v23  ;;  %v7176_v19 = vsub.f32 %v2568_v45, %v2666_v46  ;;  %v7203_v42 = vsub.f32 %v2567_v32, %v2668_v50  ;;  %v8367_v45 = vld [vmem:[#allocation15_spill] sm:$0xff] }
 0x60c   :  { %v2582_v12 = vpop.permute.xlu0 %2581 }
 0x60d   :  { %v2670_v14 = vand.u32 4294901760, %v2578_v5  ;;  %v2672_v35 = vand.u32 4294901760, %v2577_v41  ;;  %v2584_v24 = vpop.permute.xlu1 %2583  ;;  %v2764_v7 = vand.u32 4294901760, %v7176_v19 }
 0x60e   :  { %v2586_v4 = vsel %vm94_vm3, %v2584_v24, %v2582_v12  ;;  %v2585_v21 = vsel %vm94_vm3, %v2582_v12, %v2584_v24 }
 0x60f   :  { %v7178_v8 = vpack.c.bf16 %v2672_v35, %v2668_v50  ;;  %v7180_v52 = vsub.f32 %v2578_v5, %v2670_v14  ;;  %v7184_v11 = vpack.c.bf16 %v2670_v14, %v2666_v46  ;;  %v7189_v59 = vmul.f32 %v2586_v4, %v8362_v15 }
 0x610   :  { %v2592_v25 = vpop.permute.xlu0 %2591  ;;  %v2588_v49 = vmul.f32 %v2585_v21, %v8363_v30  ;;  %v7224_v32 = vsub.f32 %v2577_v41, %v2672_v35  ;;  %v7230_v46 = vsub.f32 %v7124_v62, %v2682_v58  ;;  %v8228_v5 = vand.u32 4294901760, %v7203_v42 }
 0x611   :  { %v2594_v48 = vpop.permute.xlu1 %2593  ;;  %v2776_v54 = vand.u32 4294901760, %v7180_v52  ;;  %5437 = vmatprep.subr.bf16.mxu1 %v7184_v11  ;;  %v2676_v3 = vand.u32 4294901760, %v7189_v59  ;;  %v8227_v14 = vand.u32 4294901760, %v7207_v53 }
 0x612   :  { %v2595_v29 = vsel %vm113_vm4, %v2592_v25, %v2594_v48  ;;  %v2596_v34 = vsel %vm113_vm4, %v2594_v48, %v2592_v25  ;;  %5439 = vmatpush1.bf16.msra.mxu1 %v7178_v8  ;;  %v2674_v40 = vand.u32 4294901760, %v2588_v49  ;;  %v8229_v22 = vand.u32 4294901760, %v7224_v32 }
 0x613   :  { %v2597_v36 = vmul.f32 %v2596_v34, %v8364_v10  ;;  %v2598_v47 = vmul.f32 %v2595_v29, %v8365_v18  ;;  %v7212_v56 = vpack.c.bf16 %v2776_v54, %v2764_v7  ;;  %v7252_v29 = vsub.f32 %v7203_v42, %v8228_v5 }
 0x614   :  { %v2604_v31 = vpop.permute.xlu0 %2603  ;;  %v8380_v28 = vand.u32 4294901760, %v7224_v32 }
 0x615   :  { %v2678_v20 = vand.u32 4294901760, %v2598_v47  ;;  %v2680_v16 = vand.u32 4294901760, %v2597_v36  ;;  %v2606_v33 = vpop.permute.xlu1 %2605  ;;  %8366 = vst [vmem:[#allocation27_spill] sm:$0xff] %v7212_v56 }
 0x616   :  { %v2607_v39 = vsel %vm134_vm6, %v2604_v31, %v2606_v33  ;;  %v2608_v60 = vsel %vm134_vm6, %v2606_v33, %v2604_v31  ;;  %v8370_v33 = vld [vmem:[#allocation18_spill] sm:$0xff] }
 0x617   :  { %v7218_v37 = vpack.c.bf16 %v2680_v16, %v2676_v3  ;;  %v2609_v0 = vmul.f32 %v2607_v39, %v8367_v45  ;;  %v2610_v2 = vmul.f32 %v2608_v60, %v8368_v9  ;;  %v7227_v44 = vpack.c.bf16 %v2678_v20, %v2674_v40  ;;  %v8374_v9 = vld [vmem:[#allocation22_spill] sm:$0xff] }
 0x618   :  { %v2614_v13 = vpop.permute.xlu0 %2613  ;;  %v7237_v35 = vsub.f32 %v2598_v47, %v2678_v20  ;;  %v7254_v34 = vsub.f32 %v2597_v36, %v2680_v16  ;;  %v8369_v47 = vld [vmem:[#allocation17_spill] sm:$0xff]  ;;  %v7260_v20 = vsub.f32 %v7207_v53, %v8227_v14  ;;  %v8371_v36 = vld [vmem:[#allocation19_spill] sm:$0xff]  ;;  %v2765_v14 = vsub.f32 %v7176_v19, %v2764_v7 }
 0x619   :  { %v2688_v12 = vand.u32 4294901760, %v2609_v0  ;;  %v2616_v50 = vpop.permute.xlu1 %2615  ;;  %v2686_v27 = vand.u32 4294901760, %v2610_v2  ;;  %5441 = vmatprep.subr.bf16.mxu1 %v7227_v44 }
 0x61a   :  { %v2617_v41 = vsel %vm153_vm7, %v2614_v13, %v2616_v50  ;;  %v2618_v62 = vsel %vm153_vm7, %v2616_v50, %v2614_v13  ;;  %5443 = vmatpush1.bf16.msra.mxu1 %v7218_v37  ;;  %v8372_v50 = vld [vmem:[#allocation20_spill] sm:$0xff] }
 0x61b   :  { %v7239_v24 = vpack.c.bf16 %v2688_v12, %v2684_v26  ;;  %v7245_v21 = vpack.c.bf16 %v2686_v27, %v2682_v58  ;;  %v2619_v26 = vmul.f32 %v2617_v41, %v8369_v47  ;;  %v7262_v58 = vsub.f32 %v2588_v49, %v2674_v40 }
 0x61c   :  { %v2624_v4 = vpop.permute.xlu0 %2623  ;;  %v2620_v39 = vmul.f32 %v2618_v62, %v8370_v33  ;;  %v2800_v49 = vand.u32 4294901760, %v7237_v35  ;;  %v2783_v40 = vsub.f32 %v7224_v32, %v8229_v22  ;;  %v7279_v62 = vsub.f32 %v7189_v59, %v2676_v3  ;;  %v8373_v33 = vld [vmem:[#allocation21_spill] sm:$0xff] }
 0x61d   :  { %v2626_v31 = vpop.permute.xlu1 %2625  ;;  %5445 = vmatprep.subr.bf16.mxu1 %v7245_v21  ;;  %v2692_v48 = vand.u32 4294901760, %v2619_v26  ;;  %v2788_v3 = vand.u32 4294901760, %v7262_v58 }
 0x61e   :  { %v2627_v60 = vsel %vm172_vm8, %v2624_v4, %v2626_v31  ;;  %v2628_v13 = vsel %vm172_vm8, %v2626_v31, %v2624_v4  ;;  %5447 = vmatpush1.bf16.msra.mxu1 %v7239_v24  ;;  %v7281_v4 = vsub.f32 %v2610_v2, %v2686_v27  ;;  %v7292_v2 = vsub.f32 %v2609_v0, %v2688_v12 }
 0x61f   :  { %v2629_v16 = vmul.f32 %v2627_v60, %v8371_v36  ;;  %v2630_v41 = vmul.f32 %v2628_v13, %v8372_v50  ;;  %v2777_v60 = vsub.f32 %v7180_v52, %v2776_v54  ;;  %v2806_v13 = vand.u32 4294901760, %v7254_v34 }
 0x620   :  { %v2634_v31 = vpop.permute.xlu0 %2633  ;;  %v2690_v50 = vand.u32 4294901760, %v2620_v39  ;;  %v2766_v54 = vand.u32 4294901760, %v2765_v14  ;;  %v2801_v36 = vsub.f32 %v7237_v35, %v2800_v49  ;;  %v2824_v10 = vand.u32 4294901760, %v7281_v4 }
 0x621   :  { %v2694_v7 = vand.u32 4294901760, %v2630_v41  ;;  %v2696_v5 = vand.u32 4294901760, %v2629_v16  ;;  %v2636_v25 = vpop.permute.xlu1 %2635  ;;  %v2794_v30 = vand.u32 4294901760, %v7279_v62  ;;  %v2784_v0 = vand.u32 4294901760, %v2783_v40 }
 0x622   :  { %v2637_v22 = vsel %vm191_vm9, %v2634_v31, %v2636_v25  ;;  %v2638_v59 = vsel %vm191_vm9, %v2636_v25, %v2634_v31  ;;  %v2807_v25 = vsub.f32 %v7254_v34, %v2806_v13  ;;  %v2778_v31 = vand.u32 4294901760, %v2777_v60 }
 0x623   :  { %v7294_v27 = vpack.c.bf16 %v2696_v5, %v2692_v48  ;;  %v2639_v47 = vmul.f32 %v2637_v22, %v8373_v33  ;;  %v2640_v45 = vmul.f32 %v2638_v59, %v8374_v9  ;;  %v7299_v18 = vpack.c.bf16 %v2694_v7, %v2690_v50 }
 0x624   :  { %v7304_v12 = vsub.f32 %v2630_v41, %v2694_v7  ;;  %v2789_v22 = vsub.f32 %v7262_v58, %v2788_v3  ;;  %v2830_v59 = vand.u32 4294901760, %v7292_v2  ;;  %v7309_v9 = vsub.f32 %v2620_v39, %v2690_v50 }
 0x625   :  { %v2698_v15 = vand.u32 4294901760, %v2640_v45  ;;  %v2700_v14 = vand.u32 4294901760, %v2639_v47  ;;  %5449 = vmatprep.subr.bf16.mxu1 %v7299_v18  ;;  %v7311_v33 = vsub.f32 %v2619_v26, %v2692_v48  ;;  %v7313_v23 = vsub.f32 %v2629_v16, %v2696_v5 }
 0x626   :  { %5451 = vmatpush1.bf16.msra.mxu1 %v7294_v27  ;;  %v8375_v60 = vmov 1.0   ;;  %v2802_v7 = vand.u32 4294901760, %v2801_v36  ;;  %v2825_v55 = vsub.f32 %v7281_v4, %v2824_v10  ;;  %v2795_v57 = vsub.f32 %v7279_v62, %v2794_v30 }
 0x627   :  { %v7317_v40 = vpack.c.bf16 %v8375_v60, %v2698_v15  ;;  %v7320_v41 = vpack.c.bf16 %v8375_v60, %v2700_v14  ;;  %v2755_v39 = vand.u32 4294901760, %v7260_v20  ;;  %v2772_v48 = vand.u32 4294901760, %v7252_v29 }
 0x628   :  { %v8378_v5 = vand.u32 4294901760, %v7230_v46  ;;  %v7329_v16 = vsub.f32 %v2640_v45, %v2698_v15  ;;  %v5458_v50 = vpack.c.bf16 %v2778_v31, %v2766_v54  ;;  %v2790_v36 = vand.u32 4294901760, %v2789_v22 }
 0x629   :  { %8376 = vst [vmem:[#allocation28_spill] sm:$0xff] %v7317_v40  ;;  %8377 = vst [vmem:[#allocation26_spill] sm:$0xff] %v7320_v41  ;;  %5454 = vmatprep.subr.msk.bf16.mxu1 %vm6272_vm11, %v7317_v40  ;;  %v2848_v60 = vand.u32 4294901760, %v7304_v12  ;;  %v2831_v61 = vsub.f32 %v7292_v2, %v2830_v59  ;;  %v2854_v20 = vand.u32 4294901760, %v7313_v23  ;;  %v5460_v29 = vpack.c.bf16 %v2784_v0, %v2772_v48 }
 0x62a   :  { %v2813_v26 = vsub.f32 %v7230_v46, %v8378_v5  ;;  %5457 = vmatpush1.bf16.msk.msra.mxu1 %vm6272_vm11, %v7320_v41  ;;  %v2808_v5 = vand.u32 4294901760, %v2807_v25  ;;  %v2842_v15 = vand.u32 4294901760, %v7311_v33  ;;  %v5462_v45 = vpack.c.bf16 %v2802_v7, %v2790_v36 }
 0x62b   :  { %5459 = vmatprep.subr.bf16.mxu1 %v5458_v50  ;;  %v2826_v1 = vand.u32 4294901760, %v2825_v55  ;;  %v2836_v54 = vand.u32 4294901760, %v7309_v9  ;;  %v7342_v31 = vsub.f32 %v2639_v47, %v2700_v14  ;;  %v8379_v22 = vand.u32 4294901760, %v7203_v42 }
 0x62c   :  { %v7350_v40 = vpack.c.bf16 %v2800_v49, %v2788_v3  ;;  %v7352_v41 = vpack.c.bf16 %v2806_v13, %v2794_v30  ;;  %v2849_v25 = vsub.f32 %v7304_v12, %v2848_v60  ;;  %v2860_v0 = vand.u32 4294901760, %v7329_v16 }
 0x62d   :  { %v7348_v56 = vpack.c.bf16 %v8380_v28, %v8379_v22  ;;  %2756 = vmatmul.mubr.f32.vlgmr.msra.gmra.mrb[2].mxu1 %v2755_v39  ;;  %v8381_v55 = vand.u32 4294901760, %v7230_v46  ;;  %v8382_v47 = vand.u32 4294901760, %v7221_v51  ;;  %v2796_v28 = vand.u32 4294901760, %v2795_v57 }
 0x62e   :  { %5461 = vmatpush1.bf16.msra.mxu1 %v5460_v29  ;;  %2926 = vmatprep.mubr.f32.mxu1 %v8285_v6  ;;  %v7368_v13 = vpack.c.bf16 %v2848_v60, %v2836_v54  ;;  %v7370_v3 = vpack.c.bf16 %v2854_v20, %v2842_v15  ;;  %v2814_v39 = vand.u32 4294901760, %v2813_v26  ;;  %v2855_v48 = vsub.f32 %v7313_v23, %v2854_v20 }
 0x62f   :  { %v7358_v7 = vpack.c.bf16 %v2824_v10, %v8381_v55  ;;  %v7362_v14 = vpack.c.bf16 %v2830_v59, %v8382_v47  ;;  %v8383_v49 = vmov %v8382_v47  ;;  %5463 = vmatprep.subr.bf16.mxu1 %v5462_v45  ;;  %v2837_v10 = vsub.f32 %v7309_v9, %v2836_v54 }
 0x630   :  { %v2819_v30 = vsub.f32 %v7221_v51, %v8383_v49  ;;  %v2866_v59 = vand.u32 4294901760, %v7342_v31  ;;  %v5464_v50 = vpack.c.bf16 %v2808_v5, %v2796_v28  ;;  %v2832_v57 = vand.u32 4294901760, %v2831_v61 }
 0x631   :  { %v5466_v36 = vpack.c.bf16 %v2826_v1, %v2814_v39  ;;  %v2850_v29 = vand.u32 4294901760, %v2849_v25  ;;  %v2861_v22 = vsub.f32 %v7329_v16, %v2860_v0  ;;  %v2843_v60 = vsub.f32 %v7311_v33, %v2842_v15 }
 0x632   :  { %5465 = vmatpush1.bf16.msra.mxu1 %v5464_v50  ;;  %v2820_v55 = vand.u32 4294901760, %v2819_v30  ;;  %v2838_v26 = vand.u32 4294901760, %v2837_v10  ;;  %v2867_v20 = vsub.f32 %v7342_v31, %v2866_v59  ;;  %v2856_v54 = vand.u32 4294901760, %v2855_v48  ;;  %v8394_v48 = vld [vmem:[#allocation10_spill] sm:$0xff] }
 0x633   :  { %5467 = vmatprep.subr.bf16.mxu1 %v5466_v36  ;;  %v2862_v61 = vand.u32 4294901760, %v2861_v22  ;;  %v2844_v1 = vand.u32 4294901760, %v2843_v60  ;;  %v5478_v49 = vpack.c.bf16 %v7180_v52, %v7176_v19  ;;  %v5480_v30 = vpack.c.bf16 %v7224_v32, %v7203_v42 }
 0x634   :  { %v5468_v45 = vpack.c.bf16 %v2832_v57, %v2820_v55  ;;  %v5470_v5 = vpack.c.bf16 %v2850_v29, %v2838_v26  ;;  %v2868_v47 = vand.u32 4294901760, %v2867_v20  ;;  %v5482_v39 = vpack.c.bf16 %v7237_v35, %v7262_v58  ;;  %v8388_v58 = vld [vmem:[#allocation23_spill] sm:$0xff]  ;;  %v8395_v57 = vld [vmem:[#allocation9_spill] sm:$0xff]  ;;  %v5020_v55 = vld [vmem:[%s8154_s3 + $0x20] sm:$0xff] }
 0x635   :  { %v5472_v25 = vpack.c.bf16 %v2856_v54, %v2844_v1  ;;  %v5474_v28 = vpack.c.bf16 %v6363_v63, %v2862_v61  ;;  %v5484_v10 = vpack.c.bf16 %v7254_v34, %v7279_v62  ;;  %v5486_v19 = vpack.c.bf16 %v7281_v4, %v7230_v46  ;;  %v8396_v20 = vld [vmem:[#allocation7_spill] sm:$0xff]  ;;  %v8397_v54 = vld [vmem:[#allocation8_spill] sm:$0xff] }
 0x636   :  { %5469 = vmatpush1.bf16.msra.mxu1 %v5468_v45  ;;  %v5476_v15 = vpack.c.bf16 %v6363_v63, %v2868_v47  ;;  %v5488_v52 = vpack.c.bf16 %v7292_v2, %v7221_v51  ;;  %v5490_v42 = vpack.c.bf16 %v7304_v12, %v7309_v9  ;;  %v5492_v32 = vpack.c.bf16 %v7313_v23, %v7311_v33  ;;  %v8384_v23 = vld [vmem:[#allocation28_spill] sm:$0xff]  ;;  %v8385_v51 = vld [vmem:[#allocation26_spill] sm:$0xff]  ;;  %v8386_v9 = vld [vmem:[#allocation27_spill] sm:$0xff] }
 0x637   :  { %5471 = vmatprep.subr.bf16.mxu1 %v5470_v5  ;;  %v5494_v35 = vpack.c.bf16 %v6033_v17, %v7329_v16  ;;  %v5496_v46 = vpack.c.bf16 %v6033_v17, %v7342_v31  ;;  %v8387_v34 = vand.u32 4294901760, %v7207_v53  ;;  %v5536_v33 = vpack.c.bf16 %v8388_v58, %v2860_v0 }
 0x63a   :  { %5473 = vmatpush1.bf16.msra.mxu1 %v5472_v25 }
 0x63b   :  { %5475 = vmatprep.subr.bf16.mxu1 %v5474_v28 }
 0x63e   :  { %5477 = vmatpush1.bf16.msra.mxu1 %v5476_v15  ;;  %v3484_v15 = vsel %vm226_vm5, %v5020_v55, 0 }
 0x63f   :  { %5479 = vmatprep.subr.bf16.mxu1 %v5478_v49 }
 0x641   :  { %2928 = vmatmul.mubr.f32.vlgmr.msra.gmra.mrb[2].mxu1 %v7186_v43 }
 0x642   :  { %5481 = vmatpush1.bf16.msra.mxu1 %v5480_v30  ;;  %3038 = vmatprep.mubr.f32.mxu1 %v8285_v6 }
 0x643   :  { %5483 = vmatprep.subr.bf16.mxu1 %v5482_v39 }
 0x646   :  { %5485 = vmatpush1.bf16.msra.mxu1 %v5484_v10 }
 0x647   :  { %5487 = vmatprep.subr.bf16.mxu1 %v5486_v19 }
 0x64a   :  { %5489 = vmatpush1.bf16.msra.mxu1 %v5488_v52 }
 0x64b   :  { %5491 = vmatprep.subr.bf16.mxu1 %v5490_v42 }
 0x64e   :  { %5493 = vmatpush1.bf16.msra.mxu1 %v5492_v32  ;;  %v7531_v32 = vand.u32 4294901760, %v3484_v15 }
 0x64f   :  { %5495 = vmatprep.subr.bf16.mxu1 %v5494_v35  ;;  %v8398_v35 = vld [vmem:[#allocation11_spill] sm:$0xff] }
 0x652   :  { %5497 = vmatpush1.bf16.msra.mxu1 %v5496_v46 }
 0x653   :  { %5499 = vmatprep.subr.bf16.mxu1 %v7184_v11 }
 0x655   :  { %3041 = vmatmul.mubr.f32.vlgmr.msra.gmra.mrb[2].mxu1 %v7207_v53  ;;  %v5538_v53 = vpack.c.bf16 %v8388_v58, %v2866_v59 }
 0x656   :  { %5501 = vmatpush1.bf16.msra.mxu1 %v7178_v8  ;;  %3131 = vmatprep.mubr.f32.mxu1 %v8285_v6 }
 0x657   :  { %5503 = vmatprep.subr.bf16.mxu1 %v7227_v44 }
 0x65a   :  { %5505 = vmatpush1.bf16.msra.mxu1 %v7218_v37 }
 0x65b   :  { %5507 = vmatprep.subr.bf16.mxu1 %v7245_v21 }
 0x65e   :  { %5509 = vmatpush1.bf16.msra.mxu1 %v7239_v24 }
 0x65f   :  { %5511 = vmatprep.subr.bf16.mxu1 %v7299_v18 }
 0x662   :  { %5513 = vmatpush1.bf16.msra.mxu1 %v7294_v27 }
 0x663   :  { %5516 = vmatprep.subr.msk.bf16.mxu1 %vm6272_vm11, %v8384_v23 }
 0x666   :  { %5519 = vmatpush1.bf16.msk.msra.mxu1 %vm6272_vm11, %v8385_v51 }
 0x667   :  { %5521 = vmatprep.subr.bf16.mxu1 %v8386_v9  ;;  %v8399_v9 = vld [vmem:[#allocation12_spill] sm:$0xff] }
 0x669   :  { %3135 = vmatmul.mubr.f32.vlgmr.msra.gmra.mrb[2].mxu1 %v8387_v34 }
 0x66a   :  { %5523 = vmatpush1.bf16.msra.mxu1 %v7348_v56  ;;  %3265 = vmatprep.mubr.f32.mxu1 %v8285_v6  ;;  %v3365_v56 = vstv %s5014_s15 }
 0x66b   :  { %5525 = vmatprep.subr.bf16.mxu1 %v7350_v40 }
 0x66e   :  { %5527 = vmatpush1.bf16.msra.mxu1 %v7352_v41 }
 0x66f   :  { %5529 = vmatprep.subr.bf16.mxu1 %v7358_v7 }
 0x672   :  { %5531 = vmatpush1.bf16.msra.mxu1 %v7362_v14 }
 0x673   :  { %5533 = vmatprep.subr.bf16.mxu1 %v7368_v13 }
 0x676   :  { %5535 = vmatpush1.bf16.msra.mxu1 %v7370_v3 }
 0x677   :  { %5537 = vmatprep.subr.bf16.mxu1 %v5536_v33 }
 0x67a   :  { %5539 = vmatpush1.bf16.msra.mxu1 %v5538_v53 }
 0x67b   :  { %5541 = vmatprep.subr.bf16.mxu1 %v7184_v11  ;;  %v8389_v11 = vld [vmem:[#allocation24_spill] sm:$0xff] }
 0x67d   :  { %3267 = vmatmul.mubr.f32.vlgmr.msra.gmra.mrb[2].mxu1 %v7186_v43 }
 0x67e   :  { %5543 = vmatpush1.bf16.msra.mxu1 %v7178_v8  ;;  %3357 = vmatprep.mubr.f32.mxu1 %v8285_v6  ;;  %v5888_v8 = vld [vmem:[%s8153_s2] sm:$0xff] }
 0x67f   :  { %5545 = vmatprep.subr.bf16.mxu1 %v7227_v44  ;;  %v5889_v44 = vld [vmem:[%s8153_s2 + $0x8] sm:$0xff] }
 0x682   :  { %5547 = vmatpush1.bf16.msra.mxu1 %v7218_v37  ;;  %v3370_v37 = vstv %s5015_s16 }
 0x683   :  { %5549 = vmatprep.subr.bf16.mxu1 %v7245_v21 }
 0x686   :  { %5551 = vmatpush1.bf16.msra.mxu1 %v7239_v24  ;;  %v8390_v24 = vld [vmem:[#allocation25_spill] sm:$0xff] }
 0x687   :  { %5553 = vmatprep.subr.bf16.mxu1 %v7299_v18  ;;  %v3368_v18 = vsub.f32 %v5888_v8, %v8389_v11  ;;  %v3369_v21 = vsub.f32 %v5889_v44, %v8390_v24  ;;  %v8400_v8 = vld [vmem:[#allocation13_spill] sm:$0xff] }
 0x689   :  { %v3371_v4 = vmul.f32 %v3370_v37, %v3368_v18  ;;  %v3372_v12 = vmul.f32 %v3370_v37, %v3369_v21  ;;  %v8401_v18 = vld [vmem:[#allocation14_spill] sm:$0xff] }
 0x68a   :  { %5555 = vmatpush1.bf16.msra.mxu1 %v7294_v27 }
 0x68b   :  { %5558 = vmatprep.subr.msk.bf16.mxu1 %vm6272_vm11, %v8384_v23 }
 0x68e   :  { %5561 = vmatpush1.bf16.msk.msra.mxu1 %vm6272_vm11, %v8385_v51 }
 0x691   :  { %3359 = vmatmul.mubr.f32.vlgmr.msra.gmra.mrb[2].mxu1 %v7186_v43 }
 0x692   :  { %4378 = vmatprep.mubr.f32.mxu1 %v8285_v6 }
 0x764   :  { %v3360_v62 = vpop.f32.mrb[2].mxu1 }
 0x765   :  { %v3366_v43 = vmul.f32 %v3365_v56, %v3360_v62  ;;  %v3362_v2 = vpop.f32.mrb[3].mxu1 }
 0x766   :  { %v3367_v27 = vmul.f32 %v3365_v56, %v3362_v2 }
 0x767   :  { %v3373_v40 = vadd.f32 %v3371_v4, %v3366_v43  ;;  %v7552_v43 = vsub.f32 %v3484_v15, %v7531_v32 }
 0x768   :  { %v3374_v41 = vadd.f32 %v3372_v12, %v3367_v27 }
 0x769   :  { %v7466_v16 = vadd.f32 %v3373_v40, %v8389_v11 }
 0x76a   :  { %v7469_v31 = vadd.f32 %v3374_v41, %v8390_v24 }
 0x76b   :  { %8391 = vst [vmem:[#allocation28_spill] sm:$0xff] %v7466_v16  ;;  %3381 = vrot.lane.b32.xlu0 %v7466_v16, %s5908_s0  ;;  %v3504_v37 = vand.u32 4294901760, %v7466_v16 }
 0x76c   :  { %8392 = vst [vmem:[#allocation26_spill] sm:$0xff] %v7469_v31  ;;  %3383 = vrot.lane.b32.xlu1 %v7469_v31, %s5908_s0  ;;  %v3502_v62 = vand.u32 4294901760, %v7469_v31 }
 0x76f   :  { %3391 = vrot.lane.b32.xlu0 %v7466_v16, %s5907_s25 }
 0x770   :  { %3393 = vrot.lane.b32.xlu1 %v7469_v31, %s5907_s25 }
 0x773   :  { %3401 = vrot.lane.b32.xlu0 %v7466_v16, %s5910_s28 }
 0x774   :  { %3403 = vrot.lane.b32.xlu1 %v7469_v31, %s5910_s28 }
 0x777   :  { %3411 = vrot.lane.b32.xlu0 %v7466_v16, %s5911_s29 }
 0x778   :  { %3413 = vrot.lane.b32.xlu1 %v7469_v31, %s5911_s29 }
 0x77b   :  { %3423 = vrot.lane.b32.xlu0 %v7466_v16, %s5912_s30 }
 0x77c   :  { %3425 = vrot.lane.b32.xlu1 %v7469_v31, %s5912_s30 }
 0x77f   :  { %3433 = vrot.lane.b32.xlu0 %v7466_v16, %s5913_s6 }
 0x780   :  { %3435 = vrot.lane.b32.xlu1 %v7469_v31, %s5913_s6 }
 0x783   :  { %3443 = vrot.lane.b32.xlu0 %v7466_v16, %s5914_s7 }
 0x784   :  { %3445 = vrot.lane.b32.xlu1 %v7469_v31, %s5914_s7 }
 0x787   :  { %3453 = vrot.lane.b32.xlu0 %v7466_v16, %s5915_s8 }
 0x788   :  { %3455 = vrot.lane.b32.xlu1 %v7469_v31, %s5915_s8 }
 0x7dd   :  { %v3382_v0 = vpop.permute.xlu0 %3381 }
 0x7de   :  { %v3384_v7 = vpop.permute.xlu1 %3383 }
 0x7df   :  { %v3385_v13 = vsel %vm56_vm2, %v3382_v0, %v3384_v7  ;;  %v3386_v3 = vsel %vm56_vm2, %v3384_v7, %v3382_v0 }
 0x7e0   :  { %v3388_v59 = vmul.f32 %v3385_v13, %v8394_v48  ;;  %v3387_v36 = vmul.f32 %v3386_v3, %v8395_v57  ;;  %v7566_v3 = vsub.f32 %v7466_v16, %v3504_v37 }
 0x7e1   :  { %v3392_v50 = vpop.permute.xlu0 %3391 }
 0x7e2   :  { %v3394_v29 = vpop.permute.xlu1 %3393  ;;  %v3486_v26 = vand.u32 4294901760, %v3388_v59  ;;  %v3488_v1 = vand.u32 4294901760, %v3387_v36 }
 0x7e3   :  { %v3395_v22 = vsel %vm75_vm1, %v3392_v50, %v3394_v29  ;;  %v3396_v60 = vsel %vm75_vm1, %v3394_v29, %v3392_v50  ;;  %v8404_v29 = vld [vmem:[#allocation16_spill] sm:$0xff] }
 0x7e4   :  { %v3397_v45 = vmul.f32 %v3396_v60, %v8396_v20  ;;  %v3398_v5 = vmul.f32 %v3395_v22, %v8397_v54  ;;  %v7521_v30 = vsub.f32 %v3388_v59, %v3486_v26  ;;  %v7548_v24 = vsub.f32 %v3387_v36, %v3488_v1  ;;  %v8403_v59 = vld [vmem:[#allocation15_spill] sm:$0xff] }
 0x7e5   :  { %v3402_v61 = vpop.permute.xlu0 %3401 }
 0x7e6   :  { %v3490_v25 = vand.u32 4294901760, %v3398_v5  ;;  %v3492_v47 = vand.u32 4294901760, %v3397_v45  ;;  %v3404_v28 = vpop.permute.xlu1 %3403  ;;  %v3584_v44 = vand.u32 4294901760, %v7521_v30 }
 0x7e7   :  { %v3406_v49 = vsel %vm94_vm3, %v3404_v28, %v3402_v61  ;;  %v3405_v19 = vsel %vm94_vm3, %v3402_v61, %v3404_v28 }
 0x7e8   :  { %v7523_v39 = vpack.c.bf16 %v3492_v47, %v3488_v1  ;;  %v7525_v10 = vsub.f32 %v3398_v5, %v3490_v25  ;;  %v7529_v42 = vpack.c.bf16 %v3490_v25, %v3486_v26  ;;  %v7534_v46 = vmul.f32 %v3406_v49, %v8398_v35 }
 0x7e9   :  { %v3412_v52 = vpop.permute.xlu0 %3411  ;;  %v3408_v34 = vmul.f32 %v3405_v19, %v8399_v9  ;;  %v7569_v36 = vsub.f32 %v3397_v45, %v3492_v47  ;;  %v7575_v26 = vsub.f32 %v7469_v31, %v3502_v62  ;;  %v8237_v5 = vand.u32 4294901760, %v7548_v24 }
 0x7ea   :  { %v3414_v23 = vpop.permute.xlu1 %3413  ;;  %v3596_v51 = vand.u32 4294901760, %v7525_v10  ;;  %5563 = vmatprep.subr.bf16.mxu0 %v7529_v42  ;;  %v3496_v4 = vand.u32 4294901760, %v7534_v46  ;;  %v8238_v25 = vand.u32 4294901760, %v7552_v43 }
 0x7eb   :  { %v3415_v33 = vsel %vm113_vm4, %v3412_v52, %v3414_v23  ;;  %v3416_v53 = vsel %vm113_vm4, %v3414_v23, %v3412_v52  ;;  %5565 = vmatpush1.bf16.msra.mxu0 %v7523_v39  ;;  %v3494_v41 = vand.u32 4294901760, %v3408_v34  ;;  %v8243_v19 = vand.u32 4294901760, %v7569_v36 }
 0x7ec   :  { %v3417_v11 = vmul.f32 %v3416_v53, %v8400_v8  ;;  %v3418_v56 = vmul.f32 %v3415_v33, %v8401_v18  ;;  %v7557_v40 = vpack.c.bf16 %v3596_v51, %v3584_v44  ;;  %v8416_v58 = vand.u32 4294901760, %v7569_v36 }
 0x7ed   :  { %v3424_v21 = vpop.permute.xlu0 %3423 }
 0x7ee   :  { %v3498_v2 = vand.u32 4294901760, %v3418_v56  ;;  %v3500_v27 = vand.u32 4294901760, %v3417_v11  ;;  %v3426_v12 = vpop.permute.xlu1 %3425  ;;  %8402 = vst [vmem:[#allocation27_spill] sm:$0xff] %v7557_v40 }
 0x7ef   :  { %v3427_v0 = vsel %vm134_vm6, %v3424_v21, %v3426_v12  ;;  %v3428_v7 = vsel %vm134_vm6, %v3426_v12, %v3424_v21  ;;  %v8405_v21 = vld [vmem:[#allocation17_spill] sm:$0xff] }
 0x7f0   :  { %v7563_v13 = vpack.c.bf16 %v3500_v27, %v3496_v4  ;;  %v3429_v50 = vmul.f32 %v3427_v0, %v8403_v59  ;;  %v3430_v22 = vmul.f32 %v3428_v7, %v8404_v29  ;;  %v7572_v55 = vpack.c.bf16 %v3498_v2, %v3494_v41  ;;  %v8406_v7 = vld [vmem:[#allocation18_spill] sm:$0xff] }
 0x7f1   :  { %v3434_v60 = vpop.permute.xlu0 %3433  ;;  %v7582_v47 = vsub.f32 %v3418_v56, %v3498_v2  ;;  %v7597_v56 = vsub.f32 %v7548_v24, %v8237_v5  ;;  %v7605_v0 = vsub.f32 %v7552_v43, %v8238_v25  ;;  %v3585_v25 = vsub.f32 %v7521_v30, %v3584_v44  ;;  %v8410_v29 = vld [vmem:[#allocation22_spill] sm:$0xff] }
 0x7f2   :  { %v3508_v61 = vand.u32 4294901760, %v3429_v50  ;;  %v3436_v1 = vpop.permute.xlu1 %3435  ;;  %v3506_v28 = vand.u32 4294901760, %v3430_v22  ;;  %5567 = vmatprep.subr.bf16.mxu0 %v7572_v55 }
 0x7f3   :  { %v3437_v45 = vsel %vm153_vm7, %v3434_v60, %v3436_v1  ;;  %v3438_v49 = vsel %vm153_vm7, %v3436_v1, %v3434_v60  ;;  %5569 = vmatpush1.bf16.msra.mxu0 %v7563_v13 }
 0x7f4   :  { %v7584_v15 = vpack.c.bf16 %v3508_v61, %v3504_v37  ;;  %v7590_v23 = vpack.c.bf16 %v3506_v28, %v3502_v62  ;;  %v7599_v37 = vsub.f32 %v3417_v11, %v3500_v27  ;;  %v3439_v2 = vmul.f32 %v3437_v45, %v8405_v21  ;;  %v8407_v11 = vld [vmem:[#allocation19_spill] sm:$0xff]  ;;  %v8408_v45 = vld [vmem:[#allocation20_spill] sm:$0xff] }
 0x7f5   :  { %v3444_v52 = vpop.permute.xlu0 %3443  ;;  %v7607_v62 = vsub.f32 %v3408_v34, %v3494_v41  ;;  %v3440_v60 = vmul.f32 %v3438_v49, %v8406_v7  ;;  %v3620_v34 = vand.u32 4294901760, %v7582_v47  ;;  %v3603_v41 = vsub.f32 %v7569_v36, %v8243_v19  ;;  %v8409_v7 = vld [vmem:[#allocation21_spill] sm:$0xff] }
 0x7f6   :  { %v3446_v12 = vpop.permute.xlu1 %3445  ;;  %5571 = vmatprep.subr.bf16.mxu0 %v7590_v23  ;;  %v7624_v49 = vsub.f32 %v7534_v46, %v3496_v4  ;;  %v3512_v33 = vand.u32 4294901760, %v3439_v2 }
 0x7f7   :  { %v3447_v1 = vsel %vm172_vm8, %v3444_v52, %v3446_v12  ;;  %v3448_v53 = vsel %vm172_vm8, %v3446_v12, %v3444_v52  ;;  %5573 = vmatpush1.bf16.msra.mxu0 %v7584_v15  ;;  %v7626_v52 = vsub.f32 %v3430_v22, %v3506_v28  ;;  %v3608_v4 = vand.u32 4294901760, %v7607_v62 }
 0x7f8   :  { %v3449_v27 = vmul.f32 %v3447_v1, %v8407_v11  ;;  %v3450_v5 = vmul.f32 %v3448_v53, %v8408_v45  ;;  %v3597_v53 = vsub.f32 %v7525_v10, %v3596_v51  ;;  %v3626_v1 = vand.u32 4294901760, %v7599_v37 }
 0x7f9   :  { %v3454_v12 = vpop.permute.xlu0 %3453  ;;  %v3510_v45 = vand.u32 4294901760, %v3440_v60  ;;  %v7637_v22 = vsub.f32 %v3429_v50, %v3508_v61  ;;  %v3586_v51 = vand.u32 4294901760, %v3585_v25  ;;  %v3621_v11 = vsub.f32 %v7582_v47, %v3620_v34 }
 0x7fa   :  { %v3514_v44 = vand.u32 4294901760, %v3450_v5  ;;  %v3516_v31 = vand.u32 4294901760, %v3449_v27  ;;  %v3456_v16 = vpop.permute.xlu1 %3455  ;;  %v3644_v8 = vand.u32 4294901760, %v7626_v52  ;;  %v3614_v9 = vand.u32 4294901760, %v7624_v49 }
 0x7fb   :  { %v3457_v19 = vsel %vm191_vm9, %v3454_v12, %v3456_v16  ;;  %v3458_v46 = vsel %vm191_vm9, %v3456_v16, %v3454_v12  ;;  %v3627_v16 = vsub.f32 %v7599_v37, %v3626_v1  ;;  %v3598_v12 = vand.u32 4294901760, %v3597_v53 }
 0x7fc   :  { %v7639_v28 = vpack.c.bf16 %v3516_v31, %v3512_v33  ;;  %v3459_v21 = vmul.f32 %v3457_v19, %v8409_v7  ;;  %v3460_v59 = vmul.f32 %v3458_v46, %v8410_v29  ;;  %v7644_v18 = vpack.c.bf16 %v3514_v44, %v3510_v45 }
 0x7fd   :  { %v3604_v50 = vand.u32 4294901760, %v3603_v41  ;;  %v7649_v61 = vsub.f32 %v3450_v5, %v3514_v44  ;;  %v3609_v19 = vsub.f32 %v7607_v62, %v3608_v4  ;;  %v3650_v46 = vand.u32 4294901760, %v7637_v22 }
 0x7fe   :  { %v3518_v35 = vand.u32 4294901760, %v3460_v59  ;;  %v3520_v25 = vand.u32 4294901760, %v3459_v21  ;;  %5575 = vmatprep.subr.bf16.mxu0 %v7644_v18  ;;  %v7654_v29 = vsub.f32 %v3440_v60, %v3510_v45  ;;  %v7656_v7 = vsub.f32 %v3439_v2, %v3512_v33 }
 0x7ff   :  { %v7658_v54 = vsub.f32 %v3449_v27, %v3516_v31  ;;  %5577 = vmatpush1.bf16.msra.mxu0 %v7639_v28  ;;  %v8411_v53 = vmov 1.0   ;;  %v3622_v44 = vand.u32 4294901760, %v3621_v11  ;;  %v3645_v20 = vsub.f32 %v7626_v52, %v3644_v8 }
 0x800   :  { %v7662_v41 = vpack.c.bf16 %v8411_v53, %v3518_v35  ;;  %v7665_v5 = vpack.c.bf16 %v8411_v53, %v3520_v25  ;;  %v3615_v57 = vsub.f32 %v7624_v49, %v3614_v9  ;;  %v3575_v60 = vand.u32 4294901760, %v7605_v0 }
 0x801   :  { %v3592_v33 = vand.u32 4294901760, %v7597_v56  ;;  %v8414_v31 = vand.u32 4294901760, %v7575_v26  ;;  %v7674_v27 = vsub.f32 %v3460_v59, %v3518_v35  ;;  %v5584_v45 = vpack.c.bf16 %v3598_v12, %v3586_v51 }
 0x802   :  { %8412 = vst [vmem:[#allocation24_spill] sm:$0xff] %v7662_v41  ;;  %8413 = vst [vmem:[#allocation25_spill] sm:$0xff] %v7665_v5  ;;  %5580 = vmatprep.subr.msk.bf16.mxu0 %vm6272_vm11, %v7662_v41  ;;  %v3610_v11 = vand.u32 4294901760, %v3609_v19  ;;  %v3668_v53 = vand.u32 4294901760, %v7649_v61  ;;  %v3651_v48 = vsub.f32 %v7637_v22, %v3650_v46  ;;  %v3674_v0 = vand.u32 4294901760, %v7658_v54 }
 0x803   :  { %v3633_v2 = vsub.f32 %v7575_v26, %v8414_v31  ;;  %5583 = vmatpush1.bf16.msk.msra.mxu0 %vm6272_vm11, %v7665_v5  ;;  %v5586_v56 = vpack.c.bf16 %v3604_v50, %v3592_v33  ;;  %v3628_v31 = vand.u32 4294901760, %v3627_v16  ;;  %v3662_v35 = vand.u32 4294901760, %v7656_v7 }
 0x804   :  { %5585 = vmatprep.subr.bf16.mxu0 %v5584_v45  ;;  %v5588_v59 = vpack.c.bf16 %v3622_v44, %v3610_v11  ;;  %v3646_v14 = vand.u32 4294901760, %v3645_v20  ;;  %v3656_v51 = vand.u32 4294901760, %v7654_v29  ;;  %v7687_v12 = vsub.f32 %v3459_v21, %v3520_v25 }
 0x805   :  { %v8415_v19 = vand.u32 4294901760, %v7548_v24  ;;  %v7695_v41 = vpack.c.bf16 %v3620_v34, %v3608_v4  ;;  %v7697_v5 = vpack.c.bf16 %v3626_v1, %v3614_v9  ;;  %v3669_v16 = vsub.f32 %v7649_v61, %v3668_v53 }
 0x806   :  { %3576 = vmatmul.mubr.f32.vlgmr.msra.gmra.mrb[4].mxu0 %v3575_v60  ;;  %v3680_v50 = vand.u32 4294901760, %v7674_v27  ;;  %v8417_v20 = vand.u32 4294901760, %v7575_v26  ;;  %v8418_v21 = vand.u32 4294901760, %v7566_v3  ;;  %v7713_v1 = vpack.c.bf16 %v3668_v53, %v3656_v51 }
 0x807   :  { %v7693_v40 = vpack.c.bf16 %v8416_v58, %v8415_v19  ;;  %5587 = vmatpush1.bf16.msra.mxu0 %v5586_v56  ;;  %v3616_v58 = vand.u32 4294901760, %v3615_v57  ;;  %3746 = vmatprep.mubr.f32.mxu0 %v8285_v6  ;;  %v7715_v4 = vpack.c.bf16 %v3674_v0, %v3662_v35  ;;  %v3634_v60 = vand.u32 4294901760, %v3633_v2 }
 0x808   :  { %v7703_v44 = vpack.c.bf16 %v3644_v8, %v8417_v20  ;;  %v7707_v25 = vpack.c.bf16 %v3650_v46, %v8418_v21  ;;  %v8419_v34 = vmov %v8418_v21  ;;  %5589 = vmatprep.subr.bf16.mxu0 %v5588_v59  ;;  %v3657_v8 = vsub.f32 %v7654_v29, %v3656_v51 }
 0x809   :  { %v3639_v9 = vsub.f32 %v7566_v3, %v8419_v34  ;;  %v3675_v33 = vsub.f32 %v7658_v54, %v3674_v0  ;;  %v3686_v46 = vand.u32 4294901760, %v7687_v12  ;;  %v5590_v45 = vpack.c.bf16 %v3628_v31, %v3616_v58 }
 0x80a   :  { %v3652_v57 = vand.u32 4294901760, %v3651_v48  ;;  %v5592_v11 = vpack.c.bf16 %v3646_v14, %v3634_v60  ;;  %v3670_v56 = vand.u32 4294901760, %v3669_v16  ;;  %v3681_v19 = vsub.f32 %v7674_v27, %v3680_v50 }
 0x80b   :  { %v3663_v53 = vsub.f32 %v7656_v7, %v3662_v35  ;;  %5591 = vmatpush1.bf16.msra.mxu0 %v5590_v45  ;;  %v3640_v20 = vand.u32 4294901760, %v3639_v9  ;;  %v3658_v2 = vand.u32 4294901760, %v3657_v8  ;;  %v3687_v0 = vsub.f32 %v7687_v12, %v3686_v46 }
 0x80c   :  { %5593 = vmatprep.subr.bf16.mxu0 %v5592_v11  ;;  %v3676_v51 = vand.u32 4294901760, %v3675_v33  ;;  %v3682_v48 = vand.u32 4294901760, %v3681_v19  ;;  %v5604_v34 = vpack.c.bf16 %v7525_v10, %v7521_v30  ;;  %v5606_v9 = vpack.c.bf16 %v7569_v36, %v7548_v24 }
 0x80d   :  { %v5594_v59 = vpack.c.bf16 %v3652_v57, %v3640_v20  ;;  %v5596_v31 = vpack.c.bf16 %v3670_v56, %v3658_v2  ;;  %v3664_v14 = vand.u32 4294901760, %v3663_v53  ;;  %v3688_v21 = vand.u32 4294901760, %v3687_v0 }
 0x80e   :  { %v5600_v58 = vpack.c.bf16 %v6363_v63, %v3682_v48  ;;  %v5608_v60 = vpack.c.bf16 %v7582_v47, %v7607_v62  ;;  %v5610_v8 = vpack.c.bf16 %v7599_v37, %v7624_v49  ;;  %v5612_v30 = vpack.c.bf16 %v7626_v52, %v7575_v26  ;;  %v8424_v62 = vld [vmem:[#allocation23_spill] sm:$0xff]  ;;  %v8426_v49 = vld [vmem:[#allocation10_spill] sm:$0xff] }
 0x80f   :  { %5595 = vmatpush1.bf16.msra.mxu0 %v5594_v59  ;;  %v5598_v16 = vpack.c.bf16 %v3676_v51, %v3664_v14  ;;  %v5602_v35 = vpack.c.bf16 %v6363_v63, %v3688_v21  ;;  %v5614_v10 = vpack.c.bf16 %v7637_v22, %v7566_v3  ;;  %v5616_v24 = vpack.c.bf16 %v7649_v61, %v7654_v29  ;;  %v8421_v3 = vld [vmem:[#allocation25_spill] sm:$0xff]  ;;  %v8422_v29 = vld [vmem:[#allocation27_spill] sm:$0xff] }
 0x810   :  { %5597 = vmatprep.subr.bf16.mxu0 %v5596_v31  ;;  %v5618_v36 = vpack.c.bf16 %v7658_v54, %v7656_v7  ;;  %v5620_v47 = vpack.c.bf16 %v6033_v17, %v7674_v27  ;;  %v5622_v26 = vpack.c.bf16 %v6033_v17, %v7687_v12  ;;  %v8420_v54 = vld [vmem:[#allocation24_spill] sm:$0xff]  ;;  %v8423_v37 = vand.u32 4294901760, %v7552_v43  ;;  %v5021_v12 = vld [vmem:[%s8154_s3 + $0x28] sm:$0xff]  ;;  %s5018_s3 = sld [smem:[#allocation3 + $0x100]] }
 0x811   :  { %v5662_v7 = vpack.c.bf16 %v8424_v62, %v3680_v50  ;;  %v4292_v56 = vsel %vm226_vm5, %v5021_v12, 0  ;;  %v8430_v48 = vld [vmem:[#allocation11_spill] sm:$0xff] }
 0x812   :  { %v7865_v31 = vand.u32 4294901760, %v4292_v56 }
 0x813   :  { %5599 = vmatpush1.bf16.msra.mxu0 %v5598_v16 }
 0x814   :  { %5601 = vmatprep.subr.bf16.mxu0 %v5600_v58  ;;  %v8431_v58 = vld [vmem:[#allocation12_spill] sm:$0xff] }
 0x817   :  { %5603 = vmatpush1.bf16.msra.mxu0 %v5602_v35 }
 0x818   :  { %5605 = vmatprep.subr.bf16.mxu0 %v5604_v34 }
 0x81a   :  { %3748 = vmatmul.mubr.f32.vlgmr.msra.gmra.mrb[4].mxu0 %v7531_v32 }
 0x81b   :  { %5607 = vmatpush1.bf16.msra.mxu0 %v5606_v9  ;;  %3858 = vmatprep.mubr.f32.mxu0 %v8285_v6 }
 0x81c   :  { %5609 = vmatprep.subr.bf16.mxu0 %v5608_v60  ;;  %v8432_v60 = vld [vmem:[#allocation13_spill] sm:$0xff] }
 0x81f   :  { %5611 = vmatpush1.bf16.msra.mxu0 %v5610_v8 }
 0x820   :  { %5613 = vmatprep.subr.bf16.mxu0 %v5612_v30  ;;  %v8433_v30 = vld [vmem:[#allocation14_spill] sm:$0xff] }
 0x823   :  { %5615 = vmatpush1.bf16.msra.mxu0 %v5614_v10 }
 0x824   :  { %5617 = vmatprep.subr.bf16.mxu0 %v5616_v24 }
 0x827   :  { %5619 = vmatpush1.bf16.msra.mxu0 %v5618_v36 }
 0x828   :  { %5621 = vmatprep.subr.bf16.mxu0 %v5620_v47 }
 0x82b   :  { %5623 = vmatpush1.bf16.msra.mxu0 %v5622_v26 }
 0x82c   :  { %5625 = vmatprep.subr.bf16.mxu0 %v7529_v42 }
 0x82e   :  { %3861 = vmatmul.mubr.f32.vlgmr.msra.gmra.mrb[4].mxu0 %v7552_v43  ;;  %v5664_v43 = vpack.c.bf16 %v8424_v62, %v3686_v46 }
 0x82f   :  { %5627 = vmatpush1.bf16.msra.mxu0 %v7523_v39  ;;  %3951 = vmatprep.mubr.f32.mxu0 %v8285_v6 }
 0x830   :  { %5629 = vmatprep.subr.bf16.mxu0 %v7572_v55 }
 0x833   :  { %5631 = vmatpush1.bf16.msra.mxu0 %v7563_v13 }
 0x834   :  { %5633 = vmatprep.subr.bf16.mxu0 %v7590_v23 }
 0x837   :  { %5635 = vmatpush1.bf16.msra.mxu0 %v7584_v15 }
 0x838   :  { %5637 = vmatprep.subr.bf16.mxu0 %v7644_v18 }
 0x83b   :  { %5639 = vmatpush1.bf16.msra.mxu0 %v7639_v28 }
 0x83c   :  { %5642 = vmatprep.subr.msk.bf16.mxu0 %vm6272_vm11, %v8420_v54 }
 0x83f   :  { %5645 = vmatpush1.bf16.msk.msra.mxu0 %vm6272_vm11, %v8421_v3 }
 0x840   :  { %5647 = vmatprep.subr.bf16.mxu0 %v8422_v29 }
 0x842   :  { %3955 = vmatmul.mubr.f32.vlgmr.msra.gmra.mrb[4].mxu0 %v8423_v37 }
 0x843   :  { %5649 = vmatpush1.bf16.msra.mxu0 %v7693_v40  ;;  %4085 = vmatprep.mubr.f32.mxu0 %v8285_v6 }
 0x844   :  { %5651 = vmatprep.subr.bf16.mxu0 %v7695_v41 }
 0x847   :  { %5653 = vmatpush1.bf16.msra.mxu0 %v7697_v5 }
 0x848   :  { %5655 = vmatprep.subr.bf16.mxu0 %v7703_v44  ;;  %v8428_v44 = vld [vmem:[#allocation7_spill] sm:$0xff] }
 0x84b   :  { %5657 = vmatpush1.bf16.msra.mxu0 %v7707_v25 }
 0x84c   :  { %5659 = vmatprep.subr.bf16.mxu0 %v7713_v1  ;;  %v8429_v1 = vld [vmem:[#allocation8_spill] sm:$0xff] }
 0x84f   :  { %5661 = vmatpush1.bf16.msra.mxu0 %v7715_v4 }
 0x850   :  { %5663 = vmatprep.subr.bf16.mxu0 %v5662_v7 }
 0x853   :  { %5665 = vmatpush1.bf16.msra.mxu0 %v5664_v43 }
 0x854   :  { %5667 = vmatprep.subr.bf16.mxu0 %v7529_v42 }
 0x856   :  { %4087 = vmatmul.mubr.f32.vlgmr.msra.gmra.mrb[4].mxu0 %v7531_v32 }
 0x857   :  { %5669 = vmatpush1.bf16.msra.mxu0 %v7523_v39  ;;  %4177 = vmatprep.mubr.f32.mxu0 %v8285_v6 }
 0x858   :  { %5671 = vmatprep.subr.bf16.mxu0 %v7572_v55 }
 0x85b   :  { %5673 = vmatpush1.bf16.msra.mxu0 %v7563_v13 }
 0x85c   :  { %5675 = vmatprep.subr.bf16.mxu0 %v7590_v23 }
 0x85f   :  { %5677 = vmatpush1.bf16.msra.mxu0 %v7584_v15 }
 0x860   :  { %5679 = vmatprep.subr.bf16.mxu0 %v7644_v18 }
 0x863   :  { %5681 = vmatpush1.bf16.msra.mxu0 %v7639_v28  ;;  %v8427_v28 = vld [vmem:[#allocation9_spill] sm:$0xff] }
 0x864   :  { %5684 = vmatprep.subr.msk.bf16.mxu0 %vm6272_vm11, %v8420_v54 }
 0x867   :  { %5687 = vmatpush1.bf16.msk.msra.mxu0 %vm6272_vm11, %v8421_v3  ;;  %v7886_v3 = vsub.f32 %v4292_v56, %v7865_v31 }
 0x86a   :  { %4179 = vmatmul.mubr.f32.vlgmr.msra.gmra.mrb[4].mxu0 %v7531_v32 }
 0x93d   :  { %v4180_v39 = vpop.f32.mrb[4].mxu0 }
 0x93e   :  { %v7801_v42 = vmax.f32 %v4180_v39, 0.0  ;;  %v4182_v40 = vpop.f32.mrb[5].mxu0 }
 0x93f   :  { %v7803_v13 = vmax.f32 %v4182_v40, 0.0 }
 0x940   :  { %4189 = vrot.lane.b32.xlu0 %v7801_v42, %s5908_s0  ;;  %v4312_v24 = vand.u32 4294901760, %v7801_v42 }
 0x941   :  { %4191 = vrot.lane.b32.xlu1 %v7803_v13, %s5908_s0  ;;  %v4310_v54 = vand.u32 4294901760, %v7803_v13 }
 0x944   :  { %4199 = vrot.lane.b32.xlu0 %v7801_v42, %s5907_s25 }
 0x945   :  { %4201 = vrot.lane.b32.xlu1 %v7803_v13, %s5907_s25 }
 0x948   :  { %4209 = vrot.lane.b32.xlu0 %v7801_v42, %s5910_s28 }
 0x949   :  { %4211 = vrot.lane.b32.xlu1 %v7803_v13, %s5910_s28  ;;  %s5019_s28 = sld [smem:[#allocation3 + $0x101]] }
 0x94c   :  { %4219 = vrot.lane.b32.xlu0 %v7801_v42, %s5911_s29 }
 0x94d   :  { %4221 = vrot.lane.b32.xlu1 %v7803_v13, %s5911_s29 }
 0x950   :  { %4231 = vrot.lane.b32.xlu0 %v7801_v42, %s5912_s30 }
 0x951   :  { %4233 = vrot.lane.b32.xlu1 %v7803_v13, %s5912_s30 }
 0x954   :  { %4241 = vrot.lane.b32.xlu0 %v7801_v42, %s5913_s6 }
 0x955   :  { %4243 = vrot.lane.b32.xlu1 %v7803_v13, %s5913_s6 }
 0x958   :  { %4251 = vrot.lane.b32.xlu0 %v7801_v42, %s5914_s7 }
 0x959   :  { %4253 = vrot.lane.b32.xlu1 %v7803_v13, %s5914_s7 }
 0x95c   :  { %4261 = vrot.lane.b32.xlu0 %v7801_v42, %s5915_s8 }
 0x95d   :  { %4263 = vrot.lane.b32.xlu1 %v7803_v13, %s5915_s8 }
 0x9b2   :  { %v4190_v32 = vpop.permute.xlu0 %4189 }
 0x9b3   :  { %v4192_v18 = vpop.permute.xlu1 %4191 }
 0x9b4   :  { %v4193_v15 = vsel %vm56_vm2, %v4190_v32, %v4192_v18  ;;  %v4194_v23 = vsel %vm56_vm2, %v4192_v18, %v4190_v32 }
 0x9b5   :  { %v4196_v52 = vmul.f32 %v4193_v15, %v8426_v49  ;;  %v4195_v61 = vmul.f32 %v4194_v23, %v8427_v28  ;;  %v7900_v23 = vsub.f32 %v7801_v42, %v4312_v24  ;;  %v8435_v49 = vld [vmem:[#allocation15_spill] sm:$0xff]  ;;  %v8436_v28 = vld [vmem:[#allocation16_spill] sm:$0xff] }
 0x9b6   :  { %v4200_v22 = vpop.permute.xlu0 %4199 }
 0x9b7   :  { %v4202_v41 = vpop.permute.xlu1 %4201  ;;  %v4294_v50 = vand.u32 4294901760, %v4196_v52  ;;  %v4296_v46 = vand.u32 4294901760, %v4195_v61 }
 0x9b8   :  { %v4203_v5 = vsel %vm75_vm1, %v4200_v22, %v4202_v41  ;;  %v4204_v27 = vsel %vm75_vm1, %v4202_v41, %v4200_v22 }
 0x9b9   :  { %v4205_v25 = vmul.f32 %v4204_v27, %v8428_v44  ;;  %v4206_v4 = vmul.f32 %v4203_v5, %v8429_v1  ;;  %v7855_v53 = vsub.f32 %v4196_v52, %v4294_v50  ;;  %v7882_v47 = vsub.f32 %v4195_v61, %v4296_v46 }
 0x9ba   :  { %v4210_v33 = vpop.permute.xlu0 %4209  ;;  %v7909_v27 = vsub.f32 %v7803_v13, %v4310_v54  ;;  %v8251_v1 = vand.u32 4294901760, %v7886_v3 }
 0x9bb   :  { %v4298_v45 = vand.u32 4294901760, %v4206_v4  ;;  %v4300_v57 = vand.u32 4294901760, %v4205_v25  ;;  %v4212_v11 = vpop.permute.xlu1 %4211  ;;  %v4392_v36 = vand.u32 4294901760, %v7855_v53  ;;  %v8254_v12 = vand.u32 4294901760, %v7882_v47 }
 0x9bc   :  { %v4214_v19 = vsel %vm94_vm3, %v4212_v11, %v4210_v33  ;;  %v4213_v0 = vsel %vm94_vm3, %v4210_v33, %v4212_v11  ;;  %v8253_v11 = vand.u32 4294901760, %v7909_v27 }
 0x9bd   :  { %v7857_v20 = vpack.c.bf16 %v4300_v57, %v4296_v46  ;;  %v7859_v2 = vsub.f32 %v4206_v4, %v4298_v45  ;;  %v7863_v51 = vpack.c.bf16 %v4298_v45, %v4294_v50  ;;  %v7868_v14 = vmul.f32 %v4214_v19, %v8430_v48 }
 0x9be   :  { %v4220_v59 = vpop.permute.xlu0 %4219  ;;  %v4216_v35 = vmul.f32 %v4213_v0, %v8431_v58  ;;  %v7903_v22 = vsub.f32 %v4205_v25, %v4300_v57  ;;  %v7931_v19 = vsub.f32 %v7882_v47, %v8254_v12  ;;  %v7939_v58 = vsub.f32 %v7886_v3, %v8251_v1 }
 0x9bf   :  { %v4222_v16 = vpop.permute.xlu1 %4221  ;;  %v4404_v21 = vand.u32 4294901760, %v7859_v2  ;;  %5689 = vmatprep.subr.bf16.mxu1 %v7863_v51  ;;  %v4304_v29 = vand.u32 4294901760, %v7868_v14 }
 0x9c0   :  { %v4223_v34 = vsel %vm113_vm4, %v4220_v59, %v4222_v16  ;;  %v4224_v9 = vsel %vm113_vm4, %v4222_v16, %v4220_v59  ;;  %5691 = vmatpush1.bf16.msra.mxu1 %v7857_v20  ;;  %v4302_v40 = vand.u32 4294901760, %v4216_v35  ;;  %v8252_v46 = vand.u32 4294901760, %v7903_v22  ;;  %v8437_v59 = vld [vmem:[#allocation17_spill] sm:$0xff] }
 0x9c1   :  { %v4225_v8 = vmul.f32 %v4224_v9, %v8432_v60  ;;  %v4226_v10 = vmul.f32 %v4223_v34, %v8433_v30  ;;  %v7891_v39 = vpack.c.bf16 %v4404_v21, %v4392_v36  ;;  %v8438_v9 = vld [vmem:[#allocation18_spill] sm:$0xff]  ;;  %v8447_v62 = vand.u32 4294901760, %v7903_v22 }
 0x9c2   :  { %v4232_v26 = vpop.permute.xlu0 %4231  ;;  %v7941_v34 = vsub.f32 %v4216_v35, %v4302_v40 }
 0x9c3   :  { %v4306_v37 = vand.u32 4294901760, %v4226_v10  ;;  %v4308_v7 = vand.u32 4294901760, %v4225_v8  ;;  %v4234_v43 = vpop.permute.xlu1 %4233  ;;  %8434 = vst [vmem:[#allocation24_spill] sm:$0xff] %v7891_v39 }
 0x9c4   :  { %v4235_v32 = vsel %vm134_vm6, %v4232_v26, %v4234_v43  ;;  %v4236_v18 = vsel %vm134_vm6, %v4234_v43, %v4232_v26  ;;  %v8440_v26 = vld [vmem:[#allocation20_spill] sm:$0xff]  ;;  %v7958_v43 = vsub.f32 %v7868_v14, %v4304_v29 }
 0x9c5   :  { %v7897_v15 = vpack.c.bf16 %v4308_v7, %v4304_v29  ;;  %v4237_v52 = vmul.f32 %v4235_v32, %v8435_v49  ;;  %v4238_v61 = vmul.f32 %v4236_v18, %v8436_v28  ;;  %v7906_v5 = vpack.c.bf16 %v4306_v37, %v4302_v40 }
 0x9c6   :  { %v4242_v41 = vpop.permute.xlu0 %4241  ;;  %v7916_v4 = vsub.f32 %v4226_v10, %v4306_v37  ;;  %v7933_v0 = vsub.f32 %v4225_v8, %v4308_v7  ;;  %v8439_v8 = vld [vmem:[#allocation19_spill] sm:$0xff]  ;;  %v4393_v37 = vsub.f32 %v7855_v53, %v4392_v36  ;;  %v4411_v7 = vsub.f32 %v7903_v22, %v8252_v46 }
 0x9c7   :  { %v4316_v50 = vand.u32 4294901760, %v4237_v52  ;;  %v4244_v44 = vpop.permute.xlu1 %4243  ;;  %v4314_v42 = vand.u32 4294901760, %v4238_v61  ;;  %5693 = vmatprep.subr.bf16.mxu1 %v7906_v5  ;;  %v4405_v18 = vsub.f32 %v7859_v2, %v4404_v21  ;;  %v4416_v29 = vand.u32 4294901760, %v7941_v34 }
 0x9c8   :  { %v4245_v25 = vsel %vm153_vm7, %v4242_v41, %v4244_v44  ;;  %v4246_v13 = vsel %vm153_vm7, %v4244_v44, %v4242_v41  ;;  %5695 = vmatpush1.bf16.msra.mxu1 %v7897_v15  ;;  %v4428_v35 = vand.u32 4294901760, %v7916_v4  ;;  %v4434_v49 = vand.u32 4294901760, %v7933_v0 }
 0x9c9   :  { %v7918_v33 = vpack.c.bf16 %v4316_v50, %v4312_v24  ;;  %v7924_v57 = vpack.c.bf16 %v4314_v42, %v4310_v54  ;;  %v4247_v48 = vmul.f32 %v4245_v25, %v8437_v59  ;;  %v4248_v60 = vmul.f32 %v4246_v13, %v8438_v9  ;;  %v8441_v59 = vld [vmem:[#allocation21_spill] sm:$0xff]  ;;  %v8442_v9 = vld [vmem:[#allocation22_spill] sm:$0xff] }
 0x9ca   :  { %v4252_v45 = vpop.permute.xlu0 %4251  ;;  %v7960_v40 = vsub.f32 %v4238_v61, %v4314_v42  ;;  %v7971_v61 = vsub.f32 %v4237_v52, %v4316_v50  ;;  %v4394_v21 = vand.u32 4294901760, %v4393_v37  ;;  %v4422_v55 = vand.u32 4294901760, %v7958_v43 }
 0x9cb   :  { %v4254_v16 = vpop.permute.xlu1 %4253  ;;  %5697 = vmatprep.subr.bf16.mxu1 %v7924_v57  ;;  %v4320_v28 = vand.u32 4294901760, %v4247_v48  ;;  %v4318_v25 = vand.u32 4294901760, %v4248_v60  ;;  %v4412_v52 = vand.u32 4294901760, %v4411_v7 }
 0x9cc   :  { %v4255_v30 = vsel %vm172_vm8, %v4252_v45, %v4254_v16  ;;  %v4256_v10 = vsel %vm172_vm8, %v4254_v16, %v4252_v45  ;;  %5699 = vmatpush1.bf16.msra.mxu1 %v7918_v33  ;;  %v4429_v45 = vsub.f32 %v7916_v4, %v4428_v35  ;;  %v4423_v46 = vsub.f32 %v7958_v43, %v4422_v55 }
 0x9cd   :  { %v4257_v24 = vmul.f32 %v4255_v30, %v8439_v8  ;;  %v4258_v54 = vmul.f32 %v4256_v10, %v8440_v26  ;;  %v4452_v8 = vand.u32 4294901760, %v7960_v40  ;;  %v4435_v26 = vsub.f32 %v7933_v0, %v4434_v49 }
 0x9ce   :  { %v4262_v32 = vpop.permute.xlu0 %4261 }
 0x9cf   :  { %v4322_v36 = vand.u32 4294901760, %v4258_v54  ;;  %v4324_v41 = vand.u32 4294901760, %v4257_v24  ;;  %v4264_v44 = vpop.permute.xlu1 %4263  ;;  %v4453_v56 = vsub.f32 %v7960_v40, %v4452_v8 }
 0x9d0   :  { %v4265_v13 = vsel %vm191_vm9, %v4262_v32, %v4264_v44  ;;  %v4266_v14 = vsel %vm191_vm9, %v4264_v44, %v4262_v32  ;;  %v4406_v32 = vand.u32 4294901760, %v4405_v18  ;;  %v8443_v18 = vmov 1.0  }
 0x9d1   :  { %v7973_v42 = vpack.c.bf16 %v4324_v41, %v4320_v28  ;;  %v4267_v16 = vmul.f32 %v4265_v13, %v8441_v59  ;;  %v4268_v30 = vmul.f32 %v4266_v14, %v8442_v9  ;;  %v7978_v10 = vpack.c.bf16 %v4322_v36, %v4318_v25 }
 0x9d2   :  { %v7983_v50 = vsub.f32 %v4258_v54, %v4322_v36  ;;  %v4417_v13 = vsub.f32 %v7941_v34, %v4416_v29  ;;  %v4458_v14 = vand.u32 4294901760, %v7971_v61  ;;  %v7988_v59 = vsub.f32 %v4248_v60, %v4318_v25 }
 0x9d3   :  { %v4326_v44 = vand.u32 4294901760, %v4268_v30  ;;  %v4328_v37 = vand.u32 4294901760, %v4267_v16  ;;  %5701 = vmatprep.subr.bf16.mxu1 %v7978_v10  ;;  %v7990_v9 = vsub.f32 %v4247_v48, %v4320_v28  ;;  %v7992_v1 = vsub.f32 %v4257_v24, %v4324_v41 }
 0x9d4   :  { %5703 = vmatpush1.bf16.msra.mxu1 %v7973_v42  ;;  %v4430_v36 = vand.u32 4294901760, %v4429_v45  ;;  %v4383_v60 = vand.u32 4294901760, %v7939_v58  ;;  %v4400_v48 = vand.u32 4294901760, %v7931_v19  ;;  %v4441_v24 = vsub.f32 %v7909_v27, %v8253_v11 }
 0x9d5   :  { %v7996_v7 = vpack.c.bf16 %v8443_v18, %v4326_v44  ;;  %v7999_v54 = vpack.c.bf16 %v8443_v18, %v4328_v37  ;;  %v8008_v28 = vsub.f32 %v4268_v30, %v4326_v44  ;;  %v5710_v41 = vpack.c.bf16 %v4406_v32, %v4394_v21 }
 0x9d6   :  { %v4418_v25 = vand.u32 4294901760, %v4417_v13  ;;  %v4476_v45 = vand.u32 4294901760, %v7983_v50  ;;  %v4459_v18 = vsub.f32 %v7971_v61, %v4458_v14  ;;  %v4482_v58 = vand.u32 4294901760, %v7992_v1 }
 0x9d7   :  { %8444 = vst [vmem:[#allocation25_spill] sm:$0xff] %v7996_v7  ;;  %8445 = vst [vmem:[#allocation27_spill] sm:$0xff] %v7999_v54  ;;  %5706 = vmatprep.subr.msk.bf16.mxu1 %vm6272_vm11, %v7996_v7  ;;  %v5712_v19 = vpack.c.bf16 %v4412_v52, %v4400_v48  ;;  %v4436_v11 = vand.u32 4294901760, %v4435_v26  ;;  %v4470_v30 = vand.u32 4294901760, %v7990_v9  ;;  %v4454_v12 = vand.u32 4294901760, %v4453_v56 }
 0x9d8   :  { %5709 = vmatpush1.bf16.msk.msra.mxu1 %vm6272_vm11, %v7999_v54  ;;  %v5714_v44 = vpack.c.bf16 %v4430_v36, %v4418_v25  ;;  %v4464_v21 = vand.u32 4294901760, %v7988_v59  ;;  %v8021_v32 = vsub.f32 %v4267_v16, %v4328_v37  ;;  %v8446_v13 = vand.u32 4294901760, %v7882_v47 }
 0x9d9   :  { %5711 = vmatprep.subr.bf16.mxu1 %v5710_v41  ;;  %v8029_v7 = vpack.c.bf16 %v4428_v35, %v4416_v29  ;;  %v8031_v54 = vpack.c.bf16 %v4434_v49, %v4422_v55  ;;  %v4477_v26 = vsub.f32 %v7983_v50, %v4476_v45  ;;  %v4488_v52 = vand.u32 4294901760, %v8008_v28 }
 0x9da   :  { %v8027_v39 = vpack.c.bf16 %v8447_v62, %v8446_v13  ;;  %v8448_v56 = vand.u32 4294901760, %v7909_v27  ;;  %v8449_v16 = vand.u32 4294901760, %v7900_v23  ;;  %v4424_v62 = vand.u32 4294901760, %v4423_v46 }
 0x9db   :  { %4384 = vmatmul.mubr.f32.vlgmr.msra.gmra.mrb[4].mxu1 %v4383_v60  ;;  %v8047_v29 = vpack.c.bf16 %v4476_v45, %v4464_v21  ;;  %v8049_v55 = vpack.c.bf16 %v4482_v58, %v4470_v30  ;;  %v4442_v60 = vand.u32 4294901760, %v4441_v24  ;;  %v4483_v48 = vsub.f32 %v7992_v1, %v4482_v58 }
 0x9dc   :  { %v8037_v36 = vpack.c.bf16 %v4452_v8, %v8448_v56  ;;  %v8041_v37 = vpack.c.bf16 %v4458_v14, %v8449_v16  ;;  %5713 = vmatpush1.bf16.msra.mxu1 %v5712_v19  ;;  %v8450_v35 = vmov %v8449_v16  ;;  %4554 = vmatprep.mubr.f32.mxu1 %v8285_v6  ;;  %v4465_v8 = vsub.f32 %v7988_v59, %v4464_v21 }
 0x9dd   :  { %v4447_v49 = vsub.f32 %v7900_v23, %v8450_v35  ;;  %5715 = vmatprep.subr.bf16.mxu1 %v5714_v44  ;;  %v4494_v14 = vand.u32 4294901760, %v8021_v32  ;;  %v5716_v41 = vpack.c.bf16 %v4436_v11, %v4424_v62  ;;  %v4460_v46 = vand.u32 4294901760, %v4459_v18 }
 0x9de   :  { %v5718_v25 = vpack.c.bf16 %v4454_v12, %v4442_v60  ;;  %v4478_v19 = vand.u32 4294901760, %v4477_v26  ;;  %v4489_v13 = vsub.f32 %v8008_v28, %v4488_v52  ;;  %v4471_v45 = vsub.f32 %v7990_v9, %v4470_v30 }
 0x9df   :  { %v4448_v56 = vand.u32 4294901760, %v4447_v49  ;;  %v4466_v24 = vand.u32 4294901760, %v4465_v8  ;;  %v4495_v58 = vsub.f32 %v8021_v32, %v4494_v14  ;;  %v4484_v21 = vand.u32 4294901760, %v4483_v48 }
 0x9e0   :  { %5717 = vmatpush1.bf16.msra.mxu1 %v5716_v41  ;;  %v4490_v18 = vand.u32 4294901760, %v4489_v13  ;;  %v4472_v12 = vand.u32 4294901760, %v4471_v45  ;;  %v5730_v35 = vpack.c.bf16 %v7859_v2, %v7855_v53  ;;  %v5732_v49 = vpack.c.bf16 %v7903_v22, %v7882_v47 }
 0x9e1   :  { %5719 = vmatprep.subr.bf16.mxu1 %v5718_v25  ;;  %v5720_v44 = vpack.c.bf16 %v4460_v46, %v4448_v56  ;;  %v5722_v11 = vpack.c.bf16 %v4478_v19, %v4466_v24  ;;  %v4496_v16 = vand.u32 4294901760, %v4495_v58  ;;  %v5734_v60 = vpack.c.bf16 %v7916_v4, %v7941_v34  ;;  %v8455_v34 = vld [vmem:[#allocation23_spill] sm:$0xff] }
 0x9e2   :  { %v5724_v26 = vpack.c.bf16 %v4484_v21, %v4472_v12  ;;  %v5726_v62 = vpack.c.bf16 %v6363_v63, %v4490_v18  ;;  %v5738_v53 = vpack.c.bf16 %v7960_v40, %v7909_v27  ;;  %v5740_v2 = vpack.c.bf16 %v7971_v61, %v7900_v23  ;;  %v8452_v23 = vld [vmem:[#allocation27_spill] sm:$0xff] }
 0x9e3   :  { %v5728_v30 = vpack.c.bf16 %v6363_v63, %v4496_v16  ;;  %v5736_v63 = vpack.c.bf16 %v7933_v0, %v7958_v43  ;;  %v5742_v47 = vpack.c.bf16 %v7983_v50, %v7988_v59  ;;  %v5744_v22 = vpack.c.bf16 %v7992_v1, %v7990_v9  ;;  %v8453_v1 = vld [vmem:[#allocation24_spill] sm:$0xff] }
 0x9e4   :  { %5721 = vmatpush1.bf16.msra.mxu1 %v5720_v44  ;;  %v5746_v4 = vpack.c.bf16 %v6033_v17, %v8008_v28  ;;  %v5748_v27 = vpack.c.bf16 %v6033_v17, %v8021_v32  ;;  %v8451_v17 = vld [vmem:[#allocation25_spill] sm:$0xff]  ;;  %v8454_v0 = vand.u32 4294901760, %v7886_v3  ;;  %v5788_v43 = vpack.c.bf16 %v8455_v34, %v4488_v52 }
 0x9e5   :  { %5723 = vmatprep.subr.bf16.mxu1 %v5722_v11 }
 0x9e8   :  { %5725 = vmatpush1.bf16.msra.mxu1 %v5724_v26 }
 0x9e9   :  { %5727 = vmatprep.subr.bf16.mxu1 %v5726_v62 }
 0x9ec   :  { %5729 = vmatpush1.bf16.msra.mxu1 %v5728_v30 }
 0x9ed   :  { %5731 = vmatprep.subr.bf16.mxu1 %v5730_v35 }
 0x9ef   :  { %4556 = vmatmul.mubr.f32.vlgmr.msra.gmra.mrb[4].mxu1 %v7865_v31 }
 0x9f0   :  { %5733 = vmatpush1.bf16.msra.mxu1 %v5732_v49  ;;  %4666 = vmatprep.mubr.f32.mxu1 %v8285_v6 }
 0x9f1   :  { %5735 = vmatprep.subr.bf16.mxu1 %v5734_v60 }
 0x9f4   :  { %5737 = vmatpush1.bf16.msra.mxu1 %v5736_v63 }
 0x9f5   :  { %5739 = vmatprep.subr.bf16.mxu1 %v5738_v53 }
 0x9f8   :  { %5741 = vmatpush1.bf16.msra.mxu1 %v5740_v2 }
 0x9f9   :  { %5743 = vmatprep.subr.bf16.mxu1 %v5742_v47 }
 0x9fc   :  { %5745 = vmatpush1.bf16.msra.mxu1 %v5744_v22 }
 0x9fd   :  { %5747 = vmatprep.subr.bf16.mxu1 %v5746_v4 }
 0xa00   :  { %5749 = vmatpush1.bf16.msra.mxu1 %v5748_v27 }
 0xa01   :  { %5751 = vmatprep.subr.bf16.mxu1 %v7863_v51 }
 0xa03   :  { %4669 = vmatmul.mubr.f32.vlgmr.msra.gmra.mrb[4].mxu1 %v7886_v3  ;;  %v5790_v3 = vpack.c.bf16 %v8455_v34, %v4494_v14 }
 0xa04   :  { %5753 = vmatpush1.bf16.msra.mxu1 %v7857_v20  ;;  %4759 = vmatprep.mubr.f32.mxu1 %v8285_v6 }
 0xa05   :  { %5755 = vmatprep.subr.bf16.mxu1 %v7906_v5 }
 0xa08   :  { %5757 = vmatpush1.bf16.msra.mxu1 %v7897_v15 }
 0xa09   :  { %5759 = vmatprep.subr.bf16.mxu1 %v7924_v57 }
 0xa0c   :  { %5761 = vmatpush1.bf16.msra.mxu1 %v7918_v33 }
 0xa0d   :  { %5763 = vmatprep.subr.bf16.mxu1 %v7978_v10 }
 0xa10   :  { %5765 = vmatpush1.bf16.msra.mxu1 %v7973_v42 }
 0xa11   :  { %5768 = vmatprep.subr.msk.bf16.mxu1 %vm6272_vm11, %v8451_v17 }
 0xa14   :  { %5771 = vmatpush1.bf16.msk.msra.mxu1 %vm6272_vm11, %v8452_v23 }
 0xa15   :  { %5773 = vmatprep.subr.bf16.mxu1 %v8453_v1 }
 0xa17   :  { %4763 = vmatmul.mubr.f32.vlgmr.msra.gmra.mrb[4].mxu1 %v8454_v0 }
 0xa18   :  { %5775 = vmatpush1.bf16.msra.mxu1 %v8027_v39  ;;  %4893 = vmatprep.mubr.f32.mxu1 %v8285_v6  ;;  %v4993_v39 = vstv %s5018_s3 }
 0xa19   :  { %5777 = vmatprep.subr.bf16.mxu1 %v8029_v7 }
 0xa1c   :  { %5779 = vmatpush1.bf16.msra.mxu1 %v8031_v54 }
 0xa1d   :  { %5781 = vmatprep.subr.bf16.mxu1 %v8037_v36 }
 0xa20   :  { %5783 = vmatpush1.bf16.msra.mxu1 %v8041_v37 }
 0xa21   :  { %5785 = vmatprep.subr.bf16.mxu1 %v8047_v29 }
 0xa24   :  { %5787 = vmatpush1.bf16.msra.mxu1 %v8049_v55 }
 0xa25   :  { %5789 = vmatprep.subr.bf16.mxu1 %v5788_v43 }
 0xa28   :  { %5791 = vmatpush1.bf16.msra.mxu1 %v5790_v3 }
 0xa29   :  { %5793 = vmatprep.subr.bf16.mxu1 %v7863_v51 }
 0xa2b   :  { %4895 = vmatmul.mubr.f32.vlgmr.msra.gmra.mrb[4].mxu1 %v7865_v31 }
 0xa2c   :  { %5795 = vmatpush1.bf16.msra.mxu1 %v7857_v20  ;;  %4985 = vmatprep.mubr.f32.mxu1 %v8285_v6  ;;  %v5890_v6 = vld [vmem:[%s8153_s2] sm:$0xff]  ;;  %v8456_v20 = vld [vmem:[#allocation28_spill] sm:$0xff] }
 0xa2d   :  { %5797 = vmatprep.subr.bf16.mxu1 %v7906_v5  ;;  %v4996_v51 = vsub.f32 %v5890_v6, %v8456_v20  ;;  %v5891_v5 = vld [vmem:[%s8153_s2 + $0x8] sm:$0xff] }
 0xa30   :  { %5799 = vmatpush1.bf16.msra.mxu1 %v7897_v15  ;;  %v4998_v15 = vstv %s5019_s28 }
 0xa31   :  { %5801 = vmatprep.subr.bf16.mxu1 %v7924_v57  ;;  %v4999_v61 = vmul.f32 %v4998_v15, %v4996_v51 }
 0xa34   :  { %5803 = vmatpush1.bf16.msra.mxu1 %v7918_v33  ;;  %v8457_v33 = vld [vmem:[#allocation26_spill] sm:$0xff] }
 0xa35   :  { %5805 = vmatprep.subr.bf16.mxu1 %v7978_v10  ;;  %v4997_v57 = vsub.f32 %v5891_v5, %v8457_v33 }
 0xa37   :  { %v5000_v10 = vmul.f32 %v4998_v15, %v4997_v57 }
 0xa38   :  { %5807 = vmatpush1.bf16.msra.mxu1 %v7973_v42 }
 0xa39   :  { %5810 = vmatprep.subr.msk.bf16.mxu1 %vm6272_vm11, %v8451_v17 }
 0xa3c   :  { %5813 = vmatpush1.bf16.msk.msra.mxu1 %vm6272_vm11, %v8452_v23 }
 0xa3f   :  { %4987 = vmatmul.mubr.f32.vlgmr.msra.gmra.mrb[4].mxu1 %v7865_v31 }
 0xb12   :  { %v4988_v38 = vpop.f32.mrb[4].mxu1 }
 0xb13   :  { %v4994_v40 = vmul.f32 %v4993_v39, %v4988_v38  ;;  %v4990_v31 = vpop.f32.mrb[5].mxu1 }
 0xb14   :  { %v4995_v42 = vmul.f32 %v4993_v39, %v4990_v31 }
 0xb15   :  { %v5001_v50 = vadd.f32 %v4999_v61, %v4994_v40 }
 0xb16   :  { %v5002_v59 = vadd.f32 %v5000_v10, %v4995_v42 }
 0xb17   :  { %v5003_v9 = vadd.f32 %v5001_v50, %v8456_v20 }
 0xb18   :  { %v5004_v7 = vadd.f32 %v5002_v59, %v8457_v33 }
 0xb19   :  { %5005 = vst [vmem:[%s8156_s5] sm:$0xff] %v5003_v9 }
 0xb1a   :  { %5006 = vst [vmem:[%s8156_s5 + $0x8] sm:$0xff] %v5004_v7 }
 0xb1b   :  { %5011 = vsyncpa [#allocation4], 1 }

</bundles_post_ra>
